<compile_context>
chip_gen: v7x
topology: tpu7x:2x2x1
jax: 0.10.0
libtpu: 0.0.40
codegen_flags: <defaults>
</compile_context>

<pallas_src>
import functools

import numpy as np
import jax
import jax.numpy as jnp
from jax.experimental import pallas as pl
from jax.experimental.pallas import tpu as pltpu

# ----------------------------- configuration --------------------------------
BATCH = 4
SEQ = 128          # enough rows for block_m=256 and a 2-step row grid (feeds both v7x TCs)
DIM = 128          # model dim (lane-aligned -> unmasked, lane-dense stores)
HIDDEN_DIM = 256   # FFN hidden dim


def _round_up(x, m):
    return (x + m - 1) // m * m


# ------------------------------ in-kernel math -------------------------------
def _gelu_exact(x):
    # torch.nn.GELU() default (approximate='none'): 0.5 * x * (1 + erf(x / sqrt(2)))
    # erf via Abramowitz & Stegun 7.1.26 on |z| (max abs err ~1.5e-7):
    #   erf(|z|) = 1 - poly(t) * exp(-z^2),  t = 1/(1 + p|z|)
    # Odd symmetry folded into a single select:
    #   1 + erf(z) = (2 - q) if z >= 0 else q,   q = poly(t) * exp(-z^2)
    # reciprocal -> EUP (approx), exp -> EUP; rest is VPU mul/add + one select.
    z = x * 0.7071067811865476
    az = jnp.abs(z)
    t = pl.reciprocal(1.0 + 0.3275911 * az, approx=True)
    poly = ((((1.061405429 * t - 1.453152027) * t + 1.421413741) * t
             - 0.284496736) * t + 0.254829592) * t
    q = poly * jnp.exp(-az * az)
    one_plus_erf = jnp.where(z >= 0.0, 2.0 - q, q)
    return 0.5 * x * one_plus_erf


# ------------------------------ Pallas kernel ---------------------------------
def _ffn_kernel(x_ref, w1_ref, b1_ref, w2_ref, b2_ref, o_ref, *, hidden_chunk):
    # x_ref : (block_m, dim)   bf16 row tile of flattened tokens (pipelined over the grid)
    # w1_ref: (dim, hidden)    bf16, whole array resident in VMEM (single copy)
    # b1_ref: (1, hidden)      f32
    # w2_ref: (hidden, dim)    bf16, whole array resident in VMEM (single copy)
    # b2_ref: (1, dim)         f32
    # o_ref : (block_m, dim)   output dtype (f32)
    x = x_ref[...]                                   # (bm, dim) bf16
    hidden = w1_ref.shape[1]
    acc = jnp.zeros(o_ref.shape, jnp.float32)        # (bm, dim) f32 accumulator
    # Chunk the hidden axis so the f32 activation live range is (bm, hidden_chunk),
    # not (bm, hidden): keeps vreg pressure down at block_m=256.
    for c in range(0, hidden, hidden_chunk):
        h = jnp.dot(x, w1_ref[:, c:c + hidden_chunk],
                    preferred_element_type=jnp.float32)          # (bm, ck) f32
        h = h + b1_ref[:, c:c + hidden_chunk]
        g = _gelu_exact(h)                                       # f32 GELU (v5e-safe)
        # Dropout(p=0.0) is the identity -> nothing to do.
        acc = acc + jnp.dot(g.astype(jnp.bfloat16),
                            w2_ref[c:c + hidden_chunk, :],
                            preferred_element_type=jnp.float32)  # (bm, dim) f32
    o_ref[...] = (acc + b2_ref[...]).astype(o_ref.dtype)


# ------------------------------ wrapper ---------------------------------------
def feed_forward(x, w1, b1, w2, b2, *, block_m=256, hidden_chunk=128):
    """Fused Linear -> GELU(exact) -> Linear.  x: (..., dim)."""
    orig_shape = x.shape
    orig_dtype = x.dtype
    dim = orig_shape[-1]
    hidden = w1.shape[1]

    # bf16 operand storage (f32 accumulation inside the kernel); biases stay f32.
    xm = x.reshape(-1, dim).astype(jnp.bfloat16)
    w1b = w1.astype(jnp.bfloat16)
    w2b = w2.astype(jnp.bfloat16)
    b1r = b1.reshape(1, hidden).astype(jnp.float32)
    b2r = b2.reshape(1, dim).astype(jnp.float32)

    m = xm.shape[0]
    # Row tile: keep it big enough to fill the MXU M axis; only shrink (to a sublane
    # multiple) when the whole problem is smaller than one tile.
    bm = min(block_m, _round_up(m, 8))
    m_pad = _round_up(m, bm)
    if m_pad != m:
        xm = jnp.pad(xm, ((0, m_pad - m), (0, 0)))   # zero rows -> finite through GELU

    ck = hidden_chunk if hidden % hidden_chunk == 0 else hidden
    grid = (m_pad // bm,)

    # Whole-array VMEM residency for the loop-invariant operands: one copy, no
    # per-step pipelining / double-buffering.
    vmem_whole = pl.BlockSpec(memory_space=pltpu.MemorySpace.VMEM)

    out = pl.pallas_call(
        functools.partial(_ffn_kernel, hidden_chunk=ck),
        out_shape=jax.ShapeDtypeStruct((m_pad, dim), orig_dtype),
        grid=grid,
        in_specs=[
            pl.BlockSpec((bm, dim), lambda i: (i, 0)),   # x: pipelined row tiles
            vmem_whole,                                  # w1
            vmem_whole,                                  # b1
            vmem_whole,                                  # w2
            vmem_whole,                                  # b2
        ],
        out_specs=pl.BlockSpec((bm, dim), lambda i: (i, 0)),
        compiler_params=pltpu.CompilerParams(dimension_semantics=("parallel",)),
    )(xm, w1b, b1r, w2b, b2r)

    if m_pad != m:
        out = out[:m]
    return out.reshape(orig_shape)


# ------------------------------ parameters ------------------------------------
def init_params(key, dim, hidden_dim):
    k1, k2, k3, k4 = jax.random.split(key, 4)
    w1 = jax.random.normal(k1, (dim, hidden_dim), jnp.float32) / np.sqrt(dim)
    b1 = jax.random.normal(k2, (hidden_dim,), jnp.float32) * 0.01
    w2 = jax.random.normal(k3, (hidden_dim, dim), jnp.float32) / np.sqrt(hidden_dim)
    b2 = jax.random.normal(k4, (dim,), jnp.float32) * 0.01
    return w1, b1, w2, b2


# ------------------------------ pure-JAX reference ----------------------------
def forward_ref(x, w1, b1, w2, b2):
    h = jnp.dot(x, w1) + b1
    h = jax.nn.gelu(h, approximate=False)   # exact erf GELU, like torch.nn.GELU()
    return jnp.dot(h, w2) + b2


# ---------------------------------- main --------------------------------------
if __name__ == "__main__":
    key = jax.random.PRNGKey(0)
    kp, kx = jax.random.split(key, 2)
    w1, b1, w2, b2 = init_params(kp, DIM, HIDDEN_DIM)
    x = jax.random.normal(kx, (BATCH, SEQ, DIM), jnp.float32)

    out = jax.block_until_ready(feed_forward(x, w1, b1, w2, b2))
    assert out.shape == (BATCH, SEQ, DIM)

    ref = forward_ref(x, w1, b1, w2, b2)
    # Tolerance covers bf16 operand storage (same precision class as default-precision
    # f32 MXU passes) vs. the f32 reference.
    np.testing.assert_allclose(np.asarray(out), np.asarray(ref), rtol=3e-2, atol=3e-2)

    print("KERNEL_OK")
</pallas_src>

<mosaic_0001>
module attributes {stable_mosaic.version = 11 : i64} {
  func.func @_ffn_kernel(%arg0: i32, %arg1: memref<256x128xbf16, #tpu.memory_space<vmem>>, %arg2: memref<128x256xbf16, #tpu.memory_space<vmem>>, %arg3: memref<1x256xf32, #tpu.memory_space<vmem>>, %arg4: memref<256x128xbf16, #tpu.memory_space<vmem>>, %arg5: memref<1x128xf32, #tpu.memory_space<vmem>>, %arg6: memref<256x128xf32, #tpu.memory_space<vmem>>) attributes {dimension_semantics = [#tpu.dimension_semantics<parallel>], iteration_bounds = array<i64: 2>, scalar_prefetch = 0 : i64, scratch_operands = 0 : i64, tpu.core_type = #tpu.core_type<tc>, window_params = [{transform_indices = @transform_0, window_bounds = array<i64: 256, 128>}, {pipeline_mode = #tpu.pipeline_mode<synchronous>, transform_indices = @transform_1, window_bounds = array<i64: 128, 256>}, {pipeline_mode = #tpu.pipeline_mode<synchronous>, transform_indices = @transform_2, window_bounds = array<i64: 1, 256>}, {pipeline_mode = #tpu.pipeline_mode<synchronous>, transform_indices = @transform_3, window_bounds = array<i64: 256, 128>}, {pipeline_mode = #tpu.pipeline_mode<synchronous>, transform_indices = @transform_4, window_bounds = array<i64: 1, 128>}, {transform_indices = @transform_5, window_bounds = array<i64: 256, 128>}]} {
    %c0 = arith.constant 0 : index
    %c0_0 = arith.constant 0 : index
    %0 = vector.load %arg1[%c0, %c0_0] : memref<256x128xbf16, #tpu.memory_space<vmem>>, vector<256x128xbf16>
    %cst = arith.constant 0.000000e+00 : f32
    %1 = vector.broadcast %cst : f32 to vector<256x128xf32>
    %c0_1 = arith.constant 0 : index
    %c0_2 = arith.constant 0 : index
    %2 = vector.load %arg2[%c0_1, %c0_2] : memref<128x256xbf16, #tpu.memory_space<vmem>>, vector<128x128xbf16>
    %cst_3 = arith.constant dense<0.000000e+00> : vector<256x128xf32>
    %3 = tpu.matmul %0, %2, %cst_3 {dimension_numbers = #tpu.dot_dimension_numbers<[1], [0], [0], [1], [0, 0, 1, 1], [], []>} : vector<256x128xbf16>, vector<128x128xbf16>, vector<256x128xf32> -> vector<256x128xf32>
    %c0_4 = arith.constant 0 : index
    %c0_5 = arith.constant 0 : index
    %4 = vector.load %arg3[%c0_4, %c0_5] : memref<1x256xf32, #tpu.memory_space<vmem>>, vector<1x128xf32>
    %5 = vector.broadcast %4 : vector<1x128xf32> to vector<256x128xf32>
    %6 = arith.addf %3, %5 : vector<256x128xf32>
    %cst_6 = arith.constant 0.707106769 : f32
    %7 = vector.broadcast %cst_6 : f32 to vector<256x128xf32>
    %8 = arith.mulf %6, %7 : vector<256x128xf32>
    %9 = math.absf %8 : vector<256x128xf32>
    %cst_7 = arith.constant 0.327591091 : f32
    %10 = vector.broadcast %cst_7 : f32 to vector<256x128xf32>
    %11 = arith.mulf %10, %9 : vector<256x128xf32>
    %cst_8 = arith.constant 1.000000e+00 : f32
    %12 = vector.broadcast %cst_8 : f32 to vector<256x128xf32>
    %13 = arith.addf %12, %11 : vector<256x128xf32>
    %14 = tpu.reciprocal %13 {approx = true} : vector<256x128xf32> -> vector<256x128xf32>
    %cst_9 = arith.constant 1.06140542 : f32
    %15 = vector.broadcast %cst_9 : f32 to vector<256x128xf32>
    %16 = arith.mulf %15, %14 : vector<256x128xf32>
    %cst_10 = arith.constant 1.45315206 : f32
    %17 = vector.broadcast %cst_10 : f32 to vector<256x128xf32>
    %18 = arith.subf %16, %17 : vector<256x128xf32>
    %19 = arith.mulf %18, %14 : vector<256x128xf32>
    %cst_11 = arith.constant 1.42141378 : f32
    %20 = vector.broadcast %cst_11 : f32 to vector<256x128xf32>
    %21 = arith.addf %19, %20 : vector<256x128xf32>
    %22 = arith.mulf %21, %14 : vector<256x128xf32>
    %cst_12 = arith.constant 0.284496725 : f32
    %23 = vector.broadcast %cst_12 : f32 to vector<256x128xf32>
    %24 = arith.subf %22, %23 : vector<256x128xf32>
    %25 = arith.mulf %24, %14 : vector<256x128xf32>
    %cst_13 = arith.constant 0.254829586 : f32
    %26 = vector.broadcast %cst_13 : f32 to vector<256x128xf32>
    %27 = arith.addf %25, %26 : vector<256x128xf32>
    %28 = arith.mulf %27, %14 : vector<256x128xf32>
    %cst_14 = arith.constant 0.000000e+00 : f32
    %29 = vector.broadcast %cst_14 : f32 to vector<256x128xf32>
    %30 = arith.subf %29, %9 : vector<256x128xf32>
    %31 = arith.mulf %30, %9 : vector<256x128xf32>
    %32 = math.exp %31 : vector<256x128xf32>
    %33 = arith.mulf %28, %32 : vector<256x128xf32>
    %cst_15 = arith.constant 0.000000e+00 : f32
    %34 = vector.broadcast %cst_15 : f32 to vector<256x128xf32>
    %35 = arith.cmpf oge, %8, %34 : vector<256x128xf32>
    %cst_16 = arith.constant 2.000000e+00 : f32
    %36 = vector.broadcast %cst_16 : f32 to vector<256x128xf32>
    %37 = arith.subf %36, %33 : vector<256x128xf32>
    %38 = arith.select %35, %37, %33 : vector<256x128xi1>, vector<256x128xf32>
    %cst_17 = arith.constant 5.000000e-01 : f32
    %39 = vector.broadcast %cst_17 : f32 to vector<256x128xf32>
    %40 = arith.mulf %39, %6 : vector<256x128xf32>
    %41 = arith.mulf %40, %38 : vector<256x128xf32>
    %42 = arith.truncf %41 : vector<256x128xf32> to vector<256x128xbf16>
    %c0_18 = arith.constant 0 : index
    %c0_19 = arith.constant 0 : index
    %43 = vector.load %arg4[%c0_18, %c0_19] : memref<256x128xbf16, #tpu.memory_space<vmem>>, vector<128x128xbf16>
    %cst_20 = arith.constant dense<0.000000e+00> : vector<256x128xf32>
    %44 = tpu.matmul %42, %43, %cst_20 {dimension_numbers = #tpu.dot_dimension_numbers<[1], [0], [0], [1], [0, 0, 1, 1], [], []>} : vector<256x128xbf16>, vector<128x128xbf16>, vector<256x128xf32> -> vector<256x128xf32>
    %45 = arith.addf %1, %44 : vector<256x128xf32>
    %c0_21 = arith.constant 0 : index
    %c128 = arith.constant 128 : index
    %46 = vector.load %arg2[%c0_21, %c128] : memref<128x256xbf16, #tpu.memory_space<vmem>>, vector<128x128xbf16>
    %cst_22 = arith.constant dense<0.000000e+00> : vector<256x128xf32>
    %47 = tpu.matmul %0, %46, %cst_22 {dimension_numbers = #tpu.dot_dimension_numbers<[1], [0], [0], [1], [0, 0, 1, 1], [], []>} : vector<256x128xbf16>, vector<128x128xbf16>, vector<256x128xf32> -> vector<256x128xf32>
    %c0_23 = arith.constant 0 : index
    %c128_24 = arith.constant 128 : index
    %48 = vector.load %arg3[%c0_23, %c128_24] : memref<1x256xf32, #tpu.memory_space<vmem>>, vector<1x128xf32>
    %49 = vector.broadcast %48 : vector<1x128xf32> to vector<256x128xf32>
    %50 = arith.addf %47, %49 : vector<256x128xf32>
    %cst_25 = arith.constant 0.707106769 : f32
    %51 = vector.broadcast %cst_25 : f32 to vector<256x128xf32>
    %52 = arith.mulf %50, %51 : vector<256x128xf32>
    %53 = math.absf %52 : vector<256x128xf32>
    %cst_26 = arith.constant 0.327591091 : f32
    %54 = vector.broadcast %cst_26 : f32 to vector<256x128xf32>
    %55 = arith.mulf %54, %53 : vector<256x128xf32>
    %cst_27 = arith.constant 1.000000e+00 : f32
    %56 = vector.broadcast %cst_27 : f32 to vector<256x128xf32>
    %57 = arith.addf %56, %55 : vector<256x128xf32>
    %58 = tpu.reciprocal %57 {approx = true} : vector<256x128xf32> -> vector<256x128xf32>
    %cst_28 = arith.constant 1.06140542 : f32
    %59 = vector.broadcast %cst_28 : f32 to vector<256x128xf32>
    %60 = arith.mulf %59, %58 : vector<256x128xf32>
    %cst_29 = arith.constant 1.45315206 : f32
    %61 = vector.broadcast %cst_29 : f32 to vector<256x128xf32>
    %62 = arith.subf %60, %61 : vector<256x128xf32>
    %63 = arith.mulf %62, %58 : vector<256x128xf32>
    %cst_30 = arith.constant 1.42141378 : f32
    %64 = vector.broadcast %cst_30 : f32 to vector<256x128xf32>
    %65 = arith.addf %63, %64 : vector<256x128xf32>
    %66 = arith.mulf %65, %58 : vector<256x128xf32>
    %cst_31 = arith.constant 0.284496725 : f32
    %67 = vector.broadcast %cst_31 : f32 to vector<256x128xf32>
    %68 = arith.subf %66, %67 : vector<256x128xf32>
    %69 = arith.mulf %68, %58 : vector<256x128xf32>
    %cst_32 = arith.constant 0.254829586 : f32
    %70 = vector.broadcast %cst_32 : f32 to vector<256x128xf32>
    %71 = arith.addf %69, %70 : vector<256x128xf32>
    %72 = arith.mulf %71, %58 : vector<256x128xf32>
    %cst_33 = arith.constant 0.000000e+00 : f32
    %73 = vector.broadcast %cst_33 : f32 to vector<256x128xf32>
    %74 = arith.subf %73, %53 : vector<256x128xf32>
    %75 = arith.mulf %74, %53 : vector<256x128xf32>
    %76 = math.exp %75 : vector<256x128xf32>
    %77 = arith.mulf %72, %76 : vector<256x128xf32>
    %cst_34 = arith.constant 0.000000e+00 : f32
    %78 = vector.broadcast %cst_34 : f32 to vector<256x128xf32>
    %79 = arith.cmpf oge, %52, %78 : vector<256x128xf32>
    %cst_35 = arith.constant 2.000000e+00 : f32
    %80 = vector.broadcast %cst_35 : f32 to vector<256x128xf32>
    %81 = arith.subf %80, %77 : vector<256x128xf32>
    %82 = arith.select %79, %81, %77 : vector<256x128xi1>, vector<256x128xf32>
    %cst_36 = arith.constant 5.000000e-01 : f32
    %83 = vector.broadcast %cst_36 : f32 to vector<256x128xf32>
    %84 = arith.mulf %83, %50 : vector<256x128xf32>
    %85 = arith.mulf %84, %82 : vector<256x128xf32>
    %86 = arith.truncf %85 : vector<256x128xf32> to vector<256x128xbf16>
    %c128_37 = arith.constant 128 : index
    %c0_38 = arith.constant 0 : index
    %87 = vector.load %arg4[%c128_37, %c0_38] : memref<256x128xbf16, #tpu.memory_space<vmem>>, vector<128x128xbf16>
    %cst_39 = arith.constant dense<0.000000e+00> : vector<256x128xf32>
    %88 = tpu.matmul %86, %87, %cst_39 {dimension_numbers = #tpu.dot_dimension_numbers<[1], [0], [0], [1], [0, 0, 1, 1], [], []>} : vector<256x128xbf16>, vector<128x128xbf16>, vector<256x128xf32> -> vector<256x128xf32>
    %89 = arith.addf %45, %88 : vector<256x128xf32>
    %c0_40 = arith.constant 0 : index
    %c0_41 = arith.constant 0 : index
    %90 = vector.load %arg5[%c0_40, %c0_41] : memref<1x128xf32, #tpu.memory_space<vmem>>, vector<1x128xf32>
    %91 = vector.broadcast %90 : vector<1x128xf32> to vector<256x128xf32>
    %92 = arith.addf %89, %91 : vector<256x128xf32>
    %c0_42 = arith.constant 0 : index
    %c0_43 = arith.constant 0 : index
    %93 = vector.load %arg6[%c0_42, %c0_43] : memref<256x128xf32, #tpu.memory_space<vmem>>, vector<256x128xf32>
    tpu.vector_store %arg6[%c0_42, %c0_43], %92 {strides = array<i32>} : memref<256x128xf32, #tpu.memory_space<vmem>>, vector<256x128xf32>,
    return
  }
  func.func @transform_0(%arg0: i32) -> (i32, i32) {
    %c0_i32 = arith.constant 0 : i32
    %c0_i32_0 = arith.constant 0 : i32
    return %arg0, %c0_i32 : i32, i32
  }
  func.func @transform_1(%arg0: i32) -> (i32, i32) {
    %c0_i32 = arith.constant 0 : i32
    %c0_i32_0 = arith.constant 0 : i32
    %c0_i32_1 = arith.constant 0 : i32
    return %c0_i32, %c0_i32_0 : i32, i32
  }
  func.func @transform_2(%arg0: i32) -> (i32, i32) {
    %c0_i32 = arith.constant 0 : i32
    %c0_i32_0 = arith.constant 0 : i32
    %c0_i32_1 = arith.constant 0 : i32
    return %c0_i32, %c0_i32_0 : i32, i32
  }
  func.func @transform_3(%arg0: i32) -> (i32, i32) {
    %c0_i32 = arith.constant 0 : i32
    %c0_i32_0 = arith.constant 0 : i32
    %c0_i32_1 = arith.constant 0 : i32
    return %c0_i32, %c0_i32_0 : i32, i32
  }
  func.func @transform_4(%arg0: i32) -> (i32, i32) {
    %c0_i32 = arith.constant 0 : i32
    %c0_i32_0 = arith.constant 0 : i32
    %c0_i32_1 = arith.constant 0 : i32
    return %c0_i32, %c0_i32_0 : i32, i32
  }
  func.func @transform_5(%arg0: i32) -> (i32, i32) {
    %c0_i32 = arith.constant 0 : i32
    %c0_i32_0 = arith.constant 0 : i32
    return %arg0, %c0_i32 : i32, i32
  }
}

</mosaic_0001>

<bundles_post_ra>
// kernel: tpu_custom_call.1
= control target key start
LH: loop header
LB: loop body
LE: loop exit
PB: predicated region body
PF: predicated region fallthrough
CT: control target
= control target key end

     0   :  { %10 = vsyncpa [#allocation3], 0  ;;  %s6505_s0 = inlined_call_operand.hbm [shape: bf16[512,128], index: 0, kind: input, shape index: {}]   ;;  %s6506_s1 = inlined_call_operand.hbm [shape: bf16[128,256], index: 1, kind: input, shape index: {}]   ;;  %s6507_s2 = inlined_call_operand.vmem [shape: f32[1,256], index: 2, kind: input, shape index: {}]   ;;  %s6508_s3 = inlined_call_operand.hbm [shape: bf16[256,128], index: 3, kind: input, shape index: {}]   ;;  %s6509_s4 = inlined_call_operand.vmem [shape: f32[1,128], index: 4, kind: input, shape index: {}]   ;;  %s6510_s5 = inlined_call_operand.hbm [shape: f32[512,128], index: 5, kind: output, shape index: {}]  }
   0x1   :  { %12 = vsyncpa [#allocation3 + $0x1], 0 }
   0x2   :  { %13 = vsyncpa [#allocation6], 0 }
   0x3   :  { %14 = vsyncpa [#allocation4], 0 }
   0x4   :  { %16 = vsyncpa [#allocation4 + $0x1], 0  ;;  %s4159_s18 = smov 0   ;;  %s4161_s19 = smov 0  }
   0x5   :  { %s4163_s20 = smov 0   ;;  %s4165_s21 = smov 0  }
   0x6 LB: > { %s4180_s22 = sadd.s32 4294967295, %s4117_s21   ;;  %s3062_s23 = sadd.s32 4294967294, %s4117_s21   ;;  %s4117_s21 = sphi %s4165_s21, %s6797_s21   ;;  %s4113_s20 = sphi %s4163_s20, %s6796_s20   ;;  %s4109_s19 = sphi %s4161_s19, %s6795_s19   ;;  %s4105_s18 = sphi %s4159_s18, %s6794_s18  }
   0x7   : > { %p42_p0 = scmp.ne.s32.totalorder %s4109_s19, %s4105_s18  ;;  %p6511_p1 = scmp.eq.s32.totalorder %s4180_s22, 0 }
   0x8   : > { %p156_p3 = scmp.eq.s32.totalorder %s3062_s23, 1  ;;  %p3063_p5 = scmp.ge.s32.totalorder %s4117_s21, 1 }
   0x9   : > { %p4189_p4 = por %p6511_p1, %p42_p0  ;;  %p163_p7 = scmp.lt.s32.totalorder %s4117_s21, 3 }
   0xa   : > { %p4194_p6 = por %p156_p3, %p42_p0  ;;  %s4119_s27 = smov [#allocation5]  }
   0xb   : > { %s6563_s24 = scalar_select %p4189_p4, 1, 0 }
   0xc   : > { %s6564_s25 = scalar_select %p4194_p6, 1, 0 }
   0xd   : > { %p4199_p8 = pnand %p3063_p5, %p163_p7  ;;  %s175_s28 = sshll.u32 %s4119_s27, 4  ;;  %s4203_s28 = int_to_ptr.vmem [resolvable:$true] %s175_s28 }
   0xe   : > { %s4120_s30 = smov [#allocation7]   ;;  %s3961_s9 = scalar_lea.hbm %s6506_s1, 2048 }
   0xf   : > { %p3593_p9 = pneg %p4199_p8  ;;  %s191_s6 = sshll.u32 %s4120_s30, 4  ;;  %s4214_s6 = int_to_ptr.vmem [resolvable:$true] %s191_s6 }
  0x10   : > { %p3962_p12 = scmp.ne.s32.totalorder %s6506_s1, %s3961_s9  ;;  %p3968_p5 = scmp.lt.u32.totalorder %s3961_s9, %s6506_s1 }
  0x11   : > { %p4210_p11 = pnand %p3593_p9, %p6511_p1 }
  0x13   : > { %p3963_p13 = pneg %p4210_p11 }
  0x15   : > { %p3964_p0 = pnand %p3963_p13, %p3962_p12 }
  0x17   : > { %p3965_p3 = pneg %p3964_p0 }
  0x19   : > { %p3970_p7 = pnand %p3968_p5, %p3965_p3 }
  0x1b   : > { %3973 = shalt.err (!%p3970_p7)
}
  0x1c   : > { %s3974_s14 = scalar_lea.vmem %s4203_s28, 2048  ;;  %p3982_p2 = scmp.lt.s32.totalorder %s4203_s28, %s4203_s28 }
  0x1d   : > { %p3975_p9 = scmp.ne.s32.totalorder %s4203_s28, %s3974_s14  ;;  %p3983_p12 = scmp.lt.s32.totalorder %s3974_s14, %s3974_s14 }
  0x1f   : > { %p3977_p10 = pnand %p3975_p9, %p3963_p13  ;;  %p3984_p0 = por %p3983_p12, %p3982_p2 }
  0x21   : > { %p3978_p1 = pneg %p3977_p10 }
  0x23   : > { %p3985_p6 = pnand %p3984_p0, %p3978_p1 }
  0x25   : > { %3988 = shalt.err (!%p3985_p6)
}
  0x26   : > { %s4121_s15 = smov 128   ;;  %s4122_s16 = smov 8  }
  0x27   : > { %3596 = dma.hbm_to_vmem [thread:$0]  (!%p4210_p11), %s6506_s1, 2048, %s4203_s28, [#allocation6], %s4121_s15, %s4121_s15, %s4122_s16  }
  0x28   : > { %s3989_s7 = scalar_lea.hbm %s6508_s3, 2048 }
  0x29   : > { %p3990_p2 = scmp.ne.s32.totalorder %s6508_s3, %s3989_s7  ;;  %p3996_p10 = scmp.lt.u32.totalorder %s3989_s7, %s6508_s3 }
  0x2b   : > { %p3992_p1 = pnand %p3990_p2, %p3963_p13 }
  0x2d   : > { %p3993_p6 = pneg %p3992_p1 }
  0x2f   : > { %p3998_p3 = pnand %p3996_p10, %p3993_p6 }
  0x31   : > { %4001 = shalt.err (!%p3998_p3)
}
  0x32   : > { %s4002_s28 = scalar_lea.vmem %s4214_s6, 2048  ;;  %p4010_p12 = scmp.lt.s32.totalorder %s4214_s6, %s4214_s6 }
  0x33   : > { %p4003_p5 = scmp.ne.s32.totalorder %s4214_s6, %s4002_s28  ;;  %p4011_p0 = scmp.lt.s32.totalorder %s4002_s28, %s4002_s28 }
  0x35   : > { %p4005_p7 = pnand %p4003_p5, %p3963_p13  ;;  %p4012_p2 = por %p4011_p0, %p4010_p12 }
  0x37   : > { %p4006_p9 = pneg %p4005_p7 }
  0x39   : > { %p4013_p1 = pnand %p4012_p2, %p4006_p9 }
  0x3b   : > { %4016 = shalt.err (!%p4013_p1)
}
  0x3c   : > { %s4123_s12 = smov 64   ;;  %s4124_s13 = smov 4  }
  0x3d   : > { %3599 = dma.hbm_to_vmem [thread:$0]  (!%p4210_p11), %s6508_s3, 2048, %s4214_s6, [#allocation6], %s4123_s12, %s4123_s12, %s4124_s13  }
  0x3e   : > { %s4272_s16 = sadd.s32 1, %s4117_s21   ;;  %s29_s23 = sadd.s32 1, %s4113_s20 }
  0x3f   : > { %s26_s17 = ssub.s32 %s4117_s21, %s4272_s16  ;;  %p36_p6 = scmp.ne.s32.totalorder %s4113_s20, %s4109_s19 }
  0x40   : > { %p27_p13 = scmp.eq.s32.totalorder %s26_s17, 0  ;;  %p37_p10 = scmp.eq.s32.totalorder %s4117_s21, 0 }
  0x41   : > { %p6567_p5 = scmp.eq.s32.totalorder %s4180_s22, 1  ;;  %p3610_p9 = scmp.lt.s32.totalorder %s4117_s21, 2 }
  0x42   : > { %s4281_s27 = scalar_select %p27_p13, %s4113_s20, %s29_s23  }
  0x43   : > { %p38_p3 = por %p37_p10, %p36_p6  ;;  %p4285_p7 = por %p6567_p5, %p36_p6 }
  0x44   : > { %s208_s30 = sand.u32 1, %s4113_s20   ;;  %s3259_s6 = sshll.u32 %s4117_s21, 11 }
  0x45   : > { %s6568_s29 = scalar_select %p4285_p7, 1, 0 }
  0x46   : > { %s3067_s7 = sshll.u32 %s208_s30, 7  ;;  %s4295_s10 = scalar_lea.hbm %s6505_s0, %s3259_s6 }
  0x47   : > { %s212_s11 = scalar_lea.vmem [#allocation2], %s3067_s7  ;;  %p4299_p11 = pnand %p3610_p9, %p38_p3 }
  0x48   : > { %s219_s28 = sshll.u32 %s212_s11, 4  ;;  %s4303_s15 = scalar_lea.sflag [#allocation3], %s208_s30  ;;  %s4297_s28 = int_to_ptr.vmem [resolvable:$true] %s219_s28 }
  0x49   : > { %s4017_s17 = scalar_lea.hbm %s4295_s10, 2048  ;;  %p4019_p0 = pneg %p4299_p11 }
  0x4a   : > { %p4018_p12 = scmp.ne.s32.totalorder %s4295_s10, %s4017_s17  ;;  %s4022_s6 = scalar_lea.hbm %s6505_s0, 4096 }
  0x4b   : > { %p4023_p13 = scmp.lt.u32.totalorder %s4295_s10, %s6505_s0  ;;  %p4024_p6 = scmp.lt.u32.totalorder %s4022_s6, %s4017_s17 }
  0x4c   : > { %p4020_p2 = pnand %p4019_p0, %p4018_p12  ;;  %p4026_p3 = scmp.lt.u32.totalorder %s4017_s17, %s4295_s10 }
  0x4d   : > { %p4025_p10 = por %p4024_p6, %p4023_p13 }
  0x4e   : > { %p4021_p1 = pneg %p4020_p2 }
  0x4f   : > { %p4027_p5 = por %p4026_p3, %p4025_p10 }
  0x51   : > { %p4028_p9 = pnand %p4027_p5, %p4021_p1 }
  0x53   : > { %4031 = shalt.err (!%p4028_p9)
}
  0x54   : > { %s4032_s30 = scalar_lea.vmem %s4297_s28, 2048  ;;  %s4125_s11 = smov [#allocation2]  }
  0x55   : > { %p4033_p12 = scmp.ne.s32.totalorder %s4297_s28, %s4032_s30  ;;  %s4037_s23 = sshll.u32 %s4125_s11, 4  ;;  %s4038_s23 = int_to_ptr.vmem [resolvable:$false] %s4037_s23 }
  0x56   : > { %s4039_s7 = scalar_lea.vmem %s4038_s23, 4096  ;;  %p4040_p4 = scmp.lt.s32.totalorder %s4297_s28, %s4038_s23 }
  0x57   : > { %p4035_p2 = pnand %p4033_p12, %p4019_p0  ;;  %p4041_p13 = scmp.lt.s32.totalorder %s4039_s7, %s4032_s30 }
  0x59   : > { %p4036_p7 = pneg %p4035_p2  ;;  %p4042_p6 = por %p4041_p13, %p4040_p4 }
  0x5b   : > { %p4043_p10 = pnand %p4042_p6, %p4036_p7 }
  0x5d   : > { %4046 = shalt.err (!%p4043_p10)
}
  0x5e   : > { %3603 = dma.hbm_to_vmem [thread:$0]  (!%p4299_p11), %s4295_s10, 2048, %s4297_s28, %s4303_s15, %s4123_s12, %s4123_s12, %s4124_s13  }
  0x5f   : > { %231 = sbr.rel (%p4199_p8) target bundleno = 1096 (0x448), region = 40 }
  0x66   : > { %s4337_s17 = sand.u32 1, %s4109_s19   ;;  %p6570_p4 = scmp.ne.s32.totalorder %s6563_s24, 0 }
  0x67   : > { %s3071_s6 = sshll.u32 %s4337_s17, 7  ;;  %s234_s8 = scalar_lea.sflag [#allocation3], %s4337_s17 }
  0x68   : > { %s4341_s9 = scalar_lea.vmem [#allocation2], %s3071_s6 }
  0x69   : > { %4092 = dma.done.wait (%p6570_p4), %s234_s8, 2048  }
  0x6a   : > { %4094 = vsyncadd (%p6570_p4), %s234_s8, 4294965248  ;;  %p6571_p7 = scmp.eq.s32.totalorder %s4180_s22, 0 }
  0x6c   : > { %4096 = dma.done.wait (%p6571_p7), [#allocation6], 4096   ;;  %p6572_p8 = pmov %p6571_p7 }
  0x6d   : > { %v3654_v0 = vld [vmem:[#allocation5] ss:$8 sps:$4 sm:$0xff]   ;;  %v3655_v1 = vld [vmem:[#allocation5 + $0x10] ss:$8 sps:$4 sm:$0xff]   ;;  %v3664_v9 = vld [vmem:[#allocation5 + $0x4] ss:$8 sps:$4 sm:$0xff]  }
  0x6e   : > { %4098 = vsyncadd (%p6572_p8), [#allocation6], 4294963200  ;;  %3357 = vmatprep.subr.bf16.mxu1 %v3654_v0  ;;  %v3656_v2 = vld [vmem:[#allocation5 + $0x20] ss:$8 sps:$4 sm:$0xff]   ;;  %v3657_v3 = vld [vmem:[#allocation5 + $0x30] ss:$8 sps:$4 sm:$0xff]  }
  0x6f   : > { %3358 = vmatpush3.bf16.msra.mxu1 %v3654_v0  ;;  %v4352_v4 = vld [vmem:[%s4341_s9] sm:$0xff]   ;;  %v3659_v6 = vld [vmem:[#allocation5 + $0x50] ss:$8 sps:$4 sm:$0xff]   ;;  %v3663_v10 = vld [vmem:[%s4341_s9 + $0x8] sm:$0xff]   ;;  %s3074_s30 = sshll.u32 %s4337_s17, 8  ;;  %s3260_s6 = sshll.u32 %s4180_s22, 12 }
  0x70   : > { %3359 = vmatprep.subr.bf16.mxu1 %v3655_v1  ;;  %3373 = vmatprep.mubr.bf16.mxu1 %v4352_v4  ;;  %v3658_v5 = vld [vmem:[#allocation5 + $0x40] ss:$8 sps:$4 sm:$0xff]   ;;  %v3661_v8 = vld [vmem:[#allocation5 + $0x70] ss:$8 sps:$4 sm:$0xff]   ;;  %v3667_v12 = vld [vmem:[#allocation5 + $0x14] ss:$8 sps:$4 sm:$0xff]   ;;  %s6455_s26 = scalar_lea.hbm %s6510_s5, %s3260_s6 }
  0x71   : > { %v3660_v7 = vld [vmem:[#allocation5 + $0x60] ss:$8 sps:$4 sm:$0xff]   ;;  %v3665_v11 = vld [vmem:[%s4341_s9 + $0x10] sm:$0xff]   ;;  %v3670_v13 = vld [vmem:[#allocation5 + $0x24] ss:$8 sps:$4 sm:$0xff]   ;;  %s6390_s7 = scalar_lea.vmem [#allocation8], %s3074_s30 }
  0x72   : > { %v3666_v14 = vld [vmem:[%s4341_s9 + $0x18] sm:$0xff]   ;;  %v3668_v15 = vld [vmem:[%s4341_s9 + $0x20] sm:$0xff]   ;;  %v3669_v18 = vld [vmem:[%s4341_s9 + $0x28] sm:$0xff]   ;;  %s2970_s8 = sshll.u32 %s6390_s7, 4  ;;  %s2957_s22 = scalar_lea.sflag [#allocation4], %s4337_s17  ;;  %s6457_s8 = int_to_ptr.vmem [resolvable:$true] %s2970_s8 }
  0x73   : > { %3360 = vmatpush3.bf16.msra.mxu1 %v3655_v1  ;;  %v3673_v16 = vld [vmem:[#allocation5 + $0x34] ss:$8 sps:$4 sm:$0xff]   ;;  %v3676_v17 = vld [vmem:[#allocation5 + $0x44] ss:$8 sps:$4 sm:$0xff]   ;;  %v4374_v32 = vld [vmem:[%s6507_s2] ss:$0 sm:$0xff] }
  0x74   : > { %3361 = vmatprep.subr.bf16.mxu1 %v3656_v2  ;;  %v3671_v19 = vld [vmem:[%s4341_s9 + $0x30] sm:$0xff]   ;;  %v3682_v21 = vld [vmem:[#allocation5 + $0x64] ss:$8 sps:$4 sm:$0xff]   ;;  %v3672_v22 = vld [vmem:[%s4341_s9 + $0x38] sm:$0xff]   ;;  %s4047_s12 = scalar_lea.vmem %s6457_s8, 4096  ;;  %p6791_p0 = scmp.ne.s32.totalorder %s6568_s29, 0 }
  0x75   : > { %v3679_v20 = vld [vmem:[#allocation5 + $0x54] ss:$8 sps:$4 sm:$0xff]   ;;  %v3674_v23 = vld [vmem:[%s4341_s9 + $0x40] sm:$0xff]   ;;  %v3675_v25 = vld [vmem:[%s4341_s9 + $0x48] sm:$0xff]   ;;  %p4048_p11 = scmp.ne.s32.totalorder %s6457_s8, %s4047_s12  ;;  %s4126_s13 = smov [#allocation8]  }
  0x76   : > { %v3685_v24 = vld [vmem:[#allocation5 + $0x74] ss:$8 sps:$4 sm:$0xff]   ;;  %v3680_v28 = vld [vmem:[%s4341_s9 + $0x60] sm:$0xff]   ;;  %v3681_v29 = vld [vmem:[%s4341_s9 + $0x68] sm:$0xff]   ;;  %s4051_s10 = sshll.u32 %s4126_s13, 4  ;;  %s4052_s10 = int_to_ptr.vmem [resolvable:$false] %s4051_s10 }
  0x77   : > { %3362 = vmatpush3.bf16.msra.mxu1 %v3656_v2  ;;  %v3677_v26 = vld [vmem:[%s4341_s9 + $0x50] sm:$0xff]   ;;  %v3678_v27 = vld [vmem:[%s4341_s9 + $0x58] sm:$0xff]   ;;  %p4049_p1 = pnand %p4048_p11, %p6791_p0  ;;  %s4053_s28 = scalar_lea.vmem %s4052_s10, 8192 }
  0x78   : > { %3363 = vmatprep.subr.bf16.mxu1 %v3657_v3  ;;  %v3683_v30 = vld [vmem:[%s4341_s9 + $0x70] sm:$0xff]   ;;  %v3684_v31 = vld [vmem:[%s4341_s9 + $0x78] sm:$0xff]   ;;  %p4054_p5 = scmp.lt.s32.totalorder %s6457_s8, %s4052_s10  ;;  %p4055_p9 = scmp.lt.s32.totalorder %s4053_s28, %s4047_s12 }
  0x79   : > { %p4050_p3 = pneg %p4049_p1 }
  0x7a   : > { %p4056_p12 = por %p4055_p9, %p4054_p5 }
  0x7b   : > { %3364 = vmatpush3.bf16.msra.mxu1 %v3657_v3 }
  0x7c   : > { %3365 = vmatprep.subr.bf16.mxu1 %v3658_v5  ;;  %p4057_p2 = pnand %p4056_p12, %p4050_p3 }
  0x7f   : > { %3366 = vmatpush3.bf16.msra.mxu1 %v3658_v5 }
  0x80   : > { %3367 = vmatprep.subr.bf16.mxu1 %v3659_v6 }
  0x83   : > { %3368 = vmatpush3.bf16.msra.mxu1 %v3659_v6 }
  0x84   : > { %3369 = vmatprep.subr.bf16.mxu1 %v3660_v7 }
  0x87   : > { %3370 = vmatpush3.bf16.msra.mxu1 %v3660_v7 }
  0x88   : > { %3371 = vmatprep.subr.bf16.mxu1 %v3661_v8 }
  0x8b   : > { %3372 = vmatpush3.bf16.msra.mxu1 %v3661_v8 }
  0x8c   : > { %3405 = vmatprep.subr.bf16.mxu1 %v3664_v9 }
  0x8e   : > { %3374 = vmatmul.mubr.bf16.vlgmr.msra.gmra.mrb[0].mxu1 %v3663_v10 }
  0x8f   : > { %3406 = vmatpush3.bf16.msra.mxu1 %v3664_v9  ;;  %3377 = vmatprep.mubr.bf16.mxu1 %v3665_v11 }
  0x90   : > { %3407 = vmatprep.subr.bf16.mxu1 %v3667_v12 }
  0x93   : > { %3408 = vmatpush3.bf16.msra.mxu1 %v3667_v12 }
  0x94   : > { %3409 = vmatprep.subr.bf16.mxu1 %v3670_v13 }
  0x96   : > { %3378 = vmatmul.mubr.bf16.gmra.mrb[4].mxu1 %v3666_v14 }
  0x97   : > { %3381 = vmatprep.mubr.bf16.mxu1 %v3668_v15  ;;  %3410 = vmatpush3.bf16.msra.mxu1 %v3670_v13 }
  0x98   : > { %3411 = vmatprep.subr.bf16.mxu1 %v3673_v16 }
  0x9b   : > { %3412 = vmatpush3.bf16.msra.mxu1 %v3673_v16 }
  0x9c   : > { %3413 = vmatprep.subr.bf16.mxu1 %v3676_v17 }
  0x9e   : > { %3382 = vmatmul.mubr.bf16.gmra.mrb[8].mxu1 %v3669_v18 }
  0x9f   : > { %3385 = vmatprep.mubr.bf16.mxu1 %v3671_v19  ;;  %3414 = vmatpush3.bf16.msra.mxu1 %v3676_v17 }
  0xa0   : > { %3415 = vmatprep.subr.bf16.mxu1 %v3679_v20 }
  0xa3   : > { %3416 = vmatpush3.bf16.msra.mxu1 %v3679_v20 }
  0xa4   : > { %3417 = vmatprep.subr.bf16.mxu1 %v3682_v21 }
  0xa6   : > { %3386 = vmatmul.mubr.bf16.gmra.mrb[12].mxu1 %v3672_v22 }
  0xa7   : > { %3389 = vmatprep.mubr.bf16.mxu1 %v3674_v23  ;;  %3418 = vmatpush3.bf16.msra.mxu1 %v3682_v21 }
  0xa8   : > { %3419 = vmatprep.subr.bf16.mxu1 %v3685_v24 }
  0xab   : > { %3420 = vmatpush3.bf16.msra.mxu1 %v3685_v24 }
  0xae   : > { %3390 = vmatmul.mubr.bf16.gmra.mrb[16].mxu1 %v3675_v25 }
  0xaf   : > { %3393 = vmatprep.mubr.bf16.mxu1 %v3677_v26 }
  0xb6   : > { %3394 = vmatmul.mubr.bf16.gmra.mrb[20].mxu1 %v3678_v27 }
  0xb7   : > { %3397 = vmatprep.mubr.bf16.mxu1 %v3680_v28 }
  0xbe   : > { %3398 = vmatmul.mubr.bf16.gmra.mrb[24].mxu1 %v3681_v29 }
  0xbf   : > { %3401 = vmatprep.mubr.bf16.mxu1 %v3683_v30 }
  0xc6   : > { %3402 = vmatmul.mubr.bf16.gmra.mrb[28].mxu1 %v3684_v31 }
  0xc7   : > { %3421 = vmatprep.mubr.bf16.mxu1 %v4352_v4 }
  0xce   : > { %3422 = vmatmul.mubr.bf16.vlgmr.msra.gmra.mrb[32].mxu1 %v3663_v10 }
  0xcf   : > { %3425 = vmatprep.mubr.bf16.mxu1 %v3665_v11 }
  0xd6   : > { %3426 = vmatmul.mubr.bf16.gmra.mrb[36].mxu1 %v3666_v14 }
  0xd7   : > { %3429 = vmatprep.mubr.bf16.mxu1 %v3668_v15 }
  0xde   : > { %3430 = vmatmul.mubr.bf16.gmra.mrb[40].mxu1 %v3669_v18 }
  0xdf   : > { %3433 = vmatprep.mubr.bf16.mxu1 %v3671_v19 }
  0xe6   : > { %3434 = vmatmul.mubr.bf16.gmra.mrb[44].mxu1 %v3672_v22 }
  0xe7   : > { %3437 = vmatprep.mubr.bf16.mxu1 %v3674_v23 }
  0xee   : > { %3438 = vmatmul.mubr.bf16.gmra.mrb[48].mxu1 %v3675_v25 }
  0xef   : > { %3441 = vmatprep.mubr.bf16.mxu1 %v3677_v26 }
  0xf6   : > { %3442 = vmatmul.mubr.bf16.gmra.mrb[52].mxu1 %v3678_v27 }
  0xf7   : > { %3445 = vmatprep.mubr.bf16.mxu1 %v3680_v28 }
  0xfe   : > { %3446 = vmatmul.mubr.bf16.gmra.mrb[56].mxu1 %v3681_v29 }
  0xff   : > { %3449 = vmatprep.mubr.bf16.mxu1 %v3683_v30 }
 0x106   : > { %3450 = vmatmul.mubr.bf16.gmra.mrb[60].mxu1 %v3684_v31 }
 0x161   : > { %v3375_v33 = vpop.f32.mrb[0].mxu1 }
 0x162   : > { %v4377_v34 = vadd.f32 %v3375_v33, %v4374_v32  ;;  %v508_v35 = vpop.f32.mrb[1].mxu1 }
 0x163   : > { %v4380_v36 = vadd.f32 %v4374_v32, %v508_v35  ;;  %v3376_v37 = vpop.f32.mrb[2].mxu1 }
 0x164   : > { %v4383_v38 = vmul.f32 0.70710677, %v4377_v34  ;;  %v4386_v39 = vadd.f32 %v3376_v37, %v4374_v32  ;;  %v511_v40 = vpop.f32.mrb[3].mxu1 }
 0x165   : > { %v4389_v41 = vmul.f32 0.70710677, %v4380_v36  ;;  %v4400_v47 = vadd.f32 %v4374_v32, %v511_v40 }
 0x166   : > { %v669_v42 = vand.u32 2147483647, %v4383_v38  ;;  %v4393_v43 = vmul.f32 0.70710677, %v4386_v39  ;;  %vm1245_vm0 = vcmp.ge.f32.partialorder %v4383_v38, 0.0 }
 0x167   : > { %v4396_v44 = vand.u32 2147483647, %v4389_v41  ;;  %v4404_v54 = vmul.f32 0.70710677, %v4400_v47  ;;  %vm1243_vm2 = vcmp.ge.f32.partialorder %v4389_v41, 0.0 }
 0x168   : > { %v701_v45 = vmul.f32 0.3275911, %v669_v42  ;;  %v670_v46 = vand.u32 2147483647, %v4393_v43  ;;  %v1085_v59 = vsub.f32 0.0, %v669_v42  ;;  %vm1246_vm1 = vcmp.ge.f32.partialorder %v4393_v43, 0.0 }
 0x169   : > { %v3379_v50 = vpop.f32.mrb[4].mxu1  ;;  %v699_v51 = vmul.f32 0.3275911, %v4396_v44  ;;  %v4416_v62 = vand.u32 2147483647, %v4404_v54  ;;  %vm1244_vm3 = vcmp.ge.f32.partialorder %v4404_v54, 0.0 }
 0x16a   : > { %v733_v48 = vadd.f32 1.0, %v701_v45  ;;  %v702_v49 = vmul.f32 0.3275911, %v670_v46  ;;  %v524_v52 = vpop.f32.mrb[5].mxu1  ;;  %v4407_v57 = vadd.f32 %v3379_v50, %v4374_v32  ;;  %v1117_v6 = vmul.f32 %v1085_v59, %v669_v42 }
 0x16b   : > { %v3380_v55 = vpop.f32.mrb[6].mxu1  ;;  %v4410_v58 = vadd.f32 %v4374_v32, %v524_v52  ;;  %v731_v60 = vadd.f32 1.0, %v699_v51  ;;  %v700_v9 = vmul.f32 0.3275911, %v4416_v62  ;;  %v1086_v13 = vsub.f32 0.0, %v670_v46 }
 0x16c   : > { %3702 = vrcp.f32 %v733_v48  ;;  %v734_v53 = vadd.f32 1.0, %v702_v49  ;;  %v527_v56 = vpop.f32.mrb[7].mxu1  ;;  %v4413_v61 = vadd.f32 %v3380_v55, %v4374_v32  ;;  %v4419_v63 = vmul.f32 0.70710677, %v4407_v57 }
 0x16d   : > { %v4422_v0 = vmul.f32 0.70710677, %v4410_v58  ;;  %v4425_v1 = vadd.f32 %v4374_v32, %v527_v56  ;;  %v1151_v17 = vmul.f32 1.442695, %v1117_v6  ;;  %v732_v19 = vadd.f32 1.0, %v700_v9 }
 0x16e   : > { %3704 = vrcp.f32 %v734_v53  ;;  %v4428_v3 = vand.u32 2147483647, %v4419_v63  ;;  %v4436_v7 = vmul.f32 0.70710677, %v4413_v61  ;;  %v1118_v24 = vmul.f32 %v1086_v13, %v670_v46 }
 0x16f   : > { %v4431_v4 = vand.u32 2147483647, %v4422_v0  ;;  %3706 = vrcp.f32 %v731_v60  ;;  %v4443_v11 = vmul.f32 0.70710677, %v4425_v1  ;;  %v1084_v38 = vsub.f32 0.0, %v4416_v62 }
 0x170   : > { %v705_v10 = vmul.f32 0.3275911, %v4428_v3  ;;  %v4449_v18 = vand.u32 2147483647, %v4436_v7  ;;  %3708 = vpow2.f32 %v1151_v17  ;;  %v1153_v45 = vmul.f32 1.442695, %v1118_v24 }
 0x171   : > { %v3383_v2 = vpop.f32.mrb[8].mxu1  ;;  %v703_v14 = vmul.f32 0.3275911, %v4431_v4  ;;  %v4452_v22 = vand.u32 2147483647, %v4443_v11  ;;  %3710 = vrcp.f32 %v732_v19  ;;  %vm1249_vm4 = vcmp.ge.f32.partialorder %v4419_v63, 0.0 }
 0x172   : > { %v4433_v5 = vpop.f32.mrb[9].mxu1  ;;  %v737_v21 = vadd.f32 1.0, %v705_v10  ;;  %v706_v29 = vmul.f32 0.3275911, %v4449_v18  ;;  %v4460_v31 = vadd.f32 %v3383_v2, %v4374_v32  ;;  %vm1247_vm5 = vcmp.ge.f32.partialorder %v4422_v0, 0.0 }
 0x173   : > { %v4438_v8 = vpop.f32.mrb[10].mxu1  ;;  %v735_v25 = vadd.f32 1.0, %v703_v14  ;;  %v704_v42 = vmul.f32 0.3275911, %v4452_v22  ;;  %vm1250_vm6 = vcmp.ge.f32.partialorder %v4436_v7, 0.0  ;;  %vm1248_vm7 = vcmp.ge.f32.partialorder %v4443_v11, 0.0 }
 0x174   : > { %v4446_v15 = vpop.f32.mrb[11].mxu1  ;;  %3712 = vrcp.f32 %v737_v21  ;;  %v4468_v46 = vmul.f32 0.70710677, %v4460_v31  ;;  %v738_v50 = vadd.f32 1.0, %v706_v29 }
 0x175   : > { %3714 = vrcp.f32 %v735_v25  ;;  %v736_v59 = vadd.f32 1.0, %v704_v42 }
 0x176   : > { %v3703_v12 = vpop.eup %3702  ;;  %v4474_v53 = vand.u32 2147483647, %v4468_v46  ;;  %3716 = vpow2.f32 %v1153_v45  ;;  %vm1253_vm8 = vcmp.ge.f32.partialorder %v4468_v46, 0.0 }
 0x177   : > { %v797_v16 = vmul.f32 1.0614054, %v3703_v12  ;;  %3718 = vrcp.f32 %v738_v50 }
 0x178   : > { %v3705_v23 = vpop.eup %3704  ;;  %v709_v10 = vmul.f32 0.3275911, %v4474_v53  ;;  %3720 = vrcp.f32 %v736_v59 }
 0x179   : > { %v3102_v20 = vadd.f32 -1.4531521, %v797_v16  ;;  %v4454_v26 = vpop.f32.mrb[12].mxu1  ;;  %v798_v28 = vmul.f32 1.0614054, %v3705_v23  ;;  %v4464_v35 = vpop.eup %3706 }
 0x17a   : > { %v4457_v30 = vpop.f32.mrb[13].mxu1  ;;  %v795_v52 = vmul.f32 1.0614054, %v4464_v35  ;;  %v3709_v16 = vpop.eup %3708 }
 0x17b   : > { %v861_v27 = vmul.f32 %v3703_v12, %v3102_v20  ;;  %v4462_v33 = vpop.f32.mrb[14].mxu1  ;;  %v3103_v40 = vadd.f32 -1.4531521, %v798_v28  ;;  %v4485_v21 = vpop.eup %3710  ;;  %v741_v28 = vadd.f32 1.0, %v709_v10 }
 0x17c   : > { %v4470_v51 = vpop.f32.mrb[15].mxu1  ;;  %v3100_v19 = vadd.f32 -1.4531521, %v795_v52 }
 0x17d   : > { %v893_v37 = vadd.f32 1.4214138, %v861_v27  ;;  %v862_v49 = vmul.f32 %v3705_v23, %v3103_v40  ;;  %3722 = vrcp.f32 %v741_v28 }
 0x17e   : > { %v4487_v24 = vpop.eup %3712  ;;  %v859_v40 = vmul.f32 %v4464_v35, %v3100_v19 }
 0x17f   : > { %v925_v48 = vmul.f32 %v3703_v12, %v893_v37  ;;  %v894_v56 = vadd.f32 1.4214138, %v862_v49  ;;  %v4489_v29 = vpop.eup %3714  ;;  %v796_v49 = vmul.f32 1.0614054, %v4485_v21  ;;  %v801_v50 = vmul.f32 1.0614054, %v4487_v24 }
 0x180   : > { %v3717_v59 = vpop.eup %3716 }
 0x181   : > { %v3134_v55 = vadd.f32 -0.28449672, %v925_v48  ;;  %v4476_v60 = vpop.f32.mrb[16].mxu1  ;;  %v926_v9 = vmul.f32 %v3705_v23, %v894_v56  ;;  %v1083_v48 = vsub.f32 0.0, %v4396_v44  ;;  %v4506_v10 = vpop.eup %3718 }
 0x182   : > { %v4478_v2 = vpop.f32.mrb[17].mxu1 }
 0x183   : > { %v989_v6 = vmul.f32 %v3703_v12, %v3134_v55  ;;  %v4481_v13 = vpop.f32.mrb[18].mxu1  ;;  %v3135_v20 = vadd.f32 -0.28449672, %v926_v9 }
 0x184   : > { %v4483_v14 = vpop.f32.mrb[19].mxu1 }
 0x185   : > { %6573 = vst [vmem:[#allocation12_spill] sm:$0xff] %v4483_v14  ;;  %v1021_v17 = vadd.f32 0.2548296, %v989_v6  ;;  %v990_v27 = vmul.f32 %v3705_v23, %v3135_v20  ;;  %v4502_v6 = vadd.f32 %v4374_v32, %v4433_v5  ;;  %v1115_v20 = vmul.f32 %v1083_v48, %v4396_v44 }
 0x186   : > { %v3101_v5 = vadd.f32 -1.4531521, %v796_v49  ;;  %v1090_v48 = vsub.f32 0.0, %v4449_v18 }
 0x187   : > { %v1053_v25 = vmul.f32 %v3703_v12, %v1021_v17  ;;  %v1022_v42 = vadd.f32 0.2548296, %v990_v27  ;;  %v799_v12 = vmul.f32 1.0614054, %v4489_v29  ;;  %v891_v17 = vadd.f32 1.4214138, %v859_v40  ;;  %v4515_v27 = vpop.eup %3720 }
 0x188   : > { %v802_v40 = vmul.f32 1.0614054, %v4506_v10 }
 0x189   : > { %v1213_v37 = vmul.f32 %v3709_v16, %v1053_v25  ;;  %v4492_v45 = vpop.f32.mrb[20].mxu1  ;;  %v1054_v55 = vmul.f32 %v3705_v23, %v1022_v42  ;;  %v1341_v16 = vmul.f32 0.5, %v4377_v34  ;;  %v1342_v25 = vmul.f32 0.5, %v4386_v39 }
 0x18a   : > { %6574 = vst [vmem:[#allocation13_spill] sm:$0xff] %v4492_v45  ;;  %v4498_v56 = vpop.f32.mrb[21].mxu1  ;;  %v1089_v34 = vsub.f32 0.0, %v4428_v3  ;;  %v923_v43 = vmul.f32 %v4464_v35, %v891_v17  ;;  %v1087_v39 = vsub.f32 0.0, %v4431_v4 }
 0x18b   : > { %v1277_v52 = vsub.f32 2.0, %v1213_v37  ;;  %6575 = vst [vmem:[#allocation14_spill] sm:$0xff] %v4498_v56  ;;  %v4504_v9 = vpop.f32.mrb[22].mxu1  ;;  %v1214_v23 = vmul.f32 %v3717_v59, %v1054_v55  ;;  %v3104_v56 = vadd.f32 -1.4531521, %v799_v12  ;;  %v4535_v59 = vmul.f32 0.5, %v4380_v36  ;;  %v4549_v36 = vpop.eup %3722 }
 0x18c   : > { %6576 = vst [vmem:[#allocation15_spill] sm:$0xff] %v4504_v9  ;;  %v4510_v19 = vpop.f32.mrb[23].mxu1  ;;  %v3106_v9 = vadd.f32 -1.4531521, %v801_v50  ;;  %v4521_v55 = vmul.f32 0.70710677, %v4502_v6 }
 0x18d   : > { %6577 = vst [vmem:[#allocation16_spill] sm:$0xff] %v4510_v19  ;;  %v1309_v28 = vsel %vm1245_vm0, %v1277_v52, %v1213_v37  ;;  %v1278_v42 = vsub.f32 2.0, %v1214_v23  ;;  %v860_v52 = vmul.f32 %v4485_v21, %v3101_v5  ;;  %v800_v12 = vmul.f32 1.0614054, %v4515_v27 }
 0x18e   : > { %v4528_v49 = vmul.f32 %v1341_v16, %v1309_v28  ;;  %v865_v17 = vmul.f32 %v4487_v24, %v3106_v9  ;;  %v1147_v16 = vmul.f32 1.442695, %v1115_v20  ;;  %v1116_v5 = vmul.f32 %v1084_v38, %v4416_v62 }
 0x18f   : > { %v1310_v44 = vsel %vm1246_vm1, %v1278_v42, %v1214_v23  ;;  %v863_v23 = vmul.f32 %v4489_v29, %v3104_v56  ;;  %v4540_v42 = vand.u32 2147483647, %v4521_v55  ;;  %v3107_v28 = vadd.f32 -1.4531521, %v802_v40 }
 0x190   : > { %6579 = vst [vmem:[#allocation18_spill] sm:$0xff] %v4528_v49  ;;  %v4530_v50 = vmul.f32 %v1342_v25, %v1310_v44  ;;  %v1121_v9 = vmul.f32 %v1089_v34, %v4428_v3  ;;  %v1119_v56 = vmul.f32 %v1087_v39, %v4431_v4  ;;  %v892_v20 = vadd.f32 1.4214138, %v860_v52 }
 0x191   : > { %v4526_v37 = vpop.f32.mrb[24].mxu1  ;;  %v707_v45 = vmul.f32 0.3275911, %v4540_v42  ;;  %v1122_v62 = vmul.f32 %v1090_v48, %v4449_v18  ;;  %v3105_v38 = vadd.f32 -1.4531521, %v800_v12  ;;  %3724 = vpow2.f32 %v1147_v16 }
 0x192   : > { %6578 = vst [vmem:[#allocation17_spill] sm:$0xff] %v4526_v37  ;;  %6580 = vst [vmem:[#allocation19_spill] sm:$0xff] %v4530_v50  ;;  %v4542_v19 = vpop.f32.mrb[25].mxu1  ;;  %v3132_v37 = vadd.f32 -0.28449672, %v923_v43  ;;  %v4562_v43 = vadd.f32 %v4438_v8, %v4374_v32  ;;  %v866_v4 = vmul.f32 %v4506_v10, %v3107_v28  ;;  %v4568_v52 = vmul.f32 0.5, %v4407_v57 }
 0x193   : > { %6581 = vst [vmem:[#allocation20_spill] sm:$0xff] %v4542_v19  ;;  %v4547_v44 = vpop.f32.mrb[26].mxu1  ;;  %v4557_v19 = vmul.f32 0.5, %v4400_v47  ;;  %v897_v40 = vadd.f32 1.4214138, %v865_v17  ;;  %v739_v49 = vadd.f32 1.0, %v707_v45  ;;  %v924_v45 = vmul.f32 %v4485_v21, %v892_v20 }
 0x194   : > { %6582 = vst [vmem:[#allocation21_spill] sm:$0xff] %v4547_v44  ;;  %v4554_v14 = vpop.f32.mrb[27].mxu1  ;;  %v895_v25 = vadd.f32 1.4214138, %v863_v23  ;;  %v1149_v3 = vmul.f32 1.442695, %v1116_v5  ;;  %v987_v39 = vmul.f32 %v4464_v35, %v3132_v37  ;;  %v864_v8 = vmul.f32 %v4515_v27, %v3105_v38 }
 0x195   : > { %6583 = vst [vmem:[#allocation22_spill] sm:$0xff] %v4554_v14  ;;  %v805_v34 = vmul.f32 1.0614054, %v4549_v36  ;;  %v1159_v47 = vmul.f32 1.442695, %v1121_v9  ;;  %3726 = vrcp.f32 %v739_v49  ;;  %v929_v23 = vmul.f32 %v4487_v24, %v897_v40 }
 0x196   : > { %v1155_v18 = vmul.f32 1.442695, %v1119_v56  ;;  %v1161_v12 = vmul.f32 1.442695, %v1122_v62  ;;  %v927_v16 = vmul.f32 %v4489_v29, %v895_v25  ;;  %v1088_v37 = vsub.f32 0.0, %v4452_v22 }
 0x197   : > { %v4580_v57 = vmul.f32 0.70710677, %v4562_v43  ;;  %3728 = vpow2.f32 %v1149_v3  ;;  %v898_v5 = vadd.f32 1.4214138, %v866_v4  ;;  %v3110_v28 = vadd.f32 -1.4531521, %v805_v34 }
 0x198   : > { %v4584_v9 = vadd.f32 %v4374_v32, %v4446_v15  ;;  %v1019_v49 = vadd.f32 0.2548296, %v987_v39  ;;  %3730 = vpow2.f32 %v1159_v47  ;;  %v4589_v20 = vmul.f32 0.5, %v4410_v58 }
 0x199   : > { %v4570_v48 = vpop.f32.mrb[28].mxu1  ;;  %6586 = vst [vmem:[#allocation25_spill] sm:$0xff] %v4580_v57  ;;  %v4592_v25 = vand.u32 2147483647, %v4580_v57  ;;  %v3133_v38 = vadd.f32 -0.28449672, %v924_v45  ;;  %v4601_v15 = vadd.f32 %v4454_v26, %v4374_v32  ;;  %v1120_v39 = vmul.f32 %v1088_v37, %v4452_v22 }
 0x19a   : > { %6584 = vst [vmem:[#allocation23_spill] sm:$0xff] %v4570_v48  ;;  %v4574_v17 = vpop.f32.mrb[29].mxu1  ;;  %v896_v40 = vadd.f32 1.4214138, %v864_v8  ;;  %v4597_v3 = vmul.f32 0.70710677, %v4584_v9  ;;  %v930_v47 = vmul.f32 %v4506_v10, %v898_v5  ;;  %v869_v50 = vmul.f32 %v4549_v36, %v3110_v28 }
 0x19b   : > { %6585 = vst [vmem:[#allocation24_spill] sm:$0xff] %v4574_v17  ;;  %v4586_v56 = vpop.f32.mrb[30].mxu1  ;;  %v3138_v4 = vadd.f32 -0.28449672, %v929_v23  ;;  %v3136_v34 = vadd.f32 -0.28449672, %v927_v16  ;;  %3732 = vpow2.f32 %v1155_v18  ;;  %v3725_v16 = vpop.eup %3724  ;;  %v988_v37 = vmul.f32 %v4485_v21, %v3133_v38 }
 0x19c   : > { %6587 = vst [vmem:[#allocation26_spill] sm:$0xff] %v4586_v56  ;;  %v4594_v62 = vpop.f32.mrb[31].mxu1  ;;  %6589 = vst [vmem:[#allocation28_spill] sm:$0xff] %v4597_v3  ;;  %v710_v58 = vmul.f32 0.3275911, %v4592_v25  ;;  %v4615_v26 = vmul.f32 0.5, %v4413_v61  ;;  %v928_v5 = vmul.f32 %v4515_v27, %v896_v40  ;;  %3734 = vpow2.f32 %v1161_v12 }
 0x19d   : > { %6588 = vst [vmem:[#allocation27_spill] sm:$0xff] %v4594_v62  ;;  %v4608_v45 = vand.u32 2147483647, %v4597_v3  ;;  %v4611_v8 = vmul.f32 0.70710677, %v4601_v15  ;;  %v1051_v62 = vmul.f32 %v4464_v35, %v1019_v49  ;;  %v993_v35 = vmul.f32 %v4487_v24, %v3138_v4 }
 0x19e   : > { %v742_v23 = vadd.f32 1.0, %v710_v58  ;;  %v1157_v61 = vmul.f32 1.442695, %v1120_v39  ;;  %v4629_v18 = vmul.f32 0.5, %v4425_v1  ;;  %v991_v38 = vmul.f32 %v4489_v29, %v3136_v34 }
 0x19f   : > { %6590 = vst [vmem:[#allocation29_spill] sm:$0xff] %v4611_v8  ;;  %v708_v28 = vmul.f32 0.3275911, %v4608_v45  ;;  %v4623_v56 = vand.u32 2147483647, %v4611_v8  ;;  %v4633_v58 = vpop.eup %3726  ;;  %v1211_v48 = vmul.f32 %v3725_v16, %v1051_v62  ;;  %v4645_v34 = vadd.f32 %v4462_v33, %v4374_v32 }
 0x1a0   : > { %v3139_v40 = vadd.f32 -0.28449672, %v930_v47  ;;  %3736 = vrcp.f32 %v742_v23  ;;  %v1020_v1 = vadd.f32 0.2548296, %v988_v37  ;;  %v3137_v14 = vadd.f32 -0.28449672, %v928_v5 }
 0x1a1   : > { %v4617_v22 = vpop.f32.mrb[32].mxu1  ;;  %v740_v4 = vadd.f32 1.0, %v708_v28  ;;  %v713_v12 = vmul.f32 0.3275911, %v4623_v56  ;;  %v3729_v39 = vpop.eup %3728  ;;  %v1025_v62 = vadd.f32 0.2548296, %v993_v35  ;;  %3738 = vpow2.f32 %v1157_v61 }
 0x1a2   : > { %6591 = vst [vmem:[#allocation30_spill] sm:$0xff] %v4617_v22  ;;  %v4625_v17 = vpop.f32.mrb[33].mxu1  ;;  %v901_v22 = vadd.f32 1.4214138, %v869_v50  ;;  %v3731_v50 = vpop.eup %3730  ;;  %v803_v47 = vmul.f32 1.0614054, %v4633_v58  ;;  %v994_v37 = vmul.f32 %v4506_v10, %v3139_v40  ;;  %v1052_v61 = vmul.f32 %v4485_v21, %v1020_v1 }
 0x1a3   : > { %6592 = vst [vmem:[#allocation31_spill] sm:$0xff] %v4625_v17  ;;  %v4631_v49 = vpop.f32.mrb[34].mxu1  ;;  %v1093_v17 = vsub.f32 0.0, %v4474_v53  ;;  %v745_v23 = vadd.f32 1.0, %v713_v12  ;;  %v1023_v28 = vadd.f32 0.2548296, %v991_v38  ;;  %3740 = vrcp.f32 %v740_v4 }
 0x1a4   : > { %6593 = vst [vmem:[#allocation32_spill] sm:$0xff] %v4631_v49  ;;  %v4641_v49 = vadd.f32 %v4374_v32, %v4457_v30  ;;  %v4648_v16 = vpop.f32.mrb[35].mxu1  ;;  %v933_v5 = vmul.f32 %v4549_v36, %v901_v22  ;;  %v1275_v44 = vsub.f32 2.0, %v1211_v48  ;;  %v4657_v35 = vmul.f32 0.70710677, %v4645_v34 }
 0x1a5   : > { %6594 = vst [vmem:[#allocation33_spill] sm:$0xff] %v4648_v16  ;;  %v1125_v33 = vmul.f32 %v1093_v17, %v4474_v53  ;;  %v992_v12 = vmul.f32 %v4515_v27, %v3137_v14  ;;  %3742 = vrcp.f32 %v745_v23  ;;  %v3733_v40 = vpop.eup %3732  ;;  %v1057_v22 = vmul.f32 %v4487_v24, %v1025_v62 }
 0x1a6   : > { %v4653_v30 = vmul.f32 0.70710677, %v4641_v49  ;;  %6596 = vst [vmem:[#allocation35_spill] sm:$0xff] %v4657_v35  ;;  %v3108_v16 = vadd.f32 -1.4531521, %v803_v47  ;;  %v4670_v53 = vadd.f32 %v4374_v32, %v4470_v51  ;;  %v1055_v17 = vmul.f32 %v4489_v29, %v1023_v28  ;;  %v3735_v1 = vpop.eup %3734 }
 0x1a7   : > { %v4666_v8 = vand.u32 2147483647, %v4657_v35  ;;  %v1026_v21 = vadd.f32 0.2548296, %v994_v37  ;;  %v3142_v4 = vadd.f32 -0.28449672, %v933_v5  ;;  %v1307_v51 = vsel %vm1243_vm2, %v1275_v44, %v1211_v48 }
 0x1a8   : > { %6595 = vst [vmem:[#allocation34_spill] sm:$0xff] %v4653_v30  ;;  %v4662_v38 = vand.u32 2147483647, %v4653_v30  ;;  %v1167_v23 = vmul.f32 1.442695, %v1125_v33  ;;  %v1212_v35 = vmul.f32 %v3729_v39, %v1052_v61  ;;  %v1217_v37 = vmul.f32 %v3731_v50, %v1057_v22 }
 0x1a9   : > { %v714_v24 = vmul.f32 0.3275911, %v4666_v8  ;;  %v4677_v62 = vmul.f32 0.70710677, %v4670_v53  ;;  %v1024_v29 = vadd.f32 0.2548296, %v992_v12  ;;  %v867_v5 = vmul.f32 %v4633_v58, %v3108_v16 }
 0x1aa   : > { %v711_v14 = vmul.f32 0.3275911, %v4662_v38  ;;  %v4679_v47 = vpop.eup %3736  ;;  %v1215_v3 = vmul.f32 %v3733_v40, %v1055_v17  ;;  %v1058_v57 = vmul.f32 %v4506_v10, %v1026_v21  ;;  %v997_v41 = vmul.f32 %v4549_v36, %v3142_v4 }
 0x1ab   : > { %v746_v33 = vadd.f32 1.0, %v714_v24  ;;  %v4687_v30 = vand.u32 2147483647, %v4677_v62  ;;  %v1091_v44 = vsub.f32 0.0, %v4540_v42  ;;  %v3739_v48 = vpop.eup %3738  ;;  %3744 = vpow2.f32 %v1167_v23 }
 0x1ac   : > { %v743_v28 = vadd.f32 1.0, %v711_v14  ;;  %v4693_v39 = vmul.f32 0.5, %v4460_v31  ;;  %v806_v50 = vmul.f32 1.0614054, %v4679_v47  ;;  %v4698_v61 = vmul.f32 %v4535_v59, %v1307_v51 }
 0x1ad   : > { %v712_v16 = vmul.f32 0.3275911, %v4687_v30  ;;  %v1276_v12 = vsub.f32 2.0, %v1212_v35  ;;  %v1056_v40 = vmul.f32 %v4515_v27, %v1024_v29  ;;  %v4701_v10 = vpop.eup %3740  ;;  %v1281_v22 = vsub.f32 2.0, %v1217_v37 }
 0x1ae   : > { %6597 = vst [vmem:[#allocation36_spill] sm:$0xff] %v4698_v61  ;;  %3746 = vrcp.f32 %v743_v28  ;;  %v899_v17 = vadd.f32 1.4214138, %v867_v5  ;;  %v4705_v31 = vadd.f32 %v4476_v60, %v4374_v32  ;;  %v1279_v4 = vsub.f32 2.0, %v1215_v3 }
 0x1af   : > { %3748 = vrcp.f32 %v746_v33  ;;  %v4707_v21 = vpop.eup %3742  ;;  %v1218_v14 = vmul.f32 %v3735_v1, %v1058_v57  ;;  %v1029_v59 = vadd.f32 0.2548296, %v997_v41  ;;  %v1123_v23 = vmul.f32 %v1091_v44, %v4540_v42  ;;  %v4723_v42 = vpop.f32.mrb[36].mxu1 }
 0x1b0   : > { %v3111_v27 = vadd.f32 -1.4531521, %v806_v50  ;;  %v744_v24 = vadd.f32 1.0, %v712_v16  ;;  %v4713_v51 = vmul.f32 0.70710677, %v4705_v31  ;;  %v4717_v60 = vadd.f32 %v4374_v32, %v4478_v2  ;;  %v4732_v44 = vpop.f32.mrb[37].mxu1 }
 0x1b1   : > { %v1308_v29 = vsel %vm1244_vm3, %v1276_v12, %v1212_v35  ;;  %v1216_v57 = vmul.f32 %v3739_v48, %v1056_v40  ;;  %v804_v1 = vmul.f32 1.0614054, %v4701_v10  ;;  %v809_v28 = vmul.f32 1.0614054, %v4707_v21  ;;  %6598 = vst [vmem:[#allocation37_spill] sm:$0xff] %v4732_v44  ;;  %v4745_v0 = vpop.f32.mrb[38].mxu1 }
 0x1b2   : > { %v1313_v5 = vsel %vm1249_vm4, %v1281_v22, %v1217_v37  ;;  %v931_v33 = vmul.f32 %v4633_v58, %v899_v17  ;;  %v1094_v41 = vsub.f32 0.0, %v4592_v25  ;;  %v4730_v2 = vand.u32 2147483647, %v4713_v51  ;;  %6600 = vst [vmem:[#allocation39_spill] sm:$0xff] %v4745_v0 }
 0x1b3   : > { %v1311_v54 = vsel %vm1247_vm5, %v1279_v4, %v1215_v3  ;;  %v1282_v35 = vsub.f32 2.0, %v1218_v14  ;;  %v1061_v48 = vmul.f32 %v4549_v36, %v1029_v59  ;;  %v1163_v50 = vmul.f32 1.442695, %v1123_v23 }
 0x1b4   : > { %v870_v16 = vmul.f32 %v4679_v47, %v3111_v27  ;;  %3750 = vrcp.f32 %v744_v24  ;;  %v717_v63 = vmul.f32 0.3275911, %v4730_v2  ;;  %v4740_v37 = vmul.f32 0.70710677, %v4717_v60 }
 0x1b5   : > { %v4743_v12 = vmul.f32 %v4557_v19, %v1308_v29  ;;  %v1280_v40 = vsub.f32 2.0, %v1216_v57  ;;  %v3109_v22 = vadd.f32 -1.4531521, %v804_v1  ;;  %v3114_v17 = vadd.f32 -1.4531521, %v809_v28  ;;  %v3745_v3 = vpop.eup %3744 }
 0x1b6   : > { %v3140_v4 = vadd.f32 -0.28449672, %v931_v33  ;;  %v4748_v36 = vmul.f32 0.5, %v4502_v6  ;;  %v1126_v59 = vmul.f32 %v1094_v41, %v4592_v25  ;;  %v749_v23 = vadd.f32 1.0, %v717_v63 }
 0x1b7   : > { %6599 = vst [vmem:[#allocation38_spill] sm:$0xff] %v4743_v12  ;;  %v4754_v24 = vmul.f32 %v4568_v52, %v1313_v5  ;;  %v4757_v19 = vmul.f32 %v4589_v20, %v1311_v54  ;;  %3752 = vpow2.f32 %v1163_v50  ;;  %v4761_v29 = vmul.f32 0.5, %v4562_v43 }
 0x1b8   : > { %v4751_v27 = vpop.eup %3746  ;;  %v1314_v6 = vsel %vm1250_vm6, %v1282_v35, %v1218_v14  ;;  %v1221_v25 = vmul.f32 %v3745_v3, %v1061_v48  ;;  %v902_v28 = vadd.f32 1.4214138, %v870_v16  ;;  %v4768_v33 = vand.u32 2147483647, %v4740_v37 }
 0x1b9   : > { %6601 = vst [vmem:[#allocation40_spill] sm:$0xff] %v4754_v24  ;;  %6602 = vst [vmem:[#allocation41_spill] sm:$0xff] %v4757_v19  ;;  %v4763_v1 = vpop.eup %3748  ;;  %v1312_v52 = vsel %vm1248_vm7, %v1280_v40, %v1216_v57  ;;  %v868_v20 = vmul.f32 %v4701_v10, %v3109_v22  ;;  %v1092_v5 = vsub.f32 0.0, %v4608_v45  ;;  %v873_v43 = vmul.f32 %v4707_v21, %v3114_v17  ;;  %v4788_v40 = vpop.f32.mrb[39].mxu1  ;;  %v6616_v19 = vld [vmem:[#allocation28_spill] sm:$0xff] }
 0x1ba   : > { %v995_v41 = vmul.f32 %v4633_v58, %v3140_v4  ;;  %v1169_v54 = vmul.f32 1.442695, %v1126_v59  ;;  %v807_v7 = vmul.f32 1.0614054, %v4751_v27  ;;  %3754 = vrcp.f32 %v749_v23  ;;  %6604 = vst [vmem:[#allocation43_spill] sm:$0xff] %v4788_v40 }
 0x1bb   : > { %v4778_v14 = vmul.f32 0.5, %v4584_v9  ;;  %v1097_v35 = vsub.f32 0.0, %v4623_v56  ;;  %v810_v11 = vmul.f32 1.0614054, %v4763_v1  ;;  %v715_v57 = vmul.f32 0.3275911, %v4768_v33 }
 0x1bc   : > { %v4784_v48 = vmul.f32 %v4615_v26, %v1314_v6  ;;  %v1285_v50 = vsub.f32 2.0, %v1221_v25  ;;  %v934_v16 = vmul.f32 %v4679_v47, %v902_v28  ;;  %v1095_v63 = vsub.f32 0.0, %v4662_v38 }
 0x1bd   : > { %v4791_v22 = vmul.f32 %v4629_v18, %v1312_v52  ;;  %v900_v9 = vadd.f32 1.4214138, %v868_v20  ;;  %v905_v17 = vadd.f32 1.4214138, %v873_v43  ;;  %v4794_v3 = vmul.f32 0.5, %v4601_v15 }
 0x1be   : > { %6603 = vst [vmem:[#allocation42_spill] sm:$0xff] %v4784_v48  ;;  %v4796_v4 = vpop.eup %3750  ;;  %v1027_v59 = vadd.f32 0.2548296, %v995_v41  ;;  %v1124_v26 = vmul.f32 %v1092_v5, %v4608_v45  ;;  %v3112_v23 = vadd.f32 -1.4531521, %v807_v7  ;;  %v4801_v6 = vadd.f32 %v4481_v13, %v4374_v32 }
 0x1bf   : > { %6605 = vst [vmem:[#allocation44_spill] sm:$0xff] %v4791_v22  ;;  %3756 = vpow2.f32 %v1169_v54  ;;  %v1129_v28 = vmul.f32 %v1097_v35, %v4623_v56  ;;  %v3115_v18 = vadd.f32 -1.4531521, %v810_v11  ;;  %v747_v52 = vadd.f32 1.0, %v715_v57 }
 0x1c0   : > { %v1317_v20 = vsel %vm1253_vm8, %v1285_v50, %v1221_v25  ;;  %v3143_v15 = vadd.f32 -0.28449672, %v934_v16  ;;  %v1127_v43 = vmul.f32 %v1095_v63, %v4662_v38  ;;  %v1098_v41 = vsub.f32 0.0, %v4666_v8 }
 0x1c1   : > { %v3753_v48 = vpop.eup %3752  ;;  %v932_v45 = vmul.f32 %v4701_v10, %v900_v9  ;;  %v937_v5 = vmul.f32 %v4707_v21, %v905_v17  ;;  %v808_v13 = vmul.f32 1.0614054, %v4796_v4  ;;  %v1096_v54 = vsub.f32 0.0, %v4687_v30  ;;  %v4828_v9 = vpop.f32.mrb[40].mxu1 }
 0x1c2   : > { %v1059_v56 = vmul.f32 %v4633_v58, %v1027_v59  ;;  %v1165_v7 = vmul.f32 1.442695, %v1124_v26  ;;  %v871_v46 = vmul.f32 %v4751_v27, %v3112_v23  ;;  %v4815_v25 = vmul.f32 0.70710677, %v4801_v6  ;;  %6607 = vst [vmem:[#allocation46_spill] sm:$0xff] %v4828_v9  ;;  %v6618_v9 = vld [vmem:[#allocation15_spill] sm:$0xff] }
 0x1c3   : > { %v4818_v38 = vmul.f32 %v4693_v39, %v1317_v20  ;;  %v1175_v35 = vmul.f32 1.442695, %v1129_v28  ;;  %v874_v11 = vmul.f32 %v4763_v1, %v3115_v18  ;;  %3758 = vrcp.f32 %v747_v52 }
 0x1c4   : > { %v4821_v57 = vpop.eup %3754  ;;  %v998_v50 = vmul.f32 %v4679_v47, %v3143_v15  ;;  %v1171_v16 = vmul.f32 1.442695, %v1127_v43  ;;  %v1130_v58 = vmul.f32 %v1098_v41, %v4666_v8  ;;  %v4826_v63 = vand.u32 2147483647, %v4815_v25  ;;  %v4836_v8 = vpop.f32.mrb[41].mxu1 }
 0x1c5   : > { %6606 = vst [vmem:[#allocation45_spill] sm:$0xff] %v4818_v38  ;;  %vm1251_vm9 = vcmp.ge.f32.partialorder %v4521_v55, 0.0  ;;  %v3141_v39 = vadd.f32 -0.28449672, %v932_v45  ;;  %v3146_v17 = vadd.f32 -0.28449672, %v937_v5  ;;  %v1128_v26 = vmul.f32 %v1096_v54, %v4687_v30 }
 0x1c6   : > { %v3113_v59 = vadd.f32 -1.4531521, %v808_v13  ;;  %v1219_v23 = vmul.f32 %v3753_v48, %v1059_v56  ;;  %v903_v28 = vadd.f32 1.4214138, %v871_v46  ;;  %v4833_v18 = vmul.f32 0.5, %v4641_v49  ;;  %6608 = vst [vmem:[#allocation47_spill] sm:$0xff] %v4836_v8 }
 0x1c7   : > { %v718_v52 = vmul.f32 0.3275911, %v4826_v63  ;;  %3760 = vpow2.f32 %v1165_v7  ;;  %v906_v20 = vadd.f32 1.4214138, %v874_v11  ;;  %v4839_v15 = vmul.f32 0.5, %v4645_v34  ;;  %v4842_v41 = vpop.f32.mrb[42].mxu1 }
 0x1c8   : > { %v813_v43 = vmul.f32 1.0614054, %v4821_v57  ;;  %6609 = vst [vmem:[#allocation48_spill] sm:$0xff] %v4842_v41  ;;  %v1030_v45 = vadd.f32 0.2548296, %v998_v50  ;;  %v6610_v5 = vld [vmem:[#allocation12_spill] sm:$0xff]  ;;  %v996_v54 = vmul.f32 %v4701_v10, %v3141_v39  ;;  %3762 = vpow2.f32 %v1175_v35 }
 0x1c9   : > { %v1177_v30 = vmul.f32 1.442695, %v1130_v58  ;;  %v750_v48 = vadd.f32 1.0, %v718_v52  ;;  %v4846_v49 = vadd.f32 %v4374_v32, %v6610_v5  ;;  %v3757_v13 = vpop.eup %3756  ;;  %v872_v56 = vmul.f32 %v4796_v4, %v3113_v59  ;;  %v6614_v38 = vld [vmem:[#allocation25_spill] sm:$0xff] }
 0x1ca   : > { %v1173_v7 = vmul.f32 1.442695, %v1128_v26  ;;  %v1283_v34 = vsub.f32 2.0, %v1219_v23  ;;  %v1001_v46 = vmul.f32 %v4707_v21, %v3146_v17  ;;  %v935_v11 = vmul.f32 %v4751_v27, %v903_v28  ;;  %v4866_v28 = vpop.f32.mrb[43].mxu1  ;;  %v6617_v41 = vld [vmem:[#allocation29_spill] sm:$0xff] }
 0x1cb   : > { %3764 = vrcp.f32 %v750_v48  ;;  %v938_v50 = vmul.f32 %v4763_v1, %v906_v20  ;;  %v4854_v58 = vmul.f32 0.5, %v4670_v53  ;;  %v3118_v52 = vadd.f32 -1.4531521, %v813_v43  ;;  %6611 = vst [vmem:[#allocation12_spill] sm:$0xff] %v4866_v28  ;;  %v6612_v48 = vld [vmem:[#allocation13_spill] sm:$0xff] }
 0x1cc   : > { %3766 = vpow2.f32 %v1171_v16  ;;  %v1062_v5 = vmul.f32 %v4679_v47, %v1030_v45  ;;  %v1101_v35 = vsub.f32 0.0, %v4730_v2  ;;  %v4859_v39 = vmul.f32 0.70710677, %v4846_v49 }
 0x1cd   : > { %3768 = vpow2.f32 %v1177_v30  ;;  %v4861_v59 = vpop.eup %3758  ;;  %v1028_v17 = vadd.f32 0.2548296, %v996_v54  ;;  %v904_v26 = vadd.f32 1.4214138, %v872_v56  ;;  %v4864_v16 = vmul.f32 0.5, %v4705_v31  ;;  %v6613_v56 = vld [vmem:[#allocation14_spill] sm:$0xff] }
 0x1ce   : > { %3770 = vpow2.f32 %v1173_v7  ;;  %v1315_v53 = vsel %vm1251_vm9, %v1283_v34, %v1219_v23  ;;  %v1033_v47 = vadd.f32 0.2548296, %v1001_v46  ;;  %v3144_v20 = vadd.f32 -0.28449672, %v935_v11 }
 0x1cf   : > { %v4871_v43 = vand.u32 2147483647, %v4859_v39  ;;  %v3147_v45 = vadd.f32 -0.28449672, %v938_v50  ;;  %v877_v30 = vmul.f32 %v4821_v57, %v3118_v52  ;;  %v4876_v54 = vadd.f32 %v6612_v48, %v4374_v32 }
 0x1d0   : > { %v4880_v31 = vadd.f32 %v4374_v32, %v6613_v56  ;;  %v1222_v7 = vmul.f32 %v3757_v13, %v1062_v5  ;;  %vm1254_vm10 = vcmp.ge.f32.partialorder %v6614_v38, 0.0  ;;  %v1133_v55 = vmul.f32 %v1101_v35, %v4730_v2  ;;  %v4938_v38 = vld [vmem:[%s6507_s2] ss:$0 sm:$0xff] }
 0x1d1   : > { %v811_v23 = vmul.f32 1.0614054, %v4861_v59  ;;  %v716_v34 = vmul.f32 0.3275911, %v4871_v43  ;;  %v3761_v46 = vpop.eup %3760  ;;  %v4887_v11 = vmul.f32 %v4748_v36, %v1315_v53  ;;  %v936_v50 = vmul.f32 %v4796_v4, %v904_v26 }
 0x1d2   : > { %v4891_v52 = vmul.f32 0.5, %v4717_v60  ;;  %v4894_v48 = vmul.f32 0.70710677, %v4876_v54  ;;  %v1060_v13 = vmul.f32 %v4701_v10, %v1028_v17  ;;  %v1065_v2 = vmul.f32 %v4707_v21, %v1033_v47  ;;  %v3763_v56 = vpop.eup %3762 }
 0x1d3   : > { %6615 = vst [vmem:[#allocation13_spill] sm:$0xff] %v4887_v11  ;;  %v999_v5 = vmul.f32 %v4751_v27, %v3144_v20  ;;  %v748_v35 = vadd.f32 1.0, %v716_v34  ;;  %v1002_v24 = vmul.f32 %v4763_v1, %v3147_v45  ;;  %v909_v36 = vadd.f32 1.4214138, %v877_v30 }
 0x1d4   : > { %v4901_v53 = vand.u32 2147483647, %v4894_v48  ;;  %v4904_v60 = vmul.f32 0.70710677, %v4880_v31  ;;  %v1286_v11 = vsub.f32 2.0, %v1222_v7  ;;  %v1099_v21 = vsub.f32 0.0, %v4768_v33 }
 0x1d5   : > { %v4906_v26 = vpop.eup %3764  ;;  %v1183_v22 = vmul.f32 1.442695, %v1133_v55  ;;  %v3116_v10 = vadd.f32 -1.4531521, %v811_v23  ;;  %v3145_v47 = vadd.f32 -0.28449672, %v936_v50  ;;  %3772 = vrcp.f32 %v748_v35 }
 0x1d6   : > { %v3767_v17 = vpop.eup %3766  ;;  %v814_v20 = vmul.f32 1.0614054, %v4906_v26  ;;  %v721_v45 = vmul.f32 0.3275911, %v4901_v53  ;;  %v1220_v34 = vmul.f32 %v3761_v46, %v1060_v13  ;;  %vm1252_vm11 = vcmp.ge.f32.partialorder %v6616_v19, 0.0  ;;  %v3686_v55 = vld [vmem:[#allocation7 + $0x40] sm:$0xff]  }
 0x1d7   : > { %v3769_v30 = vpop.eup %3768  ;;  %v1225_v12 = vmul.f32 %v3763_v56, %v1065_v2  ;;  %v1031_v61 = vadd.f32 0.2548296, %v999_v5  ;;  %v4913_v28 = vand.u32 2147483647, %v4904_v60  ;;  %vm1257_vm12 = vcmp.ge.f32.partialorder %v6617_v41, 0.0  ;;  %3453 = vmatprep.subr.bf16.mxu0 %v3686_v55 }
 0x1d8   : > { %v4915_v23 = vpop.eup %3770  ;;  %v1034_v50 = vadd.f32 0.2548296, %v1002_v24  ;;  %v941_v8 = vmul.f32 %v4821_v57, %v909_v36  ;;  %v753_v35 = vadd.f32 1.0, %v721_v45  ;;  %v4921_v40 = vadd.f32 %v6618_v9, %v4374_v32  ;;  %3454 = vmatpush3.bf16.msra.mxu0 %v3686_v55 }
 0x1d9   : > { %v875_v46 = vmul.f32 %v4861_v59, %v3116_v10  ;;  %v1131_v13 = vmul.f32 %v1099_v21, %v4768_v33  ;;  %v1102_v2 = vsub.f32 0.0, %v4826_v63  ;;  %v719_v5 = vmul.f32 0.3275911, %v4913_v28 }
 0x1da   : > { %v1318_v56 = vsel %vm1254_vm10, %v1286_v11, %v1222_v7  ;;  %v1000_v24 = vmul.f32 %v4796_v4, %v3145_v47  ;;  %v3119_v36 = vadd.f32 -1.4531521, %v814_v20  ;;  %3774 = vrcp.f32 %v753_v35  ;;  %v6619_v7 = vld [vmem:[#allocation16_spill] sm:$0xff]  ;;  %v4944_v47 = vpop.f32.mrb[44].mxu1 }
 0x1db   : > { %v1284_v45 = vsub.f32 2.0, %v1220_v34  ;;  %v1289_v32 = vsub.f32 2.0, %v1225_v12  ;;  %v1063_v9 = vmul.f32 %v4751_v27, %v1031_v61  ;;  %v751_v10 = vadd.f32 1.0, %v719_v5  ;;  %6620 = vst [vmem:[#allocation14_spill] sm:$0xff] %v4944_v47  ;;  %v6621_v27 = vld [vmem:[#allocation17_spill] sm:$0xff] }
 0x1dc   : > { %v1066_v33 = vmul.f32 %v4763_v1, %v1034_v50  ;;  %v3150_v21 = vadd.f32 -0.28449672, %v941_v8  ;;  %v4933_v0 = vmul.f32 0.70710677, %v4921_v40  ;;  %v4942_v11 = vadd.f32 %v4938_v38, %v6619_v7  ;;  %v4951_v8 = vpop.f32.mrb[45].mxu1 }
 0x1dd   : > { %v907_v20 = vadd.f32 1.4214138, %v875_v46  ;;  %v1134_v61 = vmul.f32 %v1102_v2, %v4826_v63  ;;  %3776 = vrcp.f32 %v751_v10  ;;  %v4949_v1 = vadd.f32 %v4938_v38, %v6621_v27  ;;  %6622 = vst [vmem:[#allocation25_spill] sm:$0xff] %v4951_v8  ;;  %v6624_v63 = vld [vmem:[#allocation34_spill] sm:$0xff]  ;;  %v6625_v27 = vld [vmem:[#allocation35_spill] sm:$0xff] }
 0x1de   : > { %v1032_v55 = vadd.f32 0.2548296, %v1000_v24  ;;  %v878_v50 = vmul.f32 %v4906_v26, %v3119_v36  ;;  %v4955_v35 = vand.u32 2147483647, %v4933_v0  ;;  %v4958_v5 = vmul.f32 0.70710677, %v4942_v11 }
 0x1df   : > { %v4961_v46 = vmul.f32 %v4761_v29, %v1318_v56  ;;  %vm1255_vm13 = vcmp.ge.f32.partialorder %v6624_v63, 0.0  ;;  %3778 = vpow2.f32 %v1183_v22  ;;  %v1179_v2 = vmul.f32 1.442695, %v1131_v13  ;;  %v4967_v7 = vpop.eup %3772 }
 0x1e0   : > { %v4965_v10 = vmul.f32 0.70710677, %v4949_v1  ;;  %v1316_v24 = vsel %vm1252_vm11, %v1284_v45, %v1220_v34  ;;  %v1223_v36 = vmul.f32 %v3767_v17, %v1063_v9  ;;  %vm1258_vm14 = vcmp.ge.f32.partialorder %v6625_v27, 0.0  ;;  %v3687_v45 = vld [vmem:[#allocation7 + $0x48] sm:$0xff]  }
 0x1e1   : > { %6623 = vst [vmem:[#allocation28_spill] sm:$0xff] %v4961_v46  ;;  %v1005_v8 = vmul.f32 %v4821_v57, %v3150_v21  ;;  %v722_v29 = vmul.f32 0.3275911, %v4955_v35  ;;  %v1321_v56 = vsel %vm1257_vm12, %v1289_v32, %v1225_v12  ;;  %v1226_v22 = vmul.f32 %v3769_v30, %v1066_v33  ;;  %3455 = vmatprep.subr.bf16.mxu0 %v3687_v45 }
 0x1e2   : > { %v939_v13 = vmul.f32 %v4861_v59, %v907_v20  ;;  %v4978_v46 = vand.u32 2147483647, %v4958_v5  ;;  %v1064_v47 = vmul.f32 %v4796_v4, %v1032_v55  ;;  %v910_v19 = vadd.f32 1.4214138, %v878_v50  ;;  %v4995_v50 = vpop.f32.mrb[46].mxu1  ;;  %3456 = vmatpush3.bf16.msra.mxu0 %v3687_v45 }
 0x1e3   : > { %v1185_v34 = vmul.f32 1.442695, %v1134_v61  ;;  %v754_v17 = vadd.f32 1.0, %v722_v29  ;;  %3780 = vpow2.f32 %v1179_v2  ;;  %v812_v9 = vmul.f32 1.0614054, %v4967_v7  ;;  %6628 = vst [vmem:[#allocation16_spill] sm:$0xff] %v4995_v50 }
 0x1e4   : > { %v720_v21 = vmul.f32 0.3275911, %v4978_v46  ;;  %v4984_v41 = vand.u32 2147483647, %v4965_v10  ;;  %v4986_v12 = vpop.eup %3774  ;;  %v4989_v30 = vmul.f32 %v4778_v14, %v1316_v24  ;;  %v1287_v32 = vsub.f32 2.0, %v1223_v36 }
 0x1e5   : > { %v1037_v33 = vadd.f32 0.2548296, %v1005_v8  ;;  %3782 = vrcp.f32 %v754_v17  ;;  %v4992_v4 = vmul.f32 %v4794_v3, %v1321_v56  ;;  %v1290_v20 = vsub.f32 2.0, %v1226_v22  ;;  %v6629_v17 = vld [vmem:[#allocation20_spill] sm:$0xff] }
 0x1e6   : > { %6626 = vst [vmem:[#allocation29_spill] sm:$0xff] %v4989_v30  ;;  %vm1256_vm15 = vcmp.ge.f32.partialorder %v4677_v62, 0.0  ;;  %v3148_v61 = vadd.f32 -0.28449672, %v939_v13  ;;  %v752_v55 = vadd.f32 1.0, %v720_v21  ;;  %v1224_v2 = vmul.f32 %v4915_v23, %v1064_v47 }
 0x1e7   : > { %6627 = vst [vmem:[#allocation15_spill] sm:$0xff] %v4992_v4  ;;  %v1100_v14 = vsub.f32 0.0, %v4871_v43  ;;  %v817_v24 = vmul.f32 1.0614054, %v4986_v12  ;;  %v725_v8 = vmul.f32 0.3275911, %v4984_v41  ;;  %v5001_v29 = vpop.eup %3776  ;;  %v942_v3 = vmul.f32 %v4906_v26, %v910_v19 }
 0x1e8   : > { %3784 = vpow2.f32 %v1185_v34  ;;  %v3117_v56 = vadd.f32 -1.4531521, %v812_v9  ;;  %v5006_v13 = vadd.f32 %v4938_v38, %v6629_v17  ;;  %v1319_v45 = vsel %vm1255_vm13, %v1287_v32, %v1223_v36 }
 0x1e9   : > { %v1069_v23 = vmul.f32 %v4821_v57, %v1037_v33  ;;  %v5012_v47 = vmul.f32 0.5, %v4801_v6  ;;  %3786 = vrcp.f32 %v752_v55  ;;  %v3779_v21 = vpop.eup %3778  ;;  %v1322_v4 = vsel %vm1258_vm14, %v1290_v20, %v1226_v22  ;;  %v6631_v20 = vld [vmem:[#allocation21_spill] sm:$0xff] }
 0x1ea   : > { %v1003_v19 = vmul.f32 %v4861_v59, %v3148_v61  ;;  %v5018_v34 = vmul.f32 0.5, %v4846_v49  ;;  %v757_v9 = vadd.f32 1.0, %v725_v8  ;;  %v1288_v17 = vsub.f32 2.0, %v1224_v2 }
 0x1eb   : > { %v1132_v63 = vmul.f32 %v1100_v14, %v4871_v43  ;;  %v3122_v36 = vadd.f32 -1.4531521, %v817_v24  ;;  %v815_v57 = vmul.f32 1.0614054, %v5001_v29  ;;  %v3151_v32 = vadd.f32 -0.28449672, %v942_v3 }
 0x1ec   : > { %v876_v6 = vmul.f32 %v4967_v7, %v3117_v56  ;;  %3788 = vrcp.f32 %v757_v9  ;;  %v5024_v33 = vmul.f32 0.70710677, %v5006_v13  ;;  %v5027_v27 = vmul.f32 %v4833_v18, %v1319_v45  ;;  %v5042_v18 = vpop.f32.mrb[47].mxu1 }
 0x1ed   : > { %v1229_v22 = vmul.f32 %v3779_v21, %v1069_v23  ;;  %v1105_v49 = vsub.f32 0.0, %v4901_v53  ;;  %v5032_v61 = vadd.f32 %v4938_v38, %v6631_v20  ;;  %v3781_v43 = vpop.eup %3780  ;;  %v5035_v55 = vmul.f32 %v4839_v15, %v1322_v4  ;;  %6633 = vst [vmem:[#allocation35_spill] sm:$0xff] %v5042_v18 }
 0x1ee   : > { %6630 = vst [vmem:[#allocation17_spill] sm:$0xff] %v5027_v27  ;;  %vm1261_vm0 = vcmp.ge.f32.partialorder %v4713_v51, 0.0  ;;  %v1035_v14 = vadd.f32 0.2548296, %v1003_v19  ;;  %v1103_v24 = vsub.f32 0.0, %v4913_v28  ;;  %v1320_v56 = vsel %vm1256_vm15, %v1288_v17, %v1224_v2 }
 0x1ef   : > { %6632 = vst [vmem:[#allocation34_spill] sm:$0xff] %v5035_v55  ;;  %v5040_v8 = vand.u32 2147483647, %v5024_v33  ;;  %v5044_v3 = vpop.eup %3782  ;;  %v881_v45 = vmul.f32 %v4986_v12, %v3122_v36  ;;  %v5050_v15 = vmul.f32 0.5, %v4876_v54  ;;  %v3120_v4 = vadd.f32 -1.4531521, %v815_v57 }
 0x1f0   : > { %v1006_v23 = vmul.f32 %v4906_v26, %v3151_v32  ;;  %v908_v21 = vadd.f32 1.4214138, %v876_v6  ;;  %v1181_v19 = vmul.f32 1.442695, %v1132_v63  ;;  %v1293_v20 = vsub.f32 2.0, %v1229_v22  ;;  %v3688_v63 = vld [vmem:[#allocation7 + $0x50] sm:$0xff]  }
 0x1f1   : > { %v723_v9 = vmul.f32 0.3275911, %v5040_v8  ;;  %v5055_v55 = vmul.f32 0.5, %v4880_v31  ;;  %v818_v27 = vmul.f32 1.0614054, %v5044_v3  ;;  %v1067_v54 = vmul.f32 %v4861_v59, %v1035_v14  ;;  %v6634_v59 = vld [vmem:[#allocation22_spill] sm:$0xff]  ;;  %3457 = vmatprep.subr.bf16.mxu0 %v3688_v63 }
 0x1f2   : > { %v5059_v62 = vmul.f32 0.70710677, %v5032_v61  ;;  %v3785_v2 = vpop.eup %3784  ;;  %v1137_v17 = vmul.f32 %v1105_v49, %v4901_v53  ;;  %v1135_v36 = vmul.f32 %v1103_v24, %v4913_v28  ;;  %v913_v6 = vadd.f32 1.4214138, %v881_v45  ;;  %3458 = vmatpush3.bf16.msra.mxu0 %v3688_v63 }
 0x1f3   : > { %v755_v57 = vadd.f32 1.0, %v723_v9  ;;  %v5064_v32 = vpop.eup %3786  ;;  %v879_v31 = vmul.f32 %v5001_v29, %v3120_v4  ;;  %v1106_v30 = vsub.f32 0.0, %v4955_v35  ;;  %v1038_v50 = vadd.f32 0.2548296, %v1006_v23 }
 0x1f4   : > { %v5069_v18 = vand.u32 2147483647, %v5059_v62  ;;  %v940_v44 = vmul.f32 %v4967_v7, %v908_v21  ;;  %v5074_v53 = vadd.f32 %v4938_v38, %v6634_v59  ;;  %v5077_v28 = vmul.f32 %v4854_v58, %v1320_v56 }
 0x1f5   : > { %3790 = vrcp.f32 %v755_v57  ;;  %vm1259_vm1 = vcmp.ge.f32.partialorder %v4740_v37, 0.0  ;;  %v3123_v49 = vadd.f32 -1.4531521, %v818_v27  ;;  %v816_v14 = vmul.f32 1.0614054, %v5064_v32  ;;  %v5088_v27 = vpop.f32.mrb[48].mxu1 }
 0x1f6   : > { %6635 = vst [vmem:[#allocation20_spill] sm:$0xff] %v5077_v28  ;;  %v726_v24 = vmul.f32 0.3275911, %v5069_v18  ;;  %v5082_v45 = vpop.eup %3788  ;;  %v1227_v4 = vmul.f32 %v3781_v43, %v1067_v54  ;;  %3792 = vpow2.f32 %v1181_v19  ;;  %v1191_v23 = vmul.f32 1.442695, %v1137_v17  ;;  %v5095_v19 = vpop.f32.mrb[49].mxu1 }
 0x1f7   : > { %v1104_v21 = vsub.f32 0.0, %v4978_v46  ;;  %v1325_v9 = vsel %vm1261_vm0, %v1293_v20, %v1229_v22  ;;  %v945_v58 = vmul.f32 %v4986_v12, %v913_v6  ;;  %v911_v56 = vadd.f32 1.4214138, %v879_v31  ;;  %6636 = vst [vmem:[#allocation21_spill] sm:$0xff] %v5095_v19  ;;  %v3691_v19 = vld [vmem:[#allocation7 + $0x68] sm:$0xff]  }
 0x1f8   : > { %v1187_v57 = vmul.f32 1.442695, %v1135_v36  ;;  %v1070_v59 = vmul.f32 %v4906_v26, %v1038_v50  ;;  %v3149_v28 = vadd.f32 -0.28449672, %v940_v44  ;;  %v1138_v63 = vmul.f32 %v1106_v30, %v4955_v35  ;;  %v3689_v50 = vld [vmem:[#allocation7 + $0x58] sm:$0xff]  }
 0x1f9   : > { %v5093_v43 = vmul.f32 0.70710677, %v5074_v53  ;;  %v882_v54 = vmul.f32 %v5044_v3, %v3123_v49  ;;  %v3121_v51 = vadd.f32 -1.4531521, %v816_v14  ;;  %v821_v22 = vmul.f32 1.0614054, %v5082_v45  ;;  %3459 = vmatprep.subr.bf16.mxu0 %v3689_v50 }
 0x1fa   : > { %v758_v20 = vadd.f32 1.0, %v726_v24  ;;  %v1291_v17 = vsub.f32 2.0, %v1227_v4  ;;  %3794 = vpow2.f32 %v1191_v23  ;;  %v5100_v36 = vmul.f32 0.5, %v4921_v40  ;;  %v5113_v24 = vpop.f32.mrb[50].mxu1  ;;  %3460 = vmatpush3.bf16.msra.mxu0 %v3689_v50 }
 0x1fb   : > { %v1136_v44 = vmul.f32 %v1104_v21, %v4978_v46  ;;  %v5104_v26 = vmul.f32 %v4864_v16, %v1325_v9  ;;  %vm1262_vm2 = vcmp.ge.f32.partialorder %v4815_v25, 0.0  ;;  %v3154_v35 = vadd.f32 -0.28449672, %v945_v58  ;;  %6638 = vst [vmem:[#allocation49_spill] sm:$0xff] %v5113_v24 }
 0x1fc   : > { %v943_v30 = vmul.f32 %v5001_v29, %v911_v56  ;;  %3796 = vrcp.f32 %v758_v20  ;;  %v1230_v6 = vmul.f32 %v3785_v2, %v1070_v59  ;;  %v1004_v31 = vmul.f32 %v4967_v7, %v3149_v28  ;;  %v6639_v59 = vld [vmem:[#allocation23_spill] sm:$0xff]  ;;  %v5130_v20 = vpop.f32.mrb[51].mxu1 }
 0x1fd   : > { %6637 = vst [vmem:[#allocation22_spill] sm:$0xff] %v5104_v26  ;;  %v1193_v49 = vmul.f32 1.442695, %v1138_v63  ;;  %v5110_v14 = vand.u32 2147483647, %v5093_v43  ;;  %3798 = vpow2.f32 %v1187_v57  ;;  %v880_v46 = vmul.f32 %v5064_v32, %v3121_v51  ;;  %6640 = vst [vmem:[#allocation23_spill] sm:$0xff] %v5130_v20 }
 0x1fe   : > { %v914_v40 = vadd.f32 1.4214138, %v882_v54  ;;  %v3126_v16 = vadd.f32 -1.4531521, %v821_v22  ;;  %v1323_v21 = vsel %vm1259_vm1, %v1291_v17, %v1227_v4  ;;  %v1189_v2 = vmul.f32 1.442695, %v1136_v44 }
 0x1ff   : > { %v5115_v23 = vpop.eup %3790  ;;  %v1109_v28 = vsub.f32 0.0, %v4984_v41  ;;  %v724_v9 = vmul.f32 0.3275911, %v5110_v14  ;;  %v1009_v58 = vmul.f32 %v4986_v12, %v3154_v35  ;;  %v3152_v56 = vadd.f32 -0.28449672, %v943_v30 }
 0x200   : > { %v819_v57 = vmul.f32 1.0614054, %v5115_v23  ;;  %v5125_v63 = vadd.f32 %v4938_v38, %v6639_v59  ;;  %v3793_v54 = vpop.eup %3792  ;;  %v1294_v51 = vsub.f32 2.0, %v1230_v6  ;;  %v1036_v22 = vadd.f32 0.2548296, %v1004_v31 }
 0x201   : > { %v5128_v37 = vmul.f32 0.5, %v4942_v11  ;;  %v756_v4 = vadd.f32 1.0, %v724_v9  ;;  %v946_v17 = vmul.f32 %v5044_v3, %v914_v40  ;;  %3800 = vpow2.f32 %v1193_v49 }
 0x202   : > { %v912_v44 = vadd.f32 1.4214138, %v880_v46  ;;  %v885_v35 = vmul.f32 %v5082_v45, %v3126_v16  ;;  %v5135_v30 = vmul.f32 %v4891_v52, %v1323_v21  ;;  %v1141_v50 = vmul.f32 %v1109_v28, %v4984_v41  ;;  %v6642_v46 = vld [vmem:[#allocation24_spill] sm:$0xff] }
 0x203   : > { %v5139_v59 = vmul.f32 0.5, %v4949_v1  ;;  %3802 = vrcp.f32 %v756_v4  ;;  %v1041_v11 = vadd.f32 0.2548296, %v1009_v58  ;;  %v1007_v31 = vmul.f32 %v5001_v29, %v3152_v56 }
 0x204   : > { %6641 = vst [vmem:[#allocation50_spill] sm:$0xff] %v5135_v30  ;;  %v3124_v9 = vadd.f32 -1.4531521, %v819_v57  ;;  %v5143_v26 = vmul.f32 0.70710677, %v5125_v63  ;;  %v3795_v49 = vpop.eup %3794  ;;  %v1326_v40 = vsel %vm1262_vm2, %v1294_v51, %v1230_v6  ;;  %v1068_v52 = vmul.f32 %v4967_v7, %v1036_v22 }
 0x205   : > { %3804 = vpow2.f32 %v1189_v2  ;;  %v5150_v41 = vadd.f32 %v4938_v38, %v6642_v46  ;;  %v3155_v16 = vadd.f32 -0.28449672, %v946_v17  ;;  %v944_v21 = vmul.f32 %v5064_v32, %v912_v44 }
 0x206   : > { %v5152_v1 = vpop.eup %3796  ;;  %v917_v28 = vadd.f32 1.4214138, %v885_v35  ;;  %v5156_v58 = vand.u32 2147483647, %v5143_v26  ;;  %v1199_v56 = vmul.f32 1.442695, %v1141_v50  ;;  %v1073_v57 = vmul.f32 %v4986_v12, %v1041_v11 }
 0x207   : > { %v1107_v25 = vsub.f32 0.0, %v5040_v8  ;;  %v5160_v6 = vmul.f32 0.5, %v5006_v13  ;;  %v822_v7 = vmul.f32 1.0614054, %v5152_v1  ;;  %v3799_v2 = vpop.eup %3798  ;;  %vm1260_vm3 = vcmp.ge.f32.partialorder %v4859_v39, 0.0 }
 0x208   : > { %v1039_v51 = vadd.f32 0.2548296, %v1007_v31  ;;  %v883_v22 = vmul.f32 %v5115_v23, %v3124_v9  ;;  %v729_v4 = vmul.f32 0.3275911, %v5156_v58  ;;  %v5168_v17 = vmul.f32 %v5012_v47, %v1326_v40  ;;  %v3690_v31 = vld [vmem:[#allocation7 + $0x60] sm:$0xff]  }
 0x209   : > { %v1228_v44 = vmul.f32 %v3793_v54, %v1068_v52  ;;  %v3127_v35 = vadd.f32 -1.4531521, %v822_v7  ;;  %v5171_v13 = vmul.f32 0.70710677, %v5150_v41  ;;  %v1010_v50 = vmul.f32 %v5044_v3, %v3155_v16  ;;  %3461 = vmatprep.subr.bf16.mxu0 %v3690_v31  ;;  %v5216_v39 = vld [vmem:[%s6507_s2 + $0x1] ss:$0 sm:$0xff] }
 0x20a   : > { %6643 = vst [vmem:[#allocation24_spill] sm:$0xff] %v5168_v17  ;;  %v3153_v46 = vadd.f32 -0.28449672, %v944_v21  ;;  %v949_v30 = vmul.f32 %v5082_v45, %v917_v28  ;;  %v761_v20 = vadd.f32 1.0, %v729_v4  ;;  %vm1265_vm4 = vcmp.ge.f32.partialorder %v4894_v48, 0.0  ;;  %3462 = vmatpush3.bf16.msra.mxu0 %v3690_v31 }
 0x20b   : > { %v1139_v12 = vmul.f32 %v1107_v25, %v5040_v8  ;;  %v886_v11 = vmul.f32 %v5152_v1, %v3127_v35  ;;  %v1110_v47 = vsub.f32 0.0, %v5069_v18  ;;  %v5180_v54 = vand.u32 2147483647, %v5171_v13  ;;  %v3801_v9 = vpop.eup %3800  ;;  %v6644_v25 = vld [vmem:[#allocation26_spill] sm:$0xff]  ;;  %3463 = vmatprep.subr.bf16.mxu0 %v3691_v19 }
 0x20c   : > { %v1233_v40 = vmul.f32 %v3795_v49, %v1073_v57  ;;  %v1071_v52 = vmul.f32 %v5001_v29, %v1039_v51  ;;  %v915_v16 = vadd.f32 1.4214138, %v883_v22  ;;  %3806 = vrcp.f32 %v761_v20 }
 0x20d   : > { %v5183_v21 = vpop.eup %3802  ;;  %v1292_v28 = vsub.f32 2.0, %v1228_v44  ;;  %3808 = vpow2.f32 %v1199_v56  ;;  %v727_v8 = vmul.f32 0.3275911, %v5180_v54  ;;  %v5188_v7 = vadd.f32 %v4938_v38, %v6644_v25 }
 0x20e   : > { %v1042_v4 = vadd.f32 0.2548296, %v1010_v50  ;;  %v1008_v35 = vmul.f32 %v5064_v32, %v3153_v46  ;;  %v3158_v17 = vadd.f32 -0.28449672, %v949_v30  ;;  %v820_v49 = vmul.f32 1.0614054, %v5183_v21  ;;  %3464 = vmatpush3.bf16.msra.mxu0 %v3691_v19 }
 0x20f   : > { %v3805_v29 = vpop.eup %3804  ;;  %vm1263_vm5 = vcmp.ge.f32.partialorder %v4904_v60, 0.0  ;;  %v1195_v20 = vmul.f32 1.442695, %v1139_v12  ;;  %v918_v57 = vadd.f32 1.4214138, %v886_v11  ;;  %v1142_v56 = vmul.f32 %v1110_v47, %v5069_v18  ;;  %v5198_v46 = vpop.f32.mrb[52].mxu1 }
 0x210   : > { %v759_v51 = vadd.f32 1.0, %v727_v8  ;;  %v1297_v22 = vsub.f32 2.0, %v1233_v40  ;;  %v1231_v24 = vmul.f32 %v3799_v2, %v1071_v52  ;;  %v947_v25 = vmul.f32 %v5115_v23, %v915_v16  ;;  %6645 = vst [vmem:[#allocation26_spill] sm:$0xff] %v5198_v46  ;;  %v5205_v11 = vpop.f32.mrb[53].mxu1  ;;  %v6647_v52 = vld [vmem:[#allocation27_spill] sm:$0xff] }
 0x211   : > { %v5196_v50 = vmul.f32 0.5, %v5032_v61  ;;  %v1324_v30 = vsel %vm1260_vm3, %v1292_v28, %v1228_v44  ;;  %v3125_v31 = vadd.f32 -1.4531521, %v820_v49  ;;  %v5203_v12 = vmul.f32 0.70710677, %v5188_v7  ;;  %6646 = vst [vmem:[#allocation51_spill] sm:$0xff] %v5205_v11 }
 0x212   : > { %3810 = vrcp.f32 %v759_v51  ;;  %v1074_v18 = vmul.f32 %v5044_v3, %v1042_v4  ;;  %v1040_v2 = vadd.f32 0.2548296, %v1008_v35  ;;  %v1013_v47 = vmul.f32 %v5082_v45, %v3158_v17  ;;  %v5257_v60 = vpop.f32.mrb[54].mxu1 }
 0x213   : > { %v5211_v61 = vadd.f32 %v4938_v38, %v6647_v52  ;;  %3812 = vpow2.f32 %v1195_v20  ;;  %v950_v44 = vmul.f32 %v5152_v1, %v918_v57  ;;  %v1201_v16 = vmul.f32 1.442695, %v1142_v56  ;;  %v6648_v20 = vld [vmem:[#allocation30_spill] sm:$0xff] }
 0x214   : > { %v5220_v28 = vand.u32 2147483647, %v5203_v12  ;;  %v1329_v3 = vsel %vm1265_vm4, %v1297_v22, %v1233_v40  ;;  %v1295_v17 = vsub.f32 2.0, %v1231_v24  ;;  %v3156_v8 = vadd.f32 -0.28449672, %v947_v25 }
 0x215   : > { %v5225_v38 = vmul.f32 0.70710677, %v5211_v61  ;;  %vm1266_vm6 = vcmp.ge.f32.partialorder %v4933_v0, 0.0  ;;  %v884_v4 = vmul.f32 %v5183_v21, %v3125_v31  ;;  %v1108_v35 = vsub.f32 0.0, %v5110_v14 }
 0x216   : > { %v730_v49 = vmul.f32 0.3275911, %v5220_v28  ;;  %v5233_v57 = vadd.f32 %v6648_v20, %v5216_v39  ;;  %v5235_v56 = vpop.eup %3806  ;;  %v1234_v48 = vmul.f32 %v3801_v9, %v1074_v18  ;;  %v1072_v40 = vmul.f32 %v5064_v32, %v1040_v2 }
 0x217   : > { %v1045_v51 = vadd.f32 0.2548296, %v1013_v47  ;;  %v5239_v22 = vand.u32 2147483647, %v5225_v38  ;;  %v3809_v25 = vpop.eup %3808  ;;  %v5242_v31 = vmul.f32 %v5018_v34, %v1324_v30  ;;  %v3159_v52 = vadd.f32 -0.28449672, %v950_v44 }
 0x218   : > { %v825_v11 = vmul.f32 1.0614054, %v5235_v56  ;;  %v762_v46 = vadd.f32 1.0, %v730_v49  ;;  %v5246_v20 = vmul.f32 %v5050_v15, %v1329_v3  ;;  %v1327_v9 = vsel %vm1263_vm5, %v1295_v17, %v1231_v24 }
 0x219   : > { %6649 = vst [vmem:[#allocation27_spill] sm:$0xff] %v5242_v31  ;;  %v1011_v32 = vmul.f32 %v5115_v23, %v3156_v8  ;;  %v728_v18 = vmul.f32 0.3275911, %v5239_v22  ;;  %v916_v2 = vadd.f32 1.4214138, %v884_v4  ;;  %v1298_v30 = vsub.f32 2.0, %v1234_v48 }
 0x21a   : > { %6650 = vst [vmem:[#allocation30_spill] sm:$0xff] %v5246_v20  ;;  %v3130_v47 = vadd.f32 -1.4531521, %v825_v11  ;;  %3814 = vrcp.f32 %v762_v46  ;;  %v5253_v34 = vmul.f32 0.70710677, %v5233_v57  ;;  %v1232_v44 = vmul.f32 %v3805_v29, %v1072_v40 }
 0x21b   : > { %vm1264_vm7 = vcmp.ge.f32.partialorder %v4958_v5, 0.0  ;;  %v1140_v15 = vmul.f32 %v1108_v35, %v5110_v14  ;;  %v760_v3 = vadd.f32 1.0, %v728_v18  ;;  %v1077_v17 = vmul.f32 %v5082_v45, %v1045_v51 }
 0x21c   : > { %v5259_v24 = vpop.eup %3810  ;;  %v1014_v46 = vmul.f32 %v5152_v1, %v3159_v52  ;;  %v889_v11 = vmul.f32 %v5235_v56, %v3130_v47  ;;  %v5265_v8 = vand.u32 2147483647, %v5253_v34  ;;  %v5268_v29 = vmul.f32 %v5055_v55, %v1327_v9 }
 0x21d   : > { %3816 = vpow2.f32 %v1201_v16  ;;  %v1113_v14 = vsub.f32 0.0, %v5156_v58  ;;  %v823_v4 = vmul.f32 1.0614054, %v5259_v24  ;;  %v3813_v19 = vpop.eup %3812  ;;  %v1043_v35 = vadd.f32 0.2548296, %v1011_v32 }
 0x21e   : > { %6651 = vst [vmem:[#allocation52_spill] sm:$0xff] %v5268_v29  ;;  %v948_v49 = vmul.f32 %v5183_v21, %v916_v2  ;;  %3818 = vrcp.f32 %v760_v3  ;;  %v1733_v45 = vmul.f32 0.3275911, %v5265_v8  ;;  %v1330_v40 = vsel %vm1266_vm6, %v1298_v30, %v1234_v48  ;;  %v6652_v3 = vld [vmem:[#allocation32_spill] sm:$0xff]  ;;  %v5286_v48 = vpop.f32.mrb[55].mxu1 }
 0x21f   : > { %vm1269_vm8 = vcmp.ge.f32.partialorder %v4965_v10, 0.0  ;;  %v1197_v51 = vmul.f32 1.442695, %v1140_v15  ;;  %v921_v55 = vadd.f32 1.4214138, %v889_v11  ;;  %v1296_v16 = vsub.f32 2.0, %v1232_v44 }
 0x220   : > { %v3128_v52 = vadd.f32 -1.4531521, %v823_v4  ;;  %v1237_v9 = vmul.f32 %v3809_v25, %v1077_v17  ;;  %v1046_v18 = vadd.f32 0.2548296, %v1014_v46  ;;  %v1765_v47 = vadd.f32 1.0, %v1733_v45 }
 0x221   : > { %v5278_v20 = vmul.f32 0.5, %v5074_v53  ;;  %v1111_v2 = vsub.f32 0.0, %v5180_v54  ;;  %v5284_v0 = vadd.f32 %v6652_v3, %v5216_v39  ;;  %v1075_v30 = vmul.f32 %v5115_v23, %v1043_v35 }
 0x222   : > { %v887_v32 = vmul.f32 %v5259_v24, %v3128_v52  ;;  %v3157_v15 = vadd.f32 -0.28449672, %v948_v49  ;;  %v1145_v25 = vmul.f32 %v1113_v14, %v5156_v58  ;;  %3820 = vrcp.f32 %v1765_v47 }
 0x223   : > { %v5291_v17 = vmul.f32 %v5100_v36, %v1330_v40  ;;  %3822 = vpow2.f32 %v1197_v51  ;;  %v953_v53 = vmul.f32 %v5235_v56, %v921_v55  ;;  %v5295_v46 = vmul.f32 0.5, %v5125_v63 }
 0x224   : > { %v5297_v11 = vpop.eup %3814  ;;  %v1328_v4 = vsel %vm1264_vm7, %v1296_v16, %v1232_v44  ;;  %v1301_v45 = vsub.f32 2.0, %v1237_v9  ;;  %v1078_v23 = vmul.f32 %v5152_v1, %v1046_v18  ;;  %v5303_v58 = vmul.f32 0.70710677, %v5284_v0 }
 0x225   : > { %6653 = vst [vmem:[#allocation32_spill] sm:$0xff] %v5291_v17  ;;  %vm1267_vm9 = vcmp.ge.f32.partialorder %v5024_v33, 0.0  ;;  %v919_v36 = vadd.f32 1.4214138, %v887_v32  ;;  %v1143_v14 = vmul.f32 %v1111_v2, %v5180_v54  ;;  %v5308_v35 = vmul.f32 0.5, %v5150_v41 }
 0x226   : > { %v826_v63 = vmul.f32 1.0614054, %v5297_v11  ;;  %v1235_v49 = vmul.f32 %v3813_v19, %v1075_v30  ;;  %v1012_v5 = vmul.f32 %v5183_v21, %v3157_v15  ;;  %v1207_v44 = vmul.f32 1.442695, %v1145_v25  ;;  %v6655_v19 = vld [vmem:[#allocation31_spill] sm:$0xff] }
 0x227   : > { %v1114_v40 = vsub.f32 0.0, %v5220_v28  ;;  %v3817_v1 = vpop.eup %3816  ;;  %v5314_v51 = vmul.f32 %v5128_v37, %v1328_v4  ;;  %v3162_v55 = vadd.f32 -0.28449672, %v953_v53  ;;  %v1112_v16 = vsub.f32 0.0, %v5239_v22  ;;  %v3692_v53 = vld [vmem:[#allocation7 + $0x70] sm:$0xff]  }
 0x228   : > { %v3131_v52 = vadd.f32 -1.4531521, %v826_v63  ;;  %v5317_v54 = vpop.eup %3818  ;;  %v1333_v41 = vsel %vm1269_vm8, %v1301_v45, %v1237_v9  ;;  %v1238_v18 = vmul.f32 %v3817_v1, %v1078_v23  ;;  %vm1270_vm10 = vcmp.ge.f32.partialorder %v5059_v62, 0.0  ;;  %3465 = vmatprep.subr.bf16.mxu0 %v3692_v53 }
 0x229   : > { %6654 = vst [vmem:[#allocation53_spill] sm:$0xff] %v5314_v51  ;;  %v5324_v47 = vadd.f32 %v5216_v39, %v6655_v19  ;;  %v5327_v32 = vand.u32 2147483647, %v5303_v58  ;;  %v951_v37 = vmul.f32 %v5259_v24, %v919_v36  ;;  %v1203_v2 = vmul.f32 1.442695, %v1143_v14  ;;  %3466 = vmatpush3.bf16.msra.mxu0 %v3692_v53 }
 0x22a   : > { %v890_v3 = vmul.f32 %v5297_v11, %v3131_v52  ;;  %v824_v30 = vmul.f32 1.0614054, %v5317_v54  ;;  %v1299_v15 = vsub.f32 2.0, %v1235_v49  ;;  %v1044_v10 = vadd.f32 0.2548296, %v1012_v5 }
 0x22b   : > { %v1146_v9 = vmul.f32 %v1114_v40, %v5220_v28  ;;  %v1734_v25 = vmul.f32 0.3275911, %v5327_v32  ;;  %v5335_v4 = vmul.f32 %v5139_v59, %v1333_v41  ;;  %v1017_v45 = vmul.f32 %v5235_v56, %v3162_v55 }
 0x22c   : > { %v3129_v23 = vadd.f32 -1.4531521, %v824_v30  ;;  %v1144_v36 = vmul.f32 %v1112_v16, %v5239_v22  ;;  %v5339_v14 = vpop.eup %3820  ;;  %v1302_v63 = vsub.f32 2.0, %v1238_v18  ;;  %3824 = vpow2.f32 %v1207_v44 }
 0x22d   : > { %6656 = vst [vmem:[#allocation31_spill] sm:$0xff] %v5335_v4  ;;  %v5342_v1 = vmul.f32 0.70710677, %v5324_v47  ;;  %v1766_v5 = vadd.f32 1.0, %v1734_v25  ;;  %v3823_v28 = vpop.eup %3822  ;;  %v3160_v40 = vadd.f32 -0.28449672, %v951_v37  ;;  %3826 = vpow2.f32 %v1203_v2 }
 0x22e   : > { %v922_v52 = vadd.f32 1.4214138, %v890_v3  ;;  %v1829_v59 = vmul.f32 1.0614054, %v5339_v14  ;;  %v1331_v55 = vsel %vm1267_vm9, %v1299_v15, %v1235_v49  ;;  %v1076_v22 = vmul.f32 %v5183_v21, %v1044_v10  ;;  %v5354_v2 = vpop.f32.mrb[56].mxu1  ;;  %v3693_v3 = vld [vmem:[#allocation7 + $0x78] sm:$0xff]  }
 0x22f   : > { %6657 = vst [vmem:[#allocation54_spill] sm:$0xff] %v5342_v1  ;;  %v1209_v16 = vmul.f32 1.442695, %v1146_v9  ;;  %v2117_v44 = vsub.f32 0.0, %v5265_v8  ;;  %v1049_v41 = vadd.f32 0.2548296, %v1017_v45  ;;  %v888_v19 = vmul.f32 %v5317_v54, %v3129_v23  ;;  %3467 = vmatprep.subr.bf16.mxu0 %v3693_v3 }
 0x230   : > { %v1205_v30 = vmul.f32 1.442695, %v1144_v36  ;;  %v5352_v37 = vadd.f32 %v4723_v42, %v5216_v39  ;;  %v5357_v25 = vmul.f32 0.5, %v5188_v7  ;;  %v3175_v33 = vadd.f32 -1.4531521, %v1829_v59  ;;  %v5360_v49 = vpop.f32.mrb[57].mxu1  ;;  %3468 = vmatpush3.bf16.msra.mxu0 %v3693_v3 }
 0x231   : > { %v1699_v21 = vand.u32 2147483647, %v5342_v1  ;;  %3828 = vrcp.f32 %v1766_v5  ;;  %v1334_v15 = vsel %vm1270_vm10, %v1302_v63, %v1238_v18  ;;  %v1015_v10 = vmul.f32 %v5259_v24, %v3160_v40  ;;  %v5373_v23 = vpop.f32.mrb[58].mxu1  ;;  %v6660_v40 = vld [vmem:[#allocation33_spill] sm:$0xff] }
 0x232   : > { %v954_v42 = vmul.f32 %v5297_v11, %v922_v52  ;;  %v5367_v9 = vmul.f32 0.5, %v5211_v61  ;;  %v5370_v7 = vmul.f32 %v5160_v6, %v1331_v55  ;;  %v1236_v53 = vmul.f32 %v3823_v28, %v1076_v22 }
 0x233   : > { %3830 = vpow2.f32 %v1209_v16  ;;  %v2149_v45 = vmul.f32 %v2117_v44, %v5265_v8  ;;  %v1081_v62 = vmul.f32 %v5235_v56, %v1049_v41  ;;  %v920_v18 = vadd.f32 1.4214138, %v888_v19 }
 0x234   : > { %6658 = vst [vmem:[#allocation55_spill] sm:$0xff] %v5370_v7  ;;  %v1893_v36 = vmul.f32 %v5339_v14, %v3175_v33  ;;  %v5378_v63 = vmul.f32 0.70710677, %v5352_v37  ;;  %v5381_v61 = vmul.f32 %v5196_v50, %v1334_v15  ;;  %3832 = vpow2.f32 %v1205_v30  ;;  %v6662_v15 = vld [vmem:[#allocation37_spill] sm:$0xff] }
 0x235   : > { %v5384_v6 = vmul.f32 0.5, %v5233_v57  ;;  %v2115_v5 = vsub.f32 0.0, %v1699_v21  ;;  %vm1268_vm11 = vcmp.ge.f32.partialorder %v5093_v43, 0.0  ;;  %v1047_v8 = vadd.f32 0.2548296, %v1015_v10 }
 0x236   : > { %6659 = vst [vmem:[#allocation56_spill] sm:$0xff] %v5381_v61  ;;  %v3163_v28 = vadd.f32 -0.28449672, %v954_v42  ;;  %v5389_v56 = vadd.f32 %v5216_v39, %v6660_v40  ;;  %v5392_v52 = vand.u32 2147483647, %v5378_v63  ;;  %v3825_v59 = vpop.eup %3824  ;;  %v1300_v55 = vsub.f32 2.0, %v1236_v53 }
 0x237   : > { %v2183_v50 = vmul.f32 1.442695, %v2149_v45  ;;  %v1731_v22 = vmul.f32 0.3275911, %v1699_v21  ;;  %v5395_v16 = vmul.f32 0.5, %v5324_v47  ;;  %v3827_v57 = vpop.eup %3826  ;;  %v1241_v44 = vmul.f32 %v3825_v59, %v1081_v62  ;;  %v6663_v42 = vld [vmem:[#allocation39_spill] sm:$0xff] }
 0x238   : > { %vm1273_vm12 = vcmp.ge.f32.partialorder %v5143_v26, 0.0  ;;  %v952_v41 = vmul.f32 %v5317_v54, %v920_v18  ;;  %v1925_v19 = vadd.f32 1.4214138, %v1893_v36  ;;  %v1737_v30 = vmul.f32 0.3275911, %v5392_v52  ;;  %v6666_v26 = vld [vmem:[#allocation43_spill] sm:$0xff] }
 0x239   : > { %6661 = vst [vmem:[#allocation33_spill] sm:$0xff] %v5395_v16  ;;  %v2147_v3 = vmul.f32 %v2115_v5, %v1699_v21  ;;  %v2118_v33 = vsub.f32 0.0, %v5327_v32  ;;  %v5403_v10 = vadd.f32 %v5216_v39, %v6662_v15  ;;  %v5407_v47 = vadd.f32 %v6663_v42, %v5216_v39 }
 0x23a   : > { %v1079_v45 = vmul.f32 %v5259_v24, %v1047_v8  ;;  %v1018_v62 = vmul.f32 %v5297_v11, %v3163_v28  ;;  %v5412_v18 = vmul.f32 0.70710677, %v5389_v56  ;;  %v1769_v36 = vadd.f32 1.0, %v1737_v30  ;;  %v5427_v28 = vpop.f32.mrb[59].mxu1 }
 0x23b   : > { %v5414_v40 = vpop.eup %3828  ;;  %v1763_v21 = vadd.f32 1.0, %v1731_v22  ;;  %v5417_v5 = vmul.f32 0.5, %v5284_v0  ;;  %v5420_v59 = vmul.f32 0.70710677, %v5403_v10  ;;  %v5423_v15 = vmul.f32 0.70710677, %v5407_v47 }
 0x23c   : > { %6664 = vst [vmem:[#allocation37_spill] sm:$0xff] %v5412_v18  ;;  %v3161_v42 = vadd.f32 -0.28449672, %v952_v41  ;;  %v1957_v24 = vmul.f32 %v5339_v14, %v1925_v19  ;;  %v1830_v8 = vmul.f32 1.0614054, %v5414_v40  ;;  %3834 = vrcp.f32 %v1769_v36 }
 0x23d   : > { %v3831_v30 = vpop.eup %3830  ;;  %v1305_v61 = vsub.f32 2.0, %v1241_v44  ;;  %vm1271_vm13 = vcmp.ge.f32.partialorder %v5171_v13, 0.0  ;;  %v2179_v0 = vmul.f32 1.442695, %v2147_v3  ;;  %v2150_v22 = vmul.f32 %v2118_v33, %v5327_v32 }
 0x23e   : > { %v5432_v4 = vand.u32 2147483647, %v5420_v59  ;;  %v1239_v7 = vmul.f32 %v3827_v57, %v1079_v45  ;;  %v1050_v17 = vadd.f32 0.2548296, %v1018_v62  ;;  %v1700_v41 = vand.u32 2147483647, %v5412_v18  ;;  %v3833_v36 = vpop.eup %3832 }
 0x23f   : > { %v5436_v19 = vand.u32 2147483647, %v5423_v15  ;;  %v1332_v51 = vsel %vm1268_vm11, %v1300_v55, %v1236_v53  ;;  %3836 = vpow2.f32 %v2183_v50  ;;  %v3176_v29 = vadd.f32 -1.4531521, %v1830_v8 }
 0x240   : > { %v1735_v3 = vmul.f32 0.3275911, %v5432_v4  ;;  %v1016_v32 = vmul.f32 %v5317_v54, %v3161_v42  ;;  %v3207_v33 = vadd.f32 -0.28449672, %v1957_v24  ;;  %3838 = vrcp.f32 %v1763_v21 }
 0x241   : > { %v1738_v57 = vmul.f32 0.3275911, %v5436_v19  ;;  %v1337_v45 = vsel %vm1273_vm12, %v1305_v61, %v1241_v44  ;;  %3840 = vpow2.f32 %v2179_v0  ;;  %v2185_v62 = vmul.f32 1.442695, %v2150_v22 }
 0x242   : > { %v1767_v31 = vadd.f32 1.0, %v1735_v3  ;;  %v1303_v16 = vsub.f32 2.0, %v1239_v7  ;;  %v1082_v43 = vmul.f32 %v5297_v11, %v1050_v17  ;;  %v1732_v53 = vmul.f32 0.3275911, %v1700_v41  ;;  %v6668_v17 = vld [vmem:[#allocation46_spill] sm:$0xff]  ;;  %v6669_v11 = vld [vmem:[#allocation47_spill] sm:$0xff] }
 0x243   : > { %v1770_v55 = vadd.f32 1.0, %v1738_v57  ;;  %v5447_v50 = vmul.f32 %v5278_v20, %v1332_v51  ;;  %v1894_v42 = vmul.f32 %v5414_v40, %v3176_v29  ;;  %v2116_v24 = vsub.f32 0.0, %v1700_v41 }
 0x244   : > { %3842 = vrcp.f32 %v1767_v31  ;;  %v1048_v21 = vadd.f32 0.2548296, %v1016_v32  ;;  %v2021_v8 = vmul.f32 %v5339_v14, %v3207_v33  ;;  %v5453_v61 = vadd.f32 %v5216_v39, %v6666_v26 }
 0x245   : > { %6665 = vst [vmem:[#allocation39_spill] sm:$0xff] %v5447_v50  ;;  %3844 = vrcp.f32 %v1770_v55  ;;  %v5456_v44 = vmul.f32 %v5295_v46, %v1337_v45  ;;  %v5460_v20 = vadd.f32 %v6668_v17, %v5216_v39  ;;  %v5464_v29 = vadd.f32 %v5216_v39, %v6669_v11 }
 0x246   : > { %3846 = vpow2.f32 %v2185_v62  ;;  %v5466_v31 = vpop.eup %3834  ;;  %v1335_v51 = vsel %vm1271_vm13, %v1303_v16, %v1239_v7  ;;  %v1242_v0 = vmul.f32 %v3831_v30, %v1082_v43  ;;  %vm1274_vm14 = vcmp.ge.f32.partialorder %v5203_v12, 0.0 }
 0x247   : > { %6667 = vst [vmem:[#allocation43_spill] sm:$0xff] %v5456_v44  ;;  %v1764_v22 = vadd.f32 1.0, %v1732_v53  ;;  %v5472_v46 = vmul.f32 0.70710677, %v5453_v61  ;;  %v1926_v3 = vadd.f32 1.4214138, %v1894_v42  ;;  %v2148_v32 = vmul.f32 %v2116_v24, %v1700_v41 }
 0x248   : > { %v1833_v33 = vmul.f32 1.0614054, %v5466_v31  ;;  %v5476_v57 = vmul.f32 0.70710677, %v5460_v20  ;;  %v1080_v45 = vmul.f32 %v5317_v54, %v1048_v21  ;;  %v2053_v62 = vadd.f32 0.2548296, %v2021_v8 }
 0x249   : > { %v5480_v13 = vand.u32 2147483647, %v5472_v46  ;;  %v5483_v7 = vmul.f32 0.70710677, %v5464_v29  ;;  %v3837_v16 = vpop.eup %3836  ;;  %v5486_v30 = vmul.f32 0.5, %v5389_v56  ;;  %v2121_v41 = vsub.f32 0.0, %v5392_v52 }
 0x24a   : > { %v3179_v43 = vadd.f32 -1.4531521, %v1833_v33  ;;  %v5490_v53 = vand.u32 2147483647, %v5476_v57  ;;  %v5492_v55 = vpop.eup %3838  ;;  %v5495_v54 = vmul.f32 %v5308_v35, %v1335_v51  ;;  %v1306_v42 = vsub.f32 2.0, %v1242_v0 }
 0x24b   : > { %6670 = vst [vmem:[#allocation46_spill] sm:$0xff] %v5486_v30  ;;  %6671 = vst [vmem:[#allocation47_spill] sm:$0xff] %v5492_v55  ;;  %3848 = vrcp.f32 %v1764_v22  ;;  %v1736_v24 = vmul.f32 0.3275911, %v5480_v13  ;;  %v5498_v21 = vpop.eup %3840  ;;  %vm1272_vm15 = vcmp.ge.f32.partialorder %v5225_v38, 0.0  ;;  %v1958_v56 = vmul.f32 %v5414_v40, %v1926_v3 }
 0x24c   : > { %6672 = vst [vmem:[#allocation57_spill] sm:$0xff] %v5495_v54  ;;  %6673 = vst [vmem:[#allocation58_spill] sm:$0xff] %v5498_v21  ;;  %v1897_v8 = vmul.f32 %v5466_v31, %v3179_v43  ;;  %v1741_v26 = vmul.f32 0.3275911, %v5490_v53  ;;  %v5505_v17 = vand.u32 2147483647, %v5483_v7  ;;  %v1240_v11 = vmul.f32 %v3833_v36, %v1080_v45 }
 0x24d   : > { %v2085_v35 = vmul.f32 %v5339_v14, %v2053_v62  ;;  %v2181_v51 = vmul.f32 1.442695, %v2148_v32  ;;  %v1768_v22 = vadd.f32 1.0, %v1736_v24  ;;  %v2153_v54 = vmul.f32 %v2121_v41, %v5392_v52  ;;  %v6674_v36 = vld [vmem:[#allocation48_spill] sm:$0xff] }
 0x24e   : > { %v5508_v33 = vpop.eup %3842  ;;  %v1929_v44 = vadd.f32 1.4214138, %v1897_v8  ;;  %v1773_v50 = vadd.f32 1.0, %v1741_v26  ;;  %v1739_v3 = vmul.f32 0.3275911, %v5505_v17  ;;  %v2119_v21 = vsub.f32 0.0, %v5432_v4 }
 0x24f   : > { %v5512_v30 = vpop.eup %3844  ;;  %v1831_v43 = vmul.f32 1.0614054, %v5508_v33  ;;  %3850 = vrcp.f32 %v1768_v22  ;;  %v5518_v14 = vadd.f32 %v6674_v36, %v5216_v39  ;;  %v1338_v45 = vsel %vm1274_vm14, %v1306_v42, %v1242_v0 }
 0x250   : > { %v5520_v32 = vpop.eup %3846  ;;  %vm2277_vm0 = vcmp.ge.f32.partialorder %v5253_v34, 0.0  ;;  %v3208_v52 = vadd.f32 -0.28449672, %v1958_v56  ;;  %v1834_v62 = vmul.f32 1.0614054, %v5512_v30  ;;  %3852 = vrcp.f32 %v1773_v50 }
 0x251   : > { %v1304_v41 = vsub.f32 2.0, %v1240_v11  ;;  %v2245_v24 = vmul.f32 %v3837_v16, %v2085_v35  ;;  %v3177_v8 = vadd.f32 -1.4531521, %v1831_v43  ;;  %v1771_v26 = vadd.f32 1.0, %v1739_v3  ;;  %v6676_v3 = vld [vmem:[#allocation12_spill] sm:$0xff] }
 0x252   : > { %v1961_v22 = vmul.f32 %v5466_v31, %v1929_v44  ;;  %v2191_v18 = vmul.f32 1.442695, %v2153_v54  ;;  %v3180_v36 = vadd.f32 -1.4531521, %v1834_v62  ;;  %v2122_v1 = vsub.f32 0.0, %v5436_v19 }
 0x253   : > { %v1895_v55 = vmul.f32 %v5508_v33, %v3177_v8  ;;  %v2151_v12 = vmul.f32 %v2119_v21, %v5432_v4  ;;  %3854 = vrcp.f32 %v1771_v26  ;;  %v5531_v0 = vmul.f32 0.70710677, %v5518_v14 }
 0x254   : > { %v2022_v50 = vmul.f32 %v5414_v40, %v3208_v52  ;;  %3856 = vpow2.f32 %v2181_v51  ;;  %v5535_v16 = vmul.f32 0.5, %v5352_v37  ;;  %v1898_v44 = vmul.f32 %v5512_v30, %v3180_v36 }
 0x255   : > { %v5538_v54 = vpop.eup %3848  ;;  %v1336_v42 = vsel %vm1272_vm15, %v1304_v41, %v1240_v11  ;;  %v2309_v56 = vsub.f32 2.0, %v2245_v24  ;;  %v5543_v4 = vmul.f32 0.5, %v5403_v10  ;;  %v5546_v21 = vand.u32 2147483647, %v5531_v0 }
 0x256   : > { %v5549_v35 = vmul.f32 %v5357_v25, %v1338_v45  ;;  %v3211_v51 = vadd.f32 -0.28449672, %v1961_v22  ;;  %v1927_v37 = vadd.f32 1.4214138, %v1895_v55  ;;  %v5553_v43 = vadd.f32 %v5216_v39, %v6676_v3 }
 0x257   : > { %3858 = vpow2.f32 %v2191_v18  ;;  %v2187_v52 = vmul.f32 1.442695, %v2151_v12  ;;  %v2154_v38 = vmul.f32 %v2122_v1, %v5436_v19  ;;  %v1742_v11 = vmul.f32 0.3275911, %v5546_v21 }
 0x258   : > { %6675 = vst [vmem:[#allocation48_spill] sm:$0xff] %v5549_v35  ;;  %v5558_v10 = vmul.f32 %v5367_v9, %v1336_v42  ;;  %v2054_v62 = vadd.f32 0.2548296, %v2022_v50  ;;  %v1930_v41 = vadd.f32 1.4214138, %v1898_v44  ;;  %v2341_v55 = vsel %vm2277_vm0, %v2309_v56, %v2245_v24 }
 0x259   : > { %v5561_v25 = vmul.f32 0.70710677, %v5553_v43  ;;  %v5563_v45 = vpop.eup %3850  ;;  %v5568_v18 = vmul.f32 0.5, %v5407_v47  ;;  %v2120_v1 = vsub.f32 0.0, %v5480_v13  ;;  %v1774_v19 = vadd.f32 1.0, %v1742_v11 }
 0x25a   : > { %6677 = vst [vmem:[#allocation12_spill] sm:$0xff] %v5558_v10  ;;  %v5571_v8 = vpop.eup %3852  ;;  %v2025_v9 = vmul.f32 %v5466_v31, %v3211_v51  ;;  %v1959_v26 = vmul.f32 %v5508_v33, %v1927_v37  ;;  %v1832_v22 = vmul.f32 1.0614054, %v5563_v45  ;;  %v2193_v12 = vmul.f32 1.442695, %v2154_v38 }
 0x25b   : > { %v5577_v36 = vand.u32 2147483647, %v5561_v25  ;;  %v1837_v34 = vmul.f32 1.0614054, %v5571_v8  ;;  %v2125_v47 = vsub.f32 0.0, %v5490_v53  ;;  %3860 = vrcp.f32 %v1774_v19 }
 0x25c   : > { %v2086_v24 = vmul.f32 %v5414_v40, %v2054_v62  ;;  %v1962_v50 = vmul.f32 %v5512_v30, %v1930_v41  ;;  %v3178_v44 = vadd.f32 -1.4531521, %v1832_v22  ;;  %v5587_v51 = vmul.f32 %v5384_v6, %v2341_v55 }
 0x25d   : > { %v1740_v42 = vmul.f32 0.3275911, %v5577_v36  ;;  %v5584_v56 = vpop.eup %3854  ;;  %3862 = vpow2.f32 %v2187_v52  ;;  %v2152_v37 = vmul.f32 %v2120_v1, %v5480_v13  ;;  %v3183_v3 = vadd.f32 -1.4531521, %v1837_v34  ;;  %v6680_v52 = vld [vmem:[#allocation14_spill] sm:$0xff] }
 0x25e   : > { %6678 = vst [vmem:[#allocation59_spill] sm:$0xff] %v5587_v51  ;;  %v5590_v38 = vpop.eup %3856  ;;  %v2057_v11 = vadd.f32 0.2548296, %v2025_v9  ;;  %v3209_v19 = vadd.f32 -0.28449672, %v1959_v26  ;;  %v1896_v40 = vmul.f32 %v5563_v45, %v3178_v44  ;;  %vm2278_vm1 = vcmp.ge.f32.partialorder %v5303_v58, 0.0 }
 0x25f   : > { %6679 = vst [vmem:[#allocation60_spill] sm:$0xff] %v5590_v38  ;;  %v1835_v62 = vmul.f32 1.0614054, %v5584_v56  ;;  %v1901_v41 = vmul.f32 %v5571_v8, %v3183_v3  ;;  %v2157_v22 = vmul.f32 %v2125_v47, %v5490_v53  ;;  %v1772_v6 = vadd.f32 1.0, %v1740_v42 }
 0x260   : > { %v5599_v55 = vadd.f32 %v6680_v52, %v5216_v39  ;;  %v2246_v13 = vmul.f32 %v5520_v32, %v2086_v24  ;;  %v3212_v1 = vadd.f32 -0.28449672, %v1962_v50  ;;  %v1928_v9 = vadd.f32 1.4214138, %v1896_v40 }
 0x261   : > { %v3181_v26 = vadd.f32 -1.4531521, %v1835_v62  ;;  %v3859_v34 = vpop.eup %3858  ;;  %v2189_v44 = vmul.f32 1.442695, %v2152_v37  ;;  %v1933_v35 = vadd.f32 1.4214138, %v1901_v41  ;;  %3864 = vrcp.f32 %v1772_v6 }
 0x262   : > { %v2123_v10 = vsub.f32 0.0, %v5505_v17  ;;  %v2089_v3 = vmul.f32 %v5466_v31, %v2057_v11  ;;  %v2023_v53 = vmul.f32 %v5508_v33, %v3209_v19  ;;  %3866 = vpow2.f32 %v2193_v12  ;;  %v5613_v37 = vpop.f32.mrb[60].mxu1 }
 0x263   : > { %v1960_v47 = vmul.f32 %v5563_v45, %v1928_v9  ;;  %v5607_v42 = vmul.f32 0.5, %v5453_v61  ;;  %v2199_v32 = vmul.f32 1.442695, %v2157_v22  ;;  %v1899_v24 = vmul.f32 %v5584_v56, %v3181_v26  ;;  %6681 = vst [vmem:[#allocation14_spill] sm:$0xff] %v5613_v37  ;;  %v5620_v11 = vpop.f32.mrb[61].mxu1 }
 0x264   : > { %v5611_v50 = vmul.f32 0.70710677, %v5599_v55  ;;  %v2310_v40 = vsub.f32 2.0, %v2246_v13  ;;  %v2026_v62 = vmul.f32 %v5512_v30, %v3212_v1  ;;  %v1965_v31 = vmul.f32 %v5571_v8, %v1933_v35  ;;  %6682 = vst [vmem:[#allocation61_spill] sm:$0xff] %v5620_v11  ;;  %v5631_v6 = vpop.f32.mrb[62].mxu1 }
 0x265   : > { %v5618_v12 = vmul.f32 0.5, %v5460_v20  ;;  %v5622_v61 = vpop.eup %3860  ;;  %3868 = vpow2.f32 %v2189_v44  ;;  %v2155_v19 = vmul.f32 %v2123_v10, %v5505_v17  ;;  %v5626_v41 = vmul.f32 0.5, %v5464_v29  ;;  %6683 = vst [vmem:[#allocation62_spill] sm:$0xff] %v5631_v6  ;;  %v5635_v9 = vpop.f32.mrb[63].mxu1 }
 0x266   : > { %v5629_v22 = vand.u32 2147483647, %v5611_v50  ;;  %v2249_v52 = vmul.f32 %v3859_v34, %v2089_v3  ;;  %vm2281_vm2 = vcmp.ge.f32.partialorder %v5378_v63, 0.0  ;;  %v2055_v20 = vadd.f32 0.2548296, %v2023_v53  ;;  %6684 = vst [vmem:[#allocation63_spill] sm:$0xff] %v5635_v9 }
 0x267   : > { %v3210_v35 = vadd.f32 -0.28449672, %v1960_v47  ;;  %v2126_v1 = vsub.f32 0.0, %v5546_v21  ;;  %v3863_v26 = vpop.eup %3862  ;;  %3870 = vpow2.f32 %v2199_v32  ;;  %v1931_v17 = vadd.f32 1.4214138, %v1899_v24  ;;  %v6685_v3 = vld [vmem:[#allocation25_spill] sm:$0xff] }
 0x268   : > { %v1838_v29 = vmul.f32 1.0614054, %v5622_v61  ;;  %v1745_v10 = vmul.f32 0.3275911, %v5629_v22  ;;  %v2342_v44 = vsel %vm2278_vm1, %v2310_v40, %v2246_v13  ;;  %v2058_v6 = vadd.f32 0.2548296, %v2026_v62 }
 0x269   : > { %v3215_v34 = vadd.f32 -0.28449672, %v1965_v31  ;;  %v5643_v53 = vadd.f32 %v5216_v39, %v6685_v3  ;;  %v2195_v47 = vmul.f32 1.442695, %v2155_v19  ;;  %v5646_v9 = vmul.f32 0.5, %v5518_v14 }
 0x26a   : > { %v3184_v11 = vadd.f32 -1.4531521, %v1838_v29  ;;  %v1777_v32 = vadd.f32 1.0, %v1745_v10  ;;  %v2313_v24 = vsub.f32 2.0, %v2249_v52  ;;  %v2024_v38 = vmul.f32 %v5563_v45, %v3210_v35 }
 0x26b   : > { %v2158_v37 = vmul.f32 %v2126_v1, %v5546_v21  ;;  %v5651_v58 = vmul.f32 0.70710677, %v5643_v53  ;;  %v5653_v13 = vpop.eup %3864  ;;  %v2087_v40 = vmul.f32 %v5508_v33, %v2055_v20  ;;  %v1963_v62 = vmul.f32 %v5584_v56, %v1931_v17  ;;  %v6686_v21 = vld [vmem:[#allocation16_spill] sm:$0xff] }
 0x26c   : > { %v1902_v31 = vmul.f32 %v5622_v61, %v3184_v11  ;;  %3872 = vrcp.f32 %v1777_v32  ;;  %v3867_v14 = vpop.eup %3866  ;;  %v2090_v19 = vmul.f32 %v5512_v30, %v2058_v6  ;;  %v2029_v29 = vmul.f32 %v5571_v8, %v3215_v34  ;;  %v3694_v17 = vld [vmem:[#allocation7] sm:$0xff]  }
 0x26d   : > { %v1836_v35 = vmul.f32 1.0614054, %v5653_v13  ;;  %v5663_v1 = vadd.f32 %v6686_v21, %v5216_v39  ;;  %v5666_v10 = vmul.f32 %v5417_v5, %v2342_v44  ;;  %v2124_v20 = vsub.f32 0.0, %v5577_v36  ;;  %3501 = vmatprep.subr.bf16.mxu0 %v3694_v17 }
 0x26e   : > { %v1934_v33 = vadd.f32 1.4214138, %v1902_v31  ;;  %v5670_v11 = vand.u32 2147483647, %v5651_v58  ;;  %vm2279_vm3 = vcmp.ge.f32.partialorder %v5420_v59, 0.0  ;;  %3874 = vpow2.f32 %v2195_v47 }
 0x26f   : > { %6687 = vst [vmem:[#allocation25_spill] sm:$0xff] %v5666_v10  ;;  %v2056_v30 = vadd.f32 0.2548296, %v2024_v38  ;;  %v2201_v6 = vmul.f32 1.442695, %v2158_v37  ;;  %v3869_v3 = vpop.eup %3868  ;;  %v2345_v32 = vsel %vm2281_vm2, %v2313_v24, %v2249_v52  ;;  %v2247_v21 = vmul.f32 %v3863_v26, %v2087_v40 }
 0x270   : > { %v3182_v34 = vadd.f32 -1.4531521, %v1836_v35  ;;  %vm2282_vm4 = vcmp.ge.f32.partialorder %v5423_v15, 0.0  ;;  %v3213_v5 = vadd.f32 -0.28449672, %v1963_v62  ;;  %v2250_v31 = vmul.f32 %v3867_v14, %v2090_v19 }
 0x271   : > { %v1743_v44 = vmul.f32 0.3275911, %v5670_v11  ;;  %v2061_v10 = vadd.f32 0.2548296, %v2029_v29  ;;  %v5679_v38 = vmul.f32 0.70710677, %v5663_v1  ;;  %v3871_v37 = vpop.eup %3870  ;;  %v1966_v47 = vmul.f32 %v5622_v61, %v1934_v33 }
 0x272   : > { %v1900_v51 = vmul.f32 %v5653_v13, %v3182_v34  ;;  %v2156_v63 = vmul.f32 %v2124_v20, %v5577_v36  ;;  %v2129_v52 = vsub.f32 0.0, %v5629_v22  ;;  %v2088_v24 = vmul.f32 %v5563_v45, %v2056_v30 }
 0x273   : > { %v1775_v26 = vadd.f32 1.0, %v1743_v44  ;;  %3876 = vpow2.f32 %v2201_v6  ;;  %v5686_v62 = vmul.f32 0.5, %v5553_v43  ;;  %v2311_v14 = vsub.f32 2.0, %v2247_v21 }
 0x274   : > { %v1932_v40 = vadd.f32 1.4214138, %v1900_v51  ;;  %v2027_v19 = vmul.f32 %v5584_v56, %v3213_v5  ;;  %v5690_v29 = vand.u32 2147483647, %v5679_v38  ;;  %v5693_v35 = vmul.f32 %v5535_v16, %v2345_v32  ;;  %v6689_v32 = vld [vmem:[#allocation35_spill] sm:$0xff] }
 0x275   : > { %3878 = vrcp.f32 %v1775_v26  ;;  %v2314_v36 = vsub.f32 2.0, %v2250_v31  ;;  %v2093_v33 = vmul.f32 %v5571_v8, %v2061_v10  ;;  %vm2280_vm5 = vcmp.ge.f32.partialorder %v5472_v46, 0.0 }
 0x276   : > { %6688 = vst [vmem:[#allocation16_spill] sm:$0xff] %v5693_v35  ;;  %v1964_v45 = vmul.f32 %v5653_v13, %v1932_v40  ;;  %v5697_v20 = vpop.eup %3872  ;;  %v3216_v43 = vadd.f32 -0.28449672, %v1966_v47  ;;  %v2197_v51 = vmul.f32 1.442695, %v2156_v63  ;;  %v2161_v17 = vmul.f32 %v2129_v52, %v5629_v22 }
 0x277   : > { %v1746_v30 = vmul.f32 0.3275911, %v5690_v29  ;;  %v2248_v6 = vmul.f32 %v3869_v3, %v2088_v24  ;;  %v1841_v16 = vmul.f32 1.0614054, %v5697_v20  ;;  %v5705_v5 = vadd.f32 %v5216_v39, %v6689_v32 }
 0x278   : > { %v3214_v34 = vadd.f32 -0.28449672, %v1964_v45  ;;  %v2343_v8 = vsel %vm2279_vm3, %v2311_v14, %v2247_v21  ;;  %vm2285_vm6 = vcmp.ge.f32.partialorder %v5476_v57, 0.0  ;;  %v2059_v10 = vadd.f32 0.2548296, %v2027_v19  ;;  %v3875_v47 = vpop.eup %3874 }
 0x279   : > { %v1778_v44 = vadd.f32 1.0, %v1746_v30  ;;  %v5712_v22 = vadd.f32 %v5088_v27, %v5216_v39  ;;  %v2346_v3 = vsel %vm2282_vm4, %v2314_v36, %v2250_v31  ;;  %v2253_v63 = vmul.f32 %v3871_v37, %v2093_v33 }
 0x27a   : > { %v3187_v52 = vadd.f32 -1.4531521, %v1841_v16  ;;  %v5717_v26 = vmul.f32 0.70710677, %v5705_v5  ;;  %v2030_v59 = vmul.f32 %v5622_v61, %v3216_v43  ;;  %v2207_v21 = vmul.f32 1.442695, %v2161_v17 }
 0x27b   : > { %3880 = vrcp.f32 %v1778_v44  ;;  %v5721_v24 = vmul.f32 0.70710677, %v5712_v22  ;;  %v2312_v40 = vsub.f32 2.0, %v2248_v6  ;;  %v2028_v27 = vmul.f32 %v5653_v13, %v3214_v34 }
 0x27c   : > { %v1905_v14 = vmul.f32 %v5697_v20, %v3187_v52  ;;  %v5726_v15 = vand.u32 2147483647, %v5717_v26  ;;  %v2091_v31 = vmul.f32 %v5584_v56, %v2059_v10  ;;  %3882 = vpow2.f32 %v2197_v51 }
 0x27d   : > { %v2127_v37 = vsub.f32 0.0, %v5670_v11  ;;  %v5731_v19 = vand.u32 2147483647, %v5721_v24  ;;  %v3877_v36 = vpop.eup %3876  ;;  %v2317_v33 = vsub.f32 2.0, %v2253_v63  ;;  %v5734_v43 = vmul.f32 0.5, %v5599_v55 }
 0x27e   : > { %v1937_v45 = vadd.f32 1.4214138, %v1905_v14  ;;  %v1744_v17 = vmul.f32 0.3275911, %v5726_v15  ;;  %v5740_v34 = vmul.f32 %v5543_v4, %v2343_v8  ;;  %v5743_v56 = vmul.f32 %v5568_v18, %v2346_v3  ;;  %v6691_v14 = vld [vmem:[#allocation21_spill] sm:$0xff] }
 0x27f   : > { %v5737_v30 = vpop.eup %3878  ;;  %v2062_v51 = vadd.f32 0.2548296, %v2030_v59  ;;  %v1749_v16 = vmul.f32 0.3275911, %v5731_v19  ;;  %v2344_v32 = vsel %vm2280_vm5, %v2312_v40, %v2248_v6  ;;  %vm2283_vm7 = vcmp.ge.f32.partialorder %v5483_v7, 0.0 }
 0x280   : > { %6690 = vst [vmem:[#allocation35_spill] sm:$0xff] %v5743_v56  ;;  %v2060_v55 = vadd.f32 0.2548296, %v2028_v27  ;;  %3884 = vpow2.f32 %v2207_v21  ;;  %v1839_v10 = vmul.f32 1.0614054, %v5737_v30  ;;  %v2251_v44 = vmul.f32 %v3875_v47, %v2091_v31  ;;  %v6692_v47 = vld [vmem:[#allocation49_spill] sm:$0xff] }
 0x281   : > { %v2159_v52 = vmul.f32 %v2127_v37, %v5670_v11  ;;  %v1776_v4 = vadd.f32 1.0, %v1744_v17  ;;  %v1781_v8 = vadd.f32 1.0, %v1749_v16  ;;  %v2349_v18 = vsel %vm2285_vm6, %v2317_v33, %v2253_v63 }
 0x282   : > { %v1969_v3 = vmul.f32 %v5697_v20, %v1937_v45  ;;  %v3185_v59 = vadd.f32 -1.4531521, %v1839_v10  ;;  %v5756_v46 = vadd.f32 %v5216_v39, %v6691_v14  ;;  %v2094_v6 = vmul.f32 %v5622_v61, %v2062_v51 }
 0x283   : > { %v2130_v21 = vsub.f32 0.0, %v5690_v29  ;;  %3886 = vrcp.f32 %v1776_v4  ;;  %v5762_v11 = vadd.f32 %v6692_v47, %v5216_v39  ;;  %v2092_v40 = vmul.f32 %v5653_v13, %v2060_v55 }
 0x284   : > { %v1903_v57 = vmul.f32 %v5737_v30, %v3185_v59  ;;  %v5767_v63 = vmul.f32 0.5, %v5643_v53  ;;  %3888 = vrcp.f32 %v1781_v8  ;;  %v5772_v31 = vmul.f32 %v5607_v42, %v2344_v32 }
 0x285   : > { %v5769_v27 = vpop.eup %3880  ;;  %v2315_v61 = vsub.f32 2.0, %v2251_v44  ;;  %v2203_v37 = vmul.f32 1.442695, %v2159_v52  ;;  %v5775_v33 = vmul.f32 0.70710677, %v5756_v46  ;;  %v5778_v39 = vmul.f32 %v5618_v12, %v2349_v18  ;;  %v6695_v52 = vld [vmem:[#allocation23_spill] sm:$0xff] }
 0x286   : > { %6693 = vst [vmem:[#allocation21_spill] sm:$0xff] %v5772_v31  ;;  %v3219_v13 = vadd.f32 -0.28449672, %v1969_v3  ;;  %v1935_v45 = vadd.f32 1.4214138, %v1903_v57  ;;  %v3883_v53 = vpop.eup %3882  ;;  %v2254_v51 = vmul.f32 %v3877_v36, %v2094_v6  ;;  %vm2286_vm8 = vcmp.ge.f32.partialorder %v5531_v0, 0.0 }
 0x287   : > { %6694 = vst [vmem:[#allocation49_spill] sm:$0xff] %v5778_v39  ;;  %v1842_v17 = vmul.f32 1.0614054, %v5769_v27  ;;  %v2162_v16 = vmul.f32 %v2130_v21, %v5690_v29  ;;  %v5784_v42 = vand.u32 2147483647, %v5775_v33  ;;  %v2252_v55 = vmul.f32 %v3883_v53, %v2092_v40 }
 0x288   : > { %v5787_v32 = vmul.f32 0.70710677, %v5762_v11  ;;  %vm2284_vm9 = vcmp.ge.f32.partialorder %v5561_v25, 0.0  ;;  %v1967_v12 = vmul.f32 %v5737_v30, %v1935_v45  ;;  %v5794_v36 = vld [vmem:[%s6507_s2 + $0x1] ss:$0 sm:$0xff]  ;;  %v2347_v4 = vsel %vm2283_vm7, %v2315_v61, %v2251_v44 }
 0x289   : > { %v3188_v10 = vadd.f32 -1.4531521, %v1842_v17  ;;  %v5798_v29 = vadd.f32 %v5794_v36, %v6695_v52  ;;  %v5803_v8 = vmul.f32 0.5, %v5663_v1  ;;  %v1747_v18 = vmul.f32 0.3275911, %v5784_v42 }
 0x28a   : > { %v5807_v3 = vand.u32 2147483647, %v5787_v32  ;;  %v3885_v59 = vpop.eup %3884  ;;  %v2033_v14 = vmul.f32 %v5697_v20, %v3219_v13  ;;  %v3217_v6 = vadd.f32 -0.28449672, %v1967_v12  ;;  %v2209_v40 = vmul.f32 1.442695, %v2162_v16 }
 0x28b   : > { %v1906_v21 = vmul.f32 %v5769_v27, %v3188_v10  ;;  %v5812_v47 = vmul.f32 0.70710677, %v5798_v29  ;;  %v2128_v7 = vsub.f32 0.0, %v5726_v15  ;;  %v1779_v44 = vadd.f32 1.0, %v1747_v18 }
 0x28c   : > { %v1750_v1 = vmul.f32 0.3275911, %v5807_v3  ;;  %v5817_v57 = vmul.f32 %v5626_v41, %v2347_v4  ;;  %v2318_v61 = vsub.f32 2.0, %v2254_v51  ;;  %v2316_v45 = vsub.f32 2.0, %v2252_v55 }
 0x28d   : > { %v2133_v17 = vsub.f32 0.0, %v5731_v19  ;;  %v5820_v13 = vpop.eup %3886  ;;  %v2031_v53 = vmul.f32 %v5737_v30, %v3217_v6  ;;  %3890 = vrcp.f32 %v1779_v44  ;;  %v5824_v16 = vand.u32 2147483647, %v5812_v47 }
 0x28e   : > { %6696 = vst [vmem:[#allocation23_spill] sm:$0xff] %v5817_v57  ;;  %v1782_v12 = vadd.f32 1.0, %v1750_v1  ;;  %v5826_v10 = vpop.eup %3888  ;;  %v2065_v52 = vadd.f32 0.2548296, %v2033_v14  ;;  %3892 = vpow2.f32 %v2203_v37  ;;  %v1938_v18 = vadd.f32 1.4214138, %v1906_v21 }
 0x28f   : > { %v1840_v41 = vmul.f32 1.0614054, %v5820_v13  ;;  %3894 = vpow2.f32 %v2209_v40  ;;  %v2160_v4 = vmul.f32 %v2128_v7, %v5726_v15  ;;  %v5831_v39 = vmul.f32 0.5, %v5705_v5 }
 0x290   : > { %v1845_v6 = vmul.f32 1.0614054, %v5826_v10  ;;  %v2350_v44 = vsel %vm2286_vm8, %v2318_v61, %v2254_v51  ;;  %v2165_v57 = vmul.f32 %v2133_v17, %v5731_v19  ;;  %3896 = vrcp.f32 %v1782_v12 }
 0x291   : > { %v3186_v1 = vadd.f32 -1.4531521, %v1840_v41  ;;  %v2348_v37 = vsel %vm2284_vm9, %v2316_v45, %v2252_v55  ;;  %v2063_v14 = vadd.f32 0.2548296, %v2031_v53  ;;  %v1748_v40 = vmul.f32 0.3275911, %v5824_v16 }
 0x292   : > { %v3191_v21 = vadd.f32 -1.4531521, %v1845_v6  ;;  %v2097_v15 = vmul.f32 %v5697_v20, %v2065_v52  ;;  %v1970_v5 = vmul.f32 %v5769_v27, %v1938_v18  ;;  %v5844_v0 = vmul.f32 0.5, %v5712_v22  ;;  %v6699_v20 = vld [vmem:[#allocation26_spill] sm:$0xff]  ;;  %v6700_v52 = vld [vmem:[#allocation51_spill] sm:$0xff] }
 0x293   : > { %v1904_v7 = vmul.f32 %v5820_v13, %v3186_v1  ;;  %v5847_v51 = vmul.f32 %v5646_v9, %v2350_v44  ;;  %v2205_v19 = vmul.f32 1.442695, %v2160_v4  ;;  %v1780_v55 = vadd.f32 1.0, %v1748_v40 }
 0x294   : > { %v1909_v25 = vmul.f32 %v5826_v10, %v3191_v21  ;;  %v5851_v61 = vmul.f32 %v5686_v62, %v2348_v37  ;;  %v2215_v17 = vmul.f32 1.442695, %v2165_v57  ;;  %v5855_v53 = vadd.f32 %v5794_v36, %v6699_v20 }
 0x295   : > { %6697 = vst [vmem:[#allocation64_spill] sm:$0xff] %v5847_v51  ;;  %v1936_v45 = vadd.f32 1.4214138, %v1904_v7  ;;  %v2095_v12 = vmul.f32 %v5737_v30, %v2063_v14  ;;  %3898 = vrcp.f32 %v1780_v55  ;;  %v5860_v9 = vadd.f32 %v5794_v36, %v6700_v52 }
 0x296   : > { %6698 = vst [vmem:[#allocation65_spill] sm:$0xff] %v5851_v61  ;;  %v1941_v22 = vadd.f32 1.4214138, %v1909_v25  ;;  %v2257_v18 = vmul.f32 %v3885_v59, %v2097_v15  ;;  %vm2289_vm10 = vcmp.ge.f32.partialorder %v5611_v50, 0.0  ;;  %v3220_v41 = vadd.f32 -0.28449672, %v1970_v5 }
 0x297   : > { %v1968_v62 = vmul.f32 %v5820_v13, %v1936_v45  ;;  %v5865_v57 = vmul.f32 0.70710677, %v5855_v53  ;;  %v5867_v4 = vpop.eup %3890  ;;  %3900 = vpow2.f32 %v2205_v19  ;;  %v2131_v6 = vsub.f32 0.0, %v5784_v42 }
 0x298   : > { %v1973_v30 = vmul.f32 %v5826_v10, %v1941_v22  ;;  %v5872_v44 = vmul.f32 0.5, %v5756_v46  ;;  %v3893_v1 = vpop.eup %3892  ;;  %vm2287_vm11 = vcmp.ge.f32.partialorder %v5651_v58, 0.0  ;;  %3902 = vpow2.f32 %v2215_v17 }
 0x299   : > { %v3218_v59 = vadd.f32 -0.28449672, %v1968_v62  ;;  %v1843_v37 = vmul.f32 1.0614054, %v5867_v4  ;;  %v5877_v14 = vand.u32 2147483647, %v5865_v57  ;;  %v3895_v21 = vpop.eup %3894  ;;  %v2255_v40 = vmul.f32 %v3893_v1, %v2095_v12 }
 0x29a   : > { %v2134_v15 = vsub.f32 0.0, %v5807_v3  ;;  %v2132_v5 = vsub.f32 0.0, %v5824_v16  ;;  %v5882_v7 = vmul.f32 0.70710677, %v5860_v9  ;;  %v5884_v46 = vpop.eup %3896  ;;  %v2321_v19 = vsub.f32 2.0, %v2257_v18 }
 0x29b   : > { %v2034_v25 = vmul.f32 %v5769_v27, %v3220_v41  ;;  %v3189_v55 = vadd.f32 -1.4531521, %v1843_v37  ;;  %v1753_v45 = vmul.f32 0.3275911, %v5877_v14  ;;  %v3223_v17 = vadd.f32 -0.28449672, %v1973_v30 }
 0x29c   : > { %v2163_v20 = vmul.f32 %v2131_v6, %v5784_v42  ;;  %v1846_v12 = vmul.f32 1.0614054, %v5884_v46  ;;  %v5891_v22 = vand.u32 2147483647, %v5882_v7  ;;  %v2032_v52 = vmul.f32 %v5820_v13, %v3218_v59 }
 0x29d   : > { %v1907_v62 = vmul.f32 %v5867_v4, %v3189_v55  ;;  %v5896_v1 = vmul.f32 0.5, %v5762_v11  ;;  %v1785_v51 = vadd.f32 1.0, %v1753_v45  ;;  %v2319_v41 = vsub.f32 2.0, %v2255_v40 }
 0x29e   : > { %v3192_v37 = vadd.f32 -1.4531521, %v1846_v12  ;;  %v2166_v61 = vmul.f32 %v2134_v15, %v5807_v3  ;;  %v2164_v30 = vmul.f32 %v2132_v5, %v5824_v16  ;;  %v2066_v42 = vadd.f32 0.2548296, %v2034_v25 }
 0x29f   : > { %v1939_v6 = vadd.f32 1.4214138, %v1907_v62  ;;  %3904 = vrcp.f32 %v1785_v51  ;;  %v1751_v56 = vmul.f32 0.3275911, %v5891_v22  ;;  %v5901_v35 = vpop.eup %3898  ;;  %v2353_v59 = vsel %vm2289_vm10, %v2321_v19, %v2257_v18 }
 0x2a0   : > { %v2037_v11 = vmul.f32 %v5826_v10, %v3223_v17  ;;  %v2211_v55 = vmul.f32 1.442695, %v2163_v20  ;;  %v1910_v45 = vmul.f32 %v5884_v46, %v3192_v37  ;;  %v2064_v12 = vadd.f32 0.2548296, %v2032_v52 }
 0x2a1   : > { %v1971_v3 = vmul.f32 %v5867_v4, %v1939_v6  ;;  %v1844_v16 = vmul.f32 1.0614054, %v5901_v35  ;;  %v1783_v15 = vadd.f32 1.0, %v1751_v56  ;;  %v3901_v5 = vpop.eup %3900  ;;  %v2351_v51 = vsel %vm2287_vm11, %v2319_v41, %v2255_v40 }
 0x2a2   : > { %v1942_v25 = vadd.f32 1.4214138, %v1910_v45  ;;  %v2217_v62 = vmul.f32 1.442695, %v2166_v61  ;;  %v2213_v31 = vmul.f32 1.442695, %v2164_v30  ;;  %v3903_v50 = vpop.eup %3902  ;;  %v2098_v18 = vmul.f32 %v5769_v27, %v2066_v42 }
 0x2a3   : > { %v3221_v19 = vadd.f32 -0.28449672, %v1971_v3  ;;  %v3190_v17 = vadd.f32 -1.4531521, %v1844_v16  ;;  %3906 = vrcp.f32 %v1783_v15  ;;  %v5913_v20 = vmul.f32 %v5734_v43, %v2353_v59 }
 0x2a4   : > { %v2069_v52 = vadd.f32 0.2548296, %v2037_v11  ;;  %3908 = vpow2.f32 %v2211_v55  ;;  %v1974_v56 = vmul.f32 %v5884_v46, %v1942_v25  ;;  %v2096_v37 = vmul.f32 %v5820_v13, %v2064_v12 }
 0x2a5   : > { %v2035_v58 = vmul.f32 %v5867_v4, %v3221_v19  ;;  %v1908_v61 = vmul.f32 %v5901_v35, %v3190_v17  ;;  %v5921_v40 = vadd.f32 %v5794_v36, %v5257_v60  ;;  %v5924_v27 = vmul.f32 %v5767_v63, %v2351_v51 }
 0x2a6   : > { %vm2290_vm12 = vcmp.ge.f32.partialorder %v5679_v38, 0.0  ;;  %v3224_v43 = vadd.f32 -0.28449672, %v1974_v56  ;;  %3910 = vpow2.f32 %v2217_v62  ;;  %v5928_v41 = vmul.f32 0.5, %v5798_v29 }
 0x2a7   : > { %v2258_v30 = vmul.f32 %v3895_v21, %v2098_v18  ;;  %v1940_v13 = vadd.f32 1.4214138, %v1908_v61  ;;  %3912 = vpow2.f32 %v2213_v31  ;;  %v5931_v42 = vmul.f32 0.70710677, %v5921_v40 }
 0x2a8   : > { %v2067_v6 = vadd.f32 0.2548296, %v2035_v58  ;;  %v2038_v60 = vmul.f32 %v5884_v46, %v3224_v43  ;;  %v2137_v59 = vsub.f32 0.0, %v5877_v14  ;;  %v5937_v63 = vadd.f32 %v5794_v36, %v5286_v48 }
 0x2a9   : > { %v5939_v11 = vpop.eup %3904  ;;  %v2256_v55 = vmul.f32 %v3901_v5, %v2096_v37  ;;  %vm2288_vm13 = vcmp.ge.f32.partialorder %v5717_v26, 0.0  ;;  %v2101_v29 = vmul.f32 %v5826_v10, %v2069_v52  ;;  %v1972_v31 = vmul.f32 %v5901_v35, %v1940_v13 }
 0x2aa   : > { %v1722_v21 = vand.u32 2147483647, %v5931_v42  ;;  %v1849_v45 = vmul.f32 1.0614054, %v5939_v11  ;;  %v5947_v12 = vmul.f32 0.5, %v5855_v53  ;;  %v5950_v3 = vmul.f32 0.5, %v5860_v9 }
 0x2ab   : > { %v5953_v48 = vmul.f32 0.70710677, %v5937_v63  ;;  %v2322_v16 = vsub.f32 2.0, %v2258_v30  ;;  %v3222_v15 = vadd.f32 -0.28449672, %v1972_v31  ;;  %v2135_v5 = vsub.f32 0.0, %v5891_v22 }
 0x2ac   : > { %v1754_v10 = vmul.f32 0.3275911, %v1722_v21  ;;  %v2099_v51 = vmul.f32 %v5867_v4, %v2067_v6  ;;  %v2070_v25 = vadd.f32 0.2548296, %v2038_v60  ;;  %v3195_v62 = vadd.f32 -1.4531521, %v1849_v45 }
 0x2ad   : > { %v5958_v18 = vand.u32 2147483647, %v5953_v48  ;;  %v5960_v53 = vpop.eup %3906  ;;  %v2320_v19 = vsub.f32 2.0, %v2256_v55  ;;  %v2261_v9 = vmul.f32 %v3903_v50, %v2101_v29  ;;  %vm2293_vm14 = vcmp.ge.f32.partialorder %v5721_v24, 0.0 }
 0x2ae   : > { %v2169_v17 = vmul.f32 %v2137_v59, %v5877_v14  ;;  %v1786_v52 = vadd.f32 1.0, %v1754_v10  ;;  %v3909_v56 = vpop.eup %3908  ;;  %v2036_v37 = vmul.f32 %v5901_v35, %v3222_v15  ;;  %v1913_v58 = vmul.f32 %v5939_v11, %v3195_v62 }
 0x2af   : > { %v1847_v4 = vmul.f32 1.0614054, %v5960_v53  ;;  %v1752_v61 = vmul.f32 0.3275911, %v5958_v18  ;;  %v2354_v43 = vsel %vm2290_vm12, %v2322_v16, %v2258_v30  ;;  %vm2291_vm15 = vcmp.ge.f32.partialorder %v5775_v33, 0.0 }
 0x2b0   : > { %v2167_v50 = vmul.f32 %v2135_v5, %v5891_v22  ;;  %3914 = vrcp.f32 %v1786_v52  ;;  %v5974_v14 = vadd.f32 %v5794_v36, %v5354_v2  ;;  %v3911_v13 = vpop.eup %3910  ;;  %v2259_v6 = vmul.f32 %v3909_v56, %v2099_v51 }
 0x2b1   : > { %v2102_v60 = vmul.f32 %v5884_v46, %v2070_v25  ;;  %v1945_v59 = vadd.f32 1.4214138, %v1913_v58  ;;  %v3193_v29 = vadd.f32 -1.4531521, %v1847_v4  ;;  %v3913_v31 = vpop.eup %3912  ;;  %v2325_v45 = vsub.f32 2.0, %v2261_v9 }
 0x2b2   : > { %v2223_v15 = vmul.f32 1.442695, %v2169_v17  ;;  %v1784_v38 = vadd.f32 1.0, %v1752_v61  ;;  %v5979_v30 = vadd.f32 %v5794_v36, %v5360_v49  ;;  %v2352_v22 = vsel %vm2288_vm13, %v2320_v19, %v2256_v55 }
 0x2b3   : > { %v2068_v16 = vadd.f32 0.2548296, %v2036_v37  ;;  %v1977_v2 = vmul.f32 %v5939_v11, %v1945_v59  ;;  %v1911_v5 = vmul.f32 %v5960_v53, %v3193_v29  ;;  %v5986_v46 = vmul.f32 %v5803_v8, %v2354_v43 }
 0x2b4   : > { %vm2294_vm0 = vcmp.ge.f32.partialorder %v5787_v32, 0.0  ;;  %v2219_v10 = vmul.f32 1.442695, %v2167_v50  ;;  %v2138_v51 = vsub.f32 0.0, %v1722_v21  ;;  %3916 = vrcp.f32 %v1784_v38 }
 0x2b5   : > { %v2323_v25 = vsub.f32 2.0, %v2259_v6  ;;  %v2262_v62 = vmul.f32 %v3911_v13, %v2102_v60  ;;  %v3227_v49 = vadd.f32 -0.28449672, %v1977_v2  ;;  %v5990_v17 = vmul.f32 0.70710677, %v5974_v14 }
 0x2b6   : > { %v5993_v26 = vmul.f32 %v5831_v39, %v2352_v22  ;;  %3918 = vpow2.f32 %v2223_v15  ;;  %v1943_v55 = vadd.f32 1.4214138, %v1911_v5  ;;  %v5996_v19 = vmul.f32 0.70710677, %v5979_v30 }
 0x2b7   : > { %v2357_v8 = vsel %vm2293_vm14, %v2325_v45, %v2261_v9  ;;  %v2100_v52 = vmul.f32 %v5901_v35, %v2068_v16  ;;  %v2136_v56 = vsub.f32 0.0, %v5958_v18  ;;  %v1725_v37 = vand.u32 2147483647, %v5990_v17 }
 0x2b8   : > { %3920 = vpow2.f32 %v2219_v10  ;;  %v2170_v58 = vmul.f32 %v2138_v51, %v1722_v21  ;;  %v1723_v4 = vand.u32 2147483647, %v5996_v19  ;;  %v6006_v39 = vadd.f32 %v5794_v36, %v5373_v23 }
 0x2b9   : > { %v2355_v61 = vsel %vm2291_vm15, %v2323_v25, %v2259_v6  ;;  %v2326_v43 = vsub.f32 2.0, %v2262_v62  ;;  %v2041_v24 = vmul.f32 %v5939_v11, %v3227_v49  ;;  %v1757_v9 = vmul.f32 0.3275911, %v1725_v37 }
 0x2ba   : > { %v6011_v35 = vpop.eup %3914  ;;  %v6014_v50 = vmul.f32 %v5844_v0, %v2357_v8  ;;  %vm2292_vm1 = vcmp.ge.f32.partialorder %v5812_v47, 0.0  ;;  %v1975_v21 = vmul.f32 %v5960_v53, %v1943_v55  ;;  %v6019_v13 = vmul.f32 0.5, %v5921_v40 }
 0x2bb   : > { %v1755_v23 = vmul.f32 0.3275911, %v1723_v4  ;;  %v2260_v60 = vmul.f32 %v3913_v31, %v2100_v52  ;;  %v1850_v33 = vmul.f32 1.0614054, %v6011_v35  ;;  %v2168_v6 = vmul.f32 %v2136_v56, %v5958_v18 }
 0x2bc   : > { %v1789_v59 = vadd.f32 1.0, %v1757_v9  ;;  %v6024_v29 = vmul.f32 %v5872_v44, %v2355_v61  ;;  %v2225_v45 = vmul.f32 1.442695, %v2170_v58  ;;  %v6027_v15 = vmul.f32 0.70710677, %v6006_v39 }
 0x2bd   : > { %v1787_v0 = vadd.f32 1.0, %v1755_v23  ;;  %v2358_v38 = vsel %vm2294_vm0, %v2326_v43, %v2262_v62  ;;  %v2073_v40 = vadd.f32 0.2548296, %v2041_v24  ;;  %v3196_v22 = vadd.f32 -1.4531521, %v1850_v33 }
 0x2be   : > { %3922 = vrcp.f32 %v1789_v59  ;;  %v6031_v31 = vpop.eup %3916  ;;  %v3225_v16 = vadd.f32 -0.28449672, %v1975_v21  ;;  %v2141_v2 = vsub.f32 0.0, %v1725_v37  ;;  %v6034_v18 = vand.u32 2147483647, %v6027_v15 }
 0x2bf   : > { %3924 = vrcp.f32 %v1787_v0  ;;  %v2324_v44 = vsub.f32 2.0, %v2260_v60  ;;  %v1914_v5 = vmul.f32 %v6011_v35, %v3196_v22  ;;  %v1848_v10 = vmul.f32 1.0614054, %v6031_v31 }
 0x2c0   : > { %v2221_v51 = vmul.f32 1.442695, %v2168_v6  ;;  %v3919_v25 = vpop.eup %3918  ;;  %3926 = vpow2.f32 %v2225_v45  ;;  %v6039_v32 = vmul.f32 0.5, %v5937_v63  ;;  %v2139_v62 = vsub.f32 0.0, %v1723_v4 }
 0x2c1   : > { %v1758_v49 = vmul.f32 0.3275911, %v6034_v18  ;;  %v6043_v55 = vmul.f32 %v5896_v1, %v2358_v38  ;;  %v2105_v8 = vmul.f32 %v5939_v11, %v2073_v40  ;;  %v1946_v52 = vadd.f32 1.4214138, %v1914_v5  ;;  %v6702_v5 = vld [vmem:[#allocation59_spill] sm:$0xff] }
 0x2c2   : > { %v3194_v56 = vadd.f32 -1.4531521, %v1848_v10  ;;  %v3921_v58 = vpop.eup %3920  ;;  %v2039_v61 = vmul.f32 %v5960_v53, %v3225_v16  ;;  %v2173_v43 = vmul.f32 %v2141_v2, %v1725_v37  ;;  %v6048_v24 = vmul.f32 0.5, %v5974_v14  ;;  %v6701_v37 = vld [vmem:[#allocation47_spill] sm:$0xff]  ;;  %v6703_v10 = vld [vmem:[#allocation25_spill] sm:$0xff] }
 0x2c3   : > { %v1790_v9 = vadd.f32 1.0, %v1758_v49  ;;  %v2356_v63 = vsel %vm2292_vm1, %v2324_v44, %v2260_v60  ;;  %v1978_v21 = vmul.f32 %v6011_v35, %v1946_v52  ;;  %3928 = vpow2.f32 %v2221_v51 }
 0x2c4   : > { %v1912_v1 = vmul.f32 %v6031_v31, %v3194_v56  ;;  %vm2297_vm2 = vcmp.ge.f32.partialorder %v5865_v57, 0.0  ;;  %v2171_v11 = vmul.f32 %v2139_v62, %v1723_v4  ;;  %v6057_v23 = vadd.f32 %v5794_v36, %v5427_v28 }
 0x2c5   : > { %3930 = vrcp.f32 %v1790_v9  ;;  %v1827_v14 = vmul.f32 1.0614054, %v6701_v37  ;;  %v2265_v33 = vmul.f32 %v3919_v25, %v2105_v8  ;;  %v6061_v47 = vmul.f32 0.5, %v5979_v30 }
 0x2c6   : > { %v1944_v6 = vadd.f32 1.4214138, %v1912_v1  ;;  %v1828_v60 = vmul.f32 1.0614054, %v5538_v54  ;;  %v6065_v59 = vmul.f32 %v5928_v41, %v2356_v63  ;;  %v2071_v45 = vadd.f32 0.2548296, %v2039_v61 }
 0x2c7   : > { %v2231_v0 = vmul.f32 1.442695, %v2173_v43  ;;  %v6068_v4 = vmul.f32 0.70710677, %v6057_v23  ;;  %v3228_v28 = vadd.f32 -0.28449672, %v1978_v21 }
 0x2c8   : > { %v6070_v38 = vpop.eup %3922  ;;  %v1976_v40 = vmul.f32 %v6031_v31, %v1944_v6  ;;  %v3173_v22 = vadd.f32 -1.4531521, %v1827_v14  ;;  %v3174_v16 = vadd.f32 -1.4531521, %v1828_v60  ;;  %v2227_v44 = vmul.f32 1.442695, %v2171_v11 }
 0x2c9   : > { %v6073_v2 = vpop.eup %3924  ;;  %v1853_v30 = vmul.f32 1.0614054, %v6070_v38  ;;  %v1724_v41 = vand.u32 2147483647, %v6068_v4  ;;  %v2329_v25 = vsub.f32 2.0, %v2265_v33  ;;  %v2142_v49 = vsub.f32 0.0, %v6034_v18 }
 0x2ca   : > { %v1851_v62 = vmul.f32 1.0614054, %v6073_v2  ;;  %v1891_v8 = vmul.f32 %v6701_v37, %v3173_v22  ;;  %v6082_v52 = vpop.eup %3926  ;;  %v3226_v56 = vadd.f32 -0.28449672, %v1976_v40  ;;  %v1892_v9 = vmul.f32 %v5538_v54, %v3174_v16 }
 0x2cb   : > { %v3199_v61 = vadd.f32 -1.4531521, %v1853_v30  ;;  %v1756_v43 = vmul.f32 0.3275911, %v1724_v41  ;;  %v2103_v63 = vmul.f32 %v5960_v53, %v2071_v45  ;;  %v2042_v21 = vmul.f32 %v6011_v35, %v3228_v28 }
 0x2cc   : > { %v3197_v1 = vadd.f32 -1.4531521, %v1851_v62  ;;  %v1923_v11 = vadd.f32 1.4214138, %v1891_v8  ;;  %3932 = vpow2.f32 %v2231_v0  ;;  %v1924_v60 = vadd.f32 1.4214138, %v1892_v9 }
 0x2cd   : > { %v1917_v14 = vmul.f32 %v6070_v38, %v3199_v61  ;;  %v1788_v6 = vadd.f32 1.0, %v1756_v43  ;;  %v3929_v51 = vpop.eup %3928  ;;  %v2361_v22 = vsel %vm2297_vm2, %v2329_v25, %v2265_v33  ;;  %v2174_v30 = vmul.f32 %v2142_v49, %v6034_v18 }
 0x2ce   : > { %v1915_v40 = vmul.f32 %v6073_v2, %v3197_v1  ;;  %v1955_v16 = vmul.f32 %v6701_v37, %v1923_v11  ;;  %v2040_v45 = vmul.f32 %v6031_v31, %v3226_v56  ;;  %v1956_v0 = vmul.f32 %v5538_v54, %v1924_v60 }
 0x2cf   : > { %v6093_v53 = vpop.eup %3930  ;;  %v1949_v28 = vadd.f32 1.4214138, %v1917_v14  ;;  %3934 = vrcp.f32 %v1788_v6  ;;  %v6097_v62 = vmul.f32 %v3921_v58, %v2103_v63  ;;  %v2074_v8 = vadd.f32 0.2548296, %v2042_v21  ;;  %v6704_v63 = vld [vmem:[#allocation54_spill] sm:$0xff]  ;;  %v6705_v21 = vld [vmem:[#allocation37_spill] sm:$0xff] }
 0x2d0   : > { %v1947_v61 = vadd.f32 1.4214138, %v1915_v40  ;;  %v1854_v57 = vmul.f32 1.0614054, %v6093_v53  ;;  %v2140_v25 = vsub.f32 0.0, %v1724_v41  ;;  %3936 = vpow2.f32 %v2227_v44 }
 0x2d1   : > { %v1981_v33 = vmul.f32 %v6070_v38, %v1949_v28  ;;  %v3205_v18 = vadd.f32 -0.28449672, %v1955_v16  ;;  %v3206_v49 = vadd.f32 -0.28449672, %v1956_v0  ;;  %v2233_v56 = vmul.f32 1.442695, %v2174_v30 }
 0x2d2   : > { %v1979_v43 = vmul.f32 %v6073_v2, %v1947_v61  ;;  %v3200_v9 = vadd.f32 -1.4531521, %v1854_v57  ;;  %v2072_v1 = vadd.f32 0.2548296, %v2040_v45  ;;  %vm2275_vm3 = vcmp.ge.f32.partialorder %v6704_v63, 0.0  ;;  %v6706_v16 = vld [vmem:[#allocation14_spill] sm:$0xff] }
 0x2d3   : > { %v3231_v11 = vadd.f32 -0.28449672, %v1981_v33  ;;  %v2019_v14 = vmul.f32 %v6701_v37, %v3205_v18  ;;  %v2020_v58 = vmul.f32 %v5538_v54, %v3206_v49  ;;  %vm2276_vm4 = vcmp.ge.f32.partialorder %v6705_v21, 0.0  ;;  %v6710_v63 = vld [vmem:[#allocation33_spill] sm:$0xff] }
 0x2d4   : > { %v2106_v6 = vmul.f32 %v6011_v35, %v2074_v8  ;;  %v3229_v60 = vadd.f32 -0.28449672, %v1979_v43  ;;  %v1918_v40 = vmul.f32 %v6093_v53, %v3200_v9  ;;  %v6110_v44 = vadd.f32 %v5794_v36, %v6706_v16 }
 0x2d5   : > { %vm2295_vm5 = vcmp.ge.f32.partialorder %v5882_v7, 0.0  ;;  %v2045_v30 = vmul.f32 %v6070_v38, %v3231_v11  ;;  %v2172_v45 = vmul.f32 %v2140_v25, %v1724_v41  ;;  %v2051_v28 = vadd.f32 0.2548296, %v2019_v14 }
 0x2d6   : > { %v2052_v0 = vadd.f32 0.2548296, %v2020_v58  ;;  %v2043_v61 = vmul.f32 %v6073_v2, %v3229_v60  ;;  %v1950_v57 = vadd.f32 1.4214138, %v1918_v40  ;;  %3938 = vpow2.f32 %v2233_v56  ;;  %v3933_v8 = vpop.eup %3932 }
 0x2d7   : > { %v6116_v35 = vmul.f32 0.70710677, %v6110_v44  ;;  %v2104_v33 = vmul.f32 %v6031_v31, %v2072_v1  ;;  %v2077_v18 = vadd.f32 0.2548296, %v2045_v30  ;;  %v2083_v49 = vmul.f32 %v6701_v37, %v2051_v28  ;;  %v6707_v1 = vld [vmem:[#allocation58_spill] sm:$0xff]  ;;  %v6708_v37 = vld [vmem:[#allocation60_spill] sm:$0xff] }
 0x2d8   : > { %v2084_v43 = vmul.f32 %v5538_v54, %v2052_v0  ;;  %v2327_v9 = vsub.f32 2.0, %v6097_v62  ;;  %vm2298_vm6 = vcmp.ge.f32.partialorder %v5931_v42, 0.0  ;;  %v2075_v41 = vadd.f32 0.2548296, %v2043_v61 }
 0x2d9   : > { %v1982_v25 = vmul.f32 %v6093_v53, %v1950_v57  ;;  %v6125_v56 = vand.u32 2147483647, %v6116_v35  ;;  %v6127_v11 = vpop.eup %3934  ;;  %v2266_v14 = vmul.f32 %v6082_v52, %v2106_v6  ;;  %v2229_v31 = vmul.f32 1.442695, %v2172_v45 }
 0x2da   : > { %v2243_v58 = vmul.f32 %v6707_v1, %v2083_v49  ;;  %v2244_v60 = vmul.f32 %v6708_v37, %v2084_v43  ;;  %v6133_v54 = vmul.f32 %v5947_v12, %v2361_v22  ;;  %vm2296_vm7 = vcmp.ge.f32.partialorder %v5953_v48, 0.0  ;;  %v3937_v6 = vpop.eup %3936  ;;  %v6709_v1 = vld [vmem:[#allocation61_spill] sm:$0xff] }
 0x2db   : > { %v3232_v40 = vadd.f32 -0.28449672, %v1982_v25  ;;  %v1852_v16 = vmul.f32 1.0614054, %v6127_v11  ;;  %v1761_v30 = vmul.f32 0.3275911, %v6125_v56  ;;  %v2264_v28 = vmul.f32 %v3929_v51, %v2104_v33 }
 0x2dc   : > { %v2109_v0 = vmul.f32 %v6070_v38, %v2077_v18  ;;  %v2307_v61 = vsub.f32 2.0, %v2243_v58  ;;  %v2308_v52 = vsub.f32 2.0, %v2244_v60  ;;  %v2107_v45 = vmul.f32 %v6073_v2, %v2075_v41 }
 0x2dd   : > { %v2046_v57 = vmul.f32 %v6093_v53, %v3232_v40  ;;  %v3198_v49 = vadd.f32 -1.4531521, %v1852_v16  ;;  %v1793_v12 = vadd.f32 1.0, %v1761_v30  ;;  %v2330_v22 = vsub.f32 2.0, %v2266_v14 }
 0x2de   : > { %v2339_v43 = vsel %vm2275_vm3, %v2307_v61, %v2243_v58  ;;  %v2340_v25 = vsel %vm2276_vm4, %v2308_v52, %v2244_v60  ;;  %v6147_v51 = vadd.f32 %v5794_v36, %v6709_v1  ;;  %v2359_v38 = vsel %vm2295_vm5, %v2327_v9, %v6097_v62  ;;  %v6711_v58 = vld [vmem:[#allocation46_spill] sm:$0xff] }
 0x2df   : > { %v2078_v2 = vadd.f32 0.2548296, %v2046_v57  ;;  %v6153_v33 = vmul.f32 0.5, %v6006_v39  ;;  %v1916_v18 = vmul.f32 %v6127_v11, %v3198_v49  ;;  %v2328_v41 = vsub.f32 2.0, %v2264_v28 }
 0x2e0   : > { %vm2301_vm8 = vcmp.ge.f32.partialorder %v5990_v17, 0.0  ;;  %vm2299_vm9 = vcmp.ge.f32.partialorder %v5996_v19, 0.0  ;;  %v2403_v21 = vmul.f32 %v6710_v63, %v2339_v43  ;;  %v2404_v37 = vmul.f32 %v6711_v58, %v2340_v25  ;;  %v3939_v60 = vpop.eup %3938 }
 0x2e1   : > { %3940 = vrcp.f32 %v1793_v12  ;;  %v2269_v40 = vmul.f32 %v3933_v8, %v2109_v0  ;;  %v2267_v7 = vmul.f32 %v3937_v6, %v2107_v45  ;;  %v2110_v62 = vmul.f32 %v6093_v53, %v2078_v2  ;;  %v6712_v8 = vld [vmem:[#allocation62_spill] sm:$0xff]  ;;  %v3695_v53 = vld [vmem:[#allocation7 + $0x8] sm:$0xff]   ;;  %v3960_v2 = vld [vmem:[#allocation7] sm:$0xff]  }
 0x2e2   : > { %vm2302_vm10 = vcmp.ge.f32.partialorder %v6027_v15, 0.0  ;;  %v1948_v39 = vadd.f32 1.4214138, %v1916_v18  ;;  %v2362_v9 = vsel %vm2298_vm6, %v2330_v22, %v2266_v14  ;;  %3942 = vpow2.f32 %v2229_v31  ;;  %v6713_v14 = vld [vmem:[#allocation63_spill] sm:$0xff]  ;;  %v6714_v45 = vld [vmem:[#allocation21_spill] sm:$0xff] }
 0x2e3   : > { %v2435_v16 = vpack.c.bf16 %v2404_v37, %v2403_v21  ;;  %v6165_v30 = vmul.f32 0.70710677, %v6147_v51  ;;  %v2270_v61 = vmul.f32 %v3939_v60, %v2110_v62  ;;  %v2145_v57 = vsub.f32 0.0, %v6125_v56 }
 0x2e4   : > { %v1980_v52 = vmul.f32 %v6127_v11, %v1948_v39  ;;  %v6171_v0 = vadd.f32 %v5794_v36, %v6712_v8  ;;  %v2360_v6 = vsel %vm2296_vm7, %v2328_v41, %v2264_v28  ;;  %v6178_v31 = vadd.f32 %v5794_v36, %v6713_v14 }
 0x2e5   : > { %3469 = vmatprep.mubr.bf16.mxu0 %v2435_v16  ;;  %v1727_v42 = vand.u32 2147483647, %v6165_v30  ;;  %v2437_v49 = vpack.c.bf16 %v6714_v45, %v5740_v34  ;;  %v2333_v12 = vsub.f32 2.0, %v2269_v40  ;;  %v2331_v22 = vsub.f32 2.0, %v2267_v7 }
 0x2e6   : > { %v3230_v43 = vadd.f32 -0.28449672, %v1980_v52  ;;  %v6715_v25 = vpack.c.bf16 %v6703_v10, %v6702_v5  ;;  %v6186_v48 = vmul.f32 0.70710677, %v6171_v0  ;;  %v6189_v28 = vmul.f32 %v5950_v3, %v2359_v38  ;;  %v3696_v3 = vld [vmem:[#allocation7 + $0x10] sm:$0xff]   ;;  %v6716_v52 = vld [vmem:[#allocation16_spill] sm:$0xff] }
 0x2e7   : > { %v2334_v1 = vsub.f32 2.0, %v2270_v61  ;;  %v1759_v36 = vmul.f32 0.3275911, %v1727_v42  ;;  %v6192_v18 = vmul.f32 0.70710677, %v6178_v31  ;;  %v2396_v41 = vmul.f32 0.5, %v6057_v23 }
 0x2e8   : > { %3470 = vmatmul.mubr.bf16.vlgmr.msra.gmra.mrb[0].mxu0 %v6715_v25  ;;  %v2044_v34 = vmul.f32 %v6127_v11, %v3230_v43  ;;  %v2177_v5 = vmul.f32 %v2145_v57, %v6125_v56  ;;  %v6198_v10 = vand.u32 2147483647, %v6186_v48  ;;  %v6201_v38 = vmul.f32 %v6019_v13, %v2362_v9  ;;  %v6717_v57 = vld [vmem:[#allocation35_spill] sm:$0xff] }
 0x2e9   : > { %3502 = vmatpush3.bf16.msra.mxu0 %v3960_v2  ;;  %3473 = vmatprep.mubr.bf16.mxu0 %v2437_v49  ;;  %v6204_v63 = vmul.f32 %v6039_v32, %v2360_v6  ;;  %vm2300_vm11 = vcmp.ge.f32.partialorder %v6068_v4, 0.0  ;;  %v1791_v21 = vadd.f32 1.0, %v1759_v36  ;;  %v6208_v58 = vand.u32 2147483647, %v6192_v18  ;;  %v6718_v49 = vld [vmem:[#allocation23_spill] sm:$0xff] }
 0x2ea   : > { %3503 = vmatprep.subr.bf16.mxu0 %v3695_v53  ;;  %v2365_v23 = vsel %vm2301_vm8, %v2333_v12, %v2269_v40  ;;  %v2363_v56 = vsel %vm2299_vm9, %v2331_v22, %v2267_v7  ;;  %v2076_v37 = vadd.f32 0.2548296, %v2044_v34  ;;  %v1762_v60 = vmul.f32 0.3275911, %v6198_v10  ;;  %v6720_v22 = vld [vmem:[#allocation49_spill] sm:$0xff] }
 0x2eb   : > { %v6215_v13 = vpop.eup %3940  ;;  %v2366_v32 = vsel %vm2302_vm10, %v2334_v1, %v2270_v61  ;;  %3944 = vrcp.f32 %v1791_v21  ;;  %v2143_v62 = vsub.f32 0.0, %v1727_v42  ;;  %v1760_v39 = vmul.f32 0.3275911, %v6208_v58  ;;  %v3698_v21 = vld [vmem:[#allocation7 + $0x20] sm:$0xff]  }
 0x2ec   : > { %v2108_v9 = vmul.f32 %v6127_v11, %v2076_v37  ;;  %v1857_v17 = vmul.f32 1.0614054, %v6215_v13  ;;  %v6222_v40 = vmul.f32 1.442695, %v2177_v5  ;;  %v1794_v19 = vadd.f32 1.0, %v1762_v60  ;;  %v3943_v7 = vpop.eup %3942  ;;  %v6722_v60 = vld [vmem:[#allocation36_spill] sm:$0xff] }
 0x2ed   : > { %3504 = vmatpush3.bf16.msra.mxu0 %v3695_v53  ;;  %v6225_v16 = vmul.f32 %v6048_v24, %v2365_v23  ;;  %v6228_v15 = vmul.f32 %v6061_v47, %v2363_v56  ;;  %v1792_v61 = vadd.f32 1.0, %v1760_v39  ;;  %v2438_v8 = vpack.c.bf16 %v6717_v57, %v6716_v52  ;;  %v3697_v53 = vld [vmem:[#allocation7 + $0x18] sm:$0xff]   ;;  %v6719_v24 = vld [vmem:[#allocation65_spill] sm:$0xff]  ;;  %v6721_v47 = vld [vmem:[#allocation64_spill] sm:$0xff] }
 0x2ee   : > { %3505 = vmatprep.subr.bf16.mxu0 %v3696_v3  ;;  %v6233_v11 = vmul.f32 %v6153_v33, %v2366_v32  ;;  %v2268_v6 = vmul.f32 %v3943_v7, %v2108_v9  ;;  %v3203_v14 = vadd.f32 -1.4531521, %v1857_v17  ;;  %3946 = vrcp.f32 %v1794_v19  ;;  %v6723_v32 = vld [vmem:[#allocation38_spill] sm:$0xff]  ;;  %v6724_v39 = vld [vmem:[#allocation41_spill] sm:$0xff]  ;;  %v6725_v9 = vld [vmem:[#allocation44_spill] sm:$0xff] }
 0x2ef   : > { %v2175_v45 = vmul.f32 %v2143_v62, %v1727_v42  ;;  %3948 = vrcp.f32 %v1792_v61  ;;  %v2439_v12 = vpack.c.bf16 %v6719_v24, %v6718_v49  ;;  %v2440_v43 = vpack.c.bf16 %v6721_v47, %v6720_v22  ;;  %v6726_v19 = vld [vmem:[#allocation40_spill] sm:$0xff]  ;;  %v6727_v7 = vld [vmem:[#allocation42_spill] sm:$0xff]  ;;  %v6728_v52 = vld [vmem:[#allocation13_spill] sm:$0xff] }
 0x2f0   : > { %3474 = vmatmul.mubr.bf16.gmra.mrb[4].mxu0 %v2438_v8  ;;  %v2332_v25 = vsub.f32 2.0, %v2268_v6  ;;  %v1921_v1 = vmul.f32 %v6215_v13, %v3203_v14  ;;  %v2146_v2 = vsub.f32 0.0, %v6198_v10  ;;  %v2441_v33 = vpack.c.bf16 %v5993_v26, %v5924_v27  ;;  %v6729_v57 = vld [vmem:[#allocation29_spill] sm:$0xff]  ;;  %v6738_v14 = vld [vmem:[#allocation22_spill] sm:$0xff]  ;;  %v6739_v37 = vld [vmem:[#allocation24_spill] sm:$0xff] }
 0x2f1   : > { %3506 = vmatpush3.bf16.msra.mxu0 %v3696_v3  ;;  %v2144_v36 = vsub.f32 0.0, %v6208_v58  ;;  %3477 = vmatprep.mubr.bf16.mxu0 %v2439_v12  ;;  %v3699_v24 = vld [vmem:[#allocation7 + $0x28] sm:$0xff]   ;;  %v6743_v42 = vld [vmem:[#allocation32_spill] sm:$0xff]  ;;  %v6745_v22 = vld [vmem:[#allocation39_spill] sm:$0xff]  ;;  %v2235_v12 = vmul.f32 1.442695, %v2175_v45  ;;  %3950 = vpow2.f32 %v6222_v40  ;;  %v6752_v40 = vpack.c.bf16 %v5986_v46, %v5913_v20 }
 0x2f2   : > { %3507 = vmatprep.subr.bf16.mxu0 %v3697_v53  ;;  %v2364_v3 = vsel %vm2300_vm11, %v2332_v25, %v2268_v6  ;;  %v1953_v23 = vadd.f32 1.4214138, %v1921_v1  ;;  %v6748_v17 = vld [vmem:[#allocation57_spill] sm:$0xff]  ;;  %v2178_v26 = vmul.f32 %v2146_v2, %v6198_v10  ;;  %v3700_v1 = vld [vmem:[#allocation7 + $0x30] sm:$0xff]   ;;  %v3701_v45 = vld [vmem:[#allocation7 + $0x38] sm:$0xff]   ;;  %vm2305_vm12 = vcmp.ge.f32.partialorder %v6116_v35, 0.0 }
 0x2f3   : > { %v6256_v56 = vmul.f32 %v2396_v41, %v2364_v3  ;;  %v6746_v3 = vld [vmem:[#allocation31_spill] sm:$0xff]  ;;  %v2176_v25 = vmul.f32 %v2144_v36, %v6208_v58  ;;  %3952 = vpow2.f32 %v2235_v12  ;;  %vm2303_vm13 = vcmp.ge.f32.partialorder %v6165_v30, 0.0 }
 0x2f4   : > { %v1985_v4 = vmul.f32 %v6215_v13, %v1953_v23  ;;  %vm2306_vm14 = vcmp.ge.f32.partialorder %v6186_v48, 0.0  ;;  %vm2304_vm15 = vcmp.ge.f32.partialorder %v6192_v18, 0.0  ;;  %v2400_v35 = vmul.f32 0.5, %v6178_v31  ;;  %v6760_v31 = vld [vmem:[#allocation19_spill] sm:$0xff] }
 0x2f5   : > { %3508 = vmatpush3.bf16.msra.mxu0 %v3697_v53  ;;  %v6271_v49 = vpop.eup %3944  ;;  %v6747_v53 = vld [vmem:[#allocation56_spill] sm:$0xff]  ;;  %v6757_v48 = vpack.c.bf16 %v6256_v56, %v6228_v15  ;;  %v6758_v18 = vpack.c.bf16 %v6233_v11, %v6225_v16  ;;  %v6763_v15 = vpack.c.bf16 %v6725_v9, %v6724_v39  ;;  %v6764_v56 = vpack.c.bf16 %v6727_v7, %v6726_v19  ;;  %v6775_v9 = vld [vmem:[#allocation27_spill] sm:$0xff] }
 0x2f6   : > { %3509 = vmatprep.subr.bf16.mxu0 %v3698_v21  ;;  %v3235_v8 = vadd.f32 -0.28449672, %v1985_v4  ;;  %v1855_v62 = vmul.f32 1.0614054, %v6271_v49  ;;  %v6749_v4 = vld [vmem:[#allocation12_spill] sm:$0xff]  ;;  %v6765_v16 = vpack.c.bf16 %v6729_v57, %v6728_v52  ;;  %v6778_v7 = vpack.c.bf16 %v6739_v37, %v6738_v14  ;;  %v6779_v52 = vld [vmem:[#allocation53_spill] sm:$0xff] }
 0x2f7   : > { %v6766_v11 = vld [vmem:[#allocation28_spill] sm:$0xff]  ;;  %v6787_v37 = vpack.c.bf16 %v6749_v4, %v6748_v17 }
 0x2f8   : > { %3478 = vmatmul.mubr.bf16.gmra.mrb[8].mxu0 %v2440_v43  ;;  %v3947_v61 = vpop.eup %3946  ;;  %v3201_v6 = vadd.f32 -1.4531521, %v1855_v62  ;;  %v2049_v41 = vmul.f32 %v6215_v13, %v3235_v8  ;;  %v2237_v8 = vmul.f32 1.442695, %v2176_v25  ;;  %v6780_v57 = vld [vmem:[#allocation52_spill] sm:$0xff] }
 0x2f9   : > { %3481 = vmatprep.mubr.bf16.mxu0 %v2441_v33  ;;  %3510 = vmatpush3.bf16.msra.mxu0 %v3698_v21  ;;  %v3949_v5 = vpop.eup %3948  ;;  %v1858_v47 = vmul.f32 1.0614054, %v3947_v61  ;;  %v2241_v33 = vmul.f32 1.442695, %v2178_v26  ;;  %v6753_v26 = vpack.c.bf16 %v6065_v59, %v6024_v29  ;;  %v6788_v14 = vld [vmem:[#allocation48_spill] sm:$0xff] }
 0x2fa   : > { %3511 = vmatprep.subr.bf16.mxu0 %v3699_v24  ;;  %v1919_v62 = vmul.f32 %v6271_v49, %v3201_v6  ;;  %v1856_v23 = vmul.f32 1.0614054, %v3949_v5  ;;  %v2081_v27 = vadd.f32 0.2548296, %v2049_v41 }
 0x2fb   : > { %v3204_v10 = vadd.f32 -1.4531521, %v1858_v47  ;;  %3954 = vpow2.f32 %v2241_v33  ;;  %v6755_v33 = vpack.c.bf16 %v6204_v63, %v6189_v28  ;;  %v2402_v28 = vmul.f32 0.5, %v6171_v0 }
 0x2fc   : > { %v1951_v2 = vadd.f32 1.4214138, %v1919_v62  ;;  %v3202_v21 = vadd.f32 -1.4531521, %v1856_v23  ;;  %v2113_v41 = vmul.f32 %v6215_v13, %v2081_v27  ;;  %3956 = vpow2.f32 %v2237_v8  ;;  %v3951_v23 = vpop.eup %3950 }
 0x2fd   : > { %3512 = vmatpush3.bf16.msra.mxu0 %v3699_v24  ;;  %v1922_v34 = vmul.f32 %v3947_v61, %v3204_v10  ;;  %v3953_v59 = vpop.eup %3952  ;;  %v6754_v13 = vpack.c.bf16 %v6043_v55, %v6014_v50  ;;  %v2401_v50 = vmul.f32 0.5, %v6110_v44 }
 0x2fe   : > { %3513 = vmatprep.subr.bf16.mxu0 %v3700_v1  ;;  %v1983_v58 = vmul.f32 %v6271_v49, %v1951_v2  ;;  %v1920_v36 = vmul.f32 %v3949_v5, %v3202_v21  ;;  %v2273_v62 = vmul.f32 %v3951_v23, %v2113_v41  ;;  %v6756_v41 = vpack.c.bf16 %v6201_v38, %v6133_v54  ;;  %v6761_v38 = vld [vmem:[#allocation18_spill] sm:$0xff]  ;;  %v6769_v23 = vld [vmem:[#allocation20_spill] sm:$0xff] }
 0x2ff   : > { %v1954_v43 = vadd.f32 1.4214138, %v1922_v34  ;;  %v6759_v54 = vpack.c.bf16 %v6723_v32, %v6722_v60  ;;  %v6767_v60 = vld [vmem:[#allocation45_spill] sm:$0xff] }
 0x300   : > { %3482 = vmatmul.mubr.bf16.gmra.mrb[12].mxu0 %v6752_v40  ;;  %v3233_v6 = vadd.f32 -0.28449672, %v1983_v58  ;;  %v1952_v47 = vadd.f32 1.4214138, %v1920_v36  ;;  %v2337_v21 = vsub.f32 2.0, %v2273_v62  ;;  %v6768_v32 = vpack.c.bf16 %v6766_v11, %v6767_v60 }
 0x301   : > { %3485 = vmatprep.mubr.bf16.mxu0 %v6753_v26  ;;  %3514 = vmatpush3.bf16.msra.mxu0 %v3700_v1  ;;  %v1986_v24 = vmul.f32 %v3947_v61, %v1954_v43 }
 0x302   : > { %3515 = vmatprep.subr.bf16.mxu0 %v3701_v45  ;;  %v2047_v12 = vmul.f32 %v6271_v49, %v3233_v6  ;;  %v1984_v34 = vmul.f32 %v3949_v5, %v1952_v47  ;;  %v2369_v47 = vsel %vm2305_vm12, %v2337_v21, %v2273_v62  ;;  %v6772_v62 = vld [vmem:[#allocation34_spill] sm:$0xff] }
 0x303   : > { %v3236_v25 = vadd.f32 -0.28449672, %v1986_v24  ;;  %v2433_v44 = vmul.f32 %v2401_v50, %v2369_v47 }
 0x304   : > { %v2079_v20 = vadd.f32 0.2548296, %v2047_v12  ;;  %v3234_v46 = vadd.f32 -0.28449672, %v1984_v34 }
 0x305   : > { %3516 = vmatpush3.bf16.msra.mxu0 %v3701_v45  ;;  %v2050_v10 = vmul.f32 %v3947_v61, %v3236_v25  ;;  %v3955_v45 = vpop.eup %3954  ;;  %v6762_v25 = vpack.c.bf16 %v6760_v31, %v6761_v38 }
 0x306   : > { %v2111_v2 = vmul.f32 %v6271_v49, %v2079_v20  ;;  %v2048_v29 = vmul.f32 %v3949_v5, %v3234_v46  ;;  %v3957_v40 = vpop.eup %3956  ;;  %v6770_v20 = vld [vmem:[#allocation17_spill] sm:$0xff] }
 0x307   : > { %v2082_v1 = vadd.f32 0.2548296, %v2050_v10  ;;  %v6771_v46 = vpack.c.bf16 %v6769_v23, %v6770_v20  ;;  %v6773_v10 = vld [vmem:[#allocation15_spill] sm:$0xff] }
 0x308   : > { %3486 = vmatmul.mubr.bf16.gmra.mrb[16].mxu0 %v6754_v13  ;;  %v2271_v27 = vmul.f32 %v3953_v59, %v2111_v2  ;;  %v2080_v43 = vadd.f32 0.2548296, %v2048_v29  ;;  %v6774_v39 = vpack.c.bf16 %v6772_v62, %v6773_v10  ;;  %v6776_v2 = vld [vmem:[#allocation50_spill] sm:$0xff]  ;;  %v6781_v29 = vpack.c.bf16 %v6779_v52, %v6780_v57  ;;  %v6784_v13 = vld [vmem:[#allocation55_spill] sm:$0xff] }
 0x309   : > { %3489 = vmatprep.mubr.bf16.mxu0 %v6755_v33  ;;  %v2114_v8 = vmul.f32 %v3947_v61, %v2082_v1  ;;  %v2399_v61 = vmul.f32 0.5, %v6147_v51  ;;  %v6777_v19 = vpack.c.bf16 %v6775_v9, %v6776_v2  ;;  %v6782_v59 = vld [vmem:[#allocation30_spill] sm:$0xff]  ;;  %v6789_v33 = vld [vmem:[#allocation43_spill] sm:$0xff] }
 0x30a   : > { %v2335_v58 = vsub.f32 2.0, %v2271_v27  ;;  %v2112_v36 = vmul.f32 %v3949_v5, %v2080_v43  ;;  %v6783_v1 = vpack.c.bf16 %v6743_v42, %v6782_v59  ;;  %v6786_v43 = vpack.c.bf16 %v6747_v53, %v6746_v3  ;;  %v6386_v42 = vld [vmem:[%s6509_s4] ss:$0 sm:$0xff] }
 0x30b   : > { %v2274_v49 = vmul.f32 %v3955_v45, %v2114_v8  ;;  %v6790_v21 = vpack.c.bf16 %v6788_v14, %v6789_v33 }
 0x30c   : > { %v2272_v6 = vmul.f32 %v3957_v40, %v2112_v36  ;;  %v2367_v26 = vsel %vm2303_vm13, %v2335_v58, %v2271_v27  ;;  %v6785_v27 = vpack.c.bf16 %v6745_v22, %v6784_v13 }
 0x30d   : > { %v2338_v55 = vsub.f32 2.0, %v2274_v49  ;;  %v2431_v0 = vmul.f32 %v2399_v61, %v2367_v26 }
 0x30e   : > { %v2336_v63 = vsub.f32 2.0, %v2272_v6 }
 0x30f   : > { %v2370_v5 = vsel %vm2306_vm14, %v2338_v55, %v2274_v49 }
 0x310   : > { %3490 = vmatmul.mubr.bf16.gmra.mrb[20].mxu0 %v6756_v41  ;;  %v2434_v30 = vmul.f32 %v2402_v28, %v2370_v5  ;;  %v2368_v24 = vsel %vm2304_vm15, %v2336_v63, %v2272_v6 }
 0x311   : > { %3493 = vmatprep.mubr.bf16.mxu0 %v6757_v48  ;;  %v2432_v12 = vmul.f32 %v2400_v35, %v2368_v24 }
 0x312   : > { %v2450_v34 = vpack.c.bf16 %v2434_v30, %v2433_v44 }
 0x313   : > { %v2449_v51 = vpack.c.bf16 %v2432_v12, %v2431_v0 }
 0x318   : > { %3494 = vmatmul.mubr.bf16.gmra.mrb[24].mxu0 %v6758_v18 }
 0x319   : > { %3497 = vmatprep.mubr.bf16.mxu0 %v2449_v51 }
 0x320   : > { %3498 = vmatmul.mubr.bf16.gmra.mrb[28].mxu0 %v2450_v34 }
 0x321   : > { %3517 = vmatprep.mubr.bf16.mxu0 %v6759_v54 }
 0x328   : > { %3518 = vmatmul.mubr.bf16.vlgmr.msra.gmra.mrb[0].mxu0 %v6762_v25 }
 0x329   : > { %3521 = vmatprep.mubr.bf16.mxu0 %v6763_v15 }
 0x330   : > { %3522 = vmatmul.mubr.bf16.gmra.mrb[4].mxu0 %v6764_v56 }
 0x331   : > { %3525 = vmatprep.mubr.bf16.mxu0 %v6765_v16 }
 0x338   : > { %3526 = vmatmul.mubr.bf16.gmra.mrb[8].mxu0 %v6768_v32 }
 0x339   : > { %3529 = vmatprep.mubr.bf16.mxu0 %v6771_v46 }
 0x340   : > { %3530 = vmatmul.mubr.bf16.gmra.mrb[12].mxu0 %v6774_v39 }
 0x341   : > { %3533 = vmatprep.mubr.bf16.mxu0 %v6777_v19 }
 0x348   : > { %3534 = vmatmul.mubr.bf16.gmra.mrb[16].mxu0 %v6778_v7 }
 0x349   : > { %3537 = vmatprep.mubr.bf16.mxu0 %v6781_v29 }
 0x350   : > { %3538 = vmatmul.mubr.bf16.gmra.mrb[20].mxu0 %v6783_v1 }
 0x351   : > { %3541 = vmatprep.mubr.bf16.mxu0 %v6785_v27 }
 0x358   : > { %3542 = vmatmul.mubr.bf16.gmra.mrb[24].mxu0 %v6786_v43 }
 0x359   : > { %3545 = vmatprep.mubr.bf16.mxu0 %v6787_v37 }
 0x360   : > { %3546 = vmatmul.mubr.bf16.gmra.mrb[28].mxu0 %v6790_v21 }
 0x3fb   : > { %v3519_v22 = vpop.f32.mrb[0].mxu0 }
 0x3fc   : > { %v2894_v8 = vadd.f32 %v3519_v22, %v6386_v42  ;;  %v2758_v45 = vpop.f32.mrb[1].mxu0 }
 0x3fd   : > { %v2892_v53 = vadd.f32 %v6386_v42, %v2758_v45  ;;  %v3520_v3 = vpop.f32.mrb[2].mxu0 }
 0x3fe   : > { %2926 = vst [vmem:[%s6390_s7 + $0x10] sm:$0xff] %v2894_v8  ;;  %v2895_v17 = vadd.f32 %v3520_v3, %v6386_v42  ;;  %v2761_v4 = vpop.f32.mrb[3].mxu0 }
 0x3ff   : > { %2924 = vst [vmem:[%s6390_s7] sm:$0xff] %v2892_v53  ;;  %v2893_v58 = vadd.f32 %v6386_v42, %v2761_v4 }
 0x400   : > { %2927 = vst [vmem:[%s6390_s7 + $0x18] sm:$0xff] %v2895_v17 }
 0x401   : > { %2925 = vst [vmem:[%s6390_s7 + $0x8] sm:$0xff] %v2893_v58 }
 0x403   : > { %v3523_v36 = vpop.f32.mrb[4].mxu0 }
 0x404   : > { %v2898_v40 = vadd.f32 %v3523_v36, %v6386_v42  ;;  %v2774_v49 = vpop.f32.mrb[5].mxu0 }
 0x405   : > { %v2896_v6 = vadd.f32 %v6386_v42, %v2774_v49  ;;  %v3524_v47 = vpop.f32.mrb[6].mxu0 }
 0x406   : > { %2930 = vst [vmem:[%s6390_s7 + $0x30] sm:$0xff] %v2898_v40  ;;  %v2899_v50 = vadd.f32 %v3524_v47, %v6386_v42  ;;  %v2777_v55 = vpop.f32.mrb[7].mxu0 }
 0x407   : > { %2928 = vst [vmem:[%s6390_s7 + $0x20] sm:$0xff] %v2896_v6  ;;  %v2897_v26 = vadd.f32 %v6386_v42, %v2777_v55 }
 0x408   : > { %2931 = vst [vmem:[%s6390_s7 + $0x38] sm:$0xff] %v2899_v50 }
 0x409   : > { %2929 = vst [vmem:[%s6390_s7 + $0x28] sm:$0xff] %v2897_v26 }
 0x40b   : > { %v3527_v28 = vpop.f32.mrb[8].mxu0 }
 0x40c   : > { %v2902_v63 = vadd.f32 %v3527_v28, %v6386_v42  ;;  %v2790_v61 = vpop.f32.mrb[9].mxu0 }
 0x40d   : > { %v2900_v5 = vadd.f32 %v6386_v42, %v2790_v61  ;;  %v3528_v35 = vpop.f32.mrb[10].mxu0 }
 0x40e   : > { %2934 = vst [vmem:[%s6390_s7 + $0x50] sm:$0xff] %v2902_v63  ;;  %v2903_v41 = vadd.f32 %v3528_v35, %v6386_v42  ;;  %v2793_v44 = vpop.f32.mrb[11].mxu0 }
 0x40f   : > { %2932 = vst [vmem:[%s6390_s7 + $0x40] sm:$0xff] %v2900_v5  ;;  %v2901_v30 = vadd.f32 %v6386_v42, %v2793_v44 }
 0x410   : > { %2935 = vst [vmem:[%s6390_s7 + $0x58] sm:$0xff] %v2903_v41 }
 0x411   : > { %2933 = vst [vmem:[%s6390_s7 + $0x48] sm:$0xff] %v2901_v30 }
 0x413   : > { %v3531_v24 = vpop.f32.mrb[12].mxu0 }
 0x414   : > { %v2906_v48 = vadd.f32 %v3531_v24, %v6386_v42  ;;  %v2806_v0 = vpop.f32.mrb[13].mxu0 }
 0x415   : > { %v2904_v12 = vadd.f32 %v6386_v42, %v2806_v0  ;;  %v3532_v34 = vpop.f32.mrb[14].mxu0 }
 0x416   : > { %2938 = vst [vmem:[%s6390_s7 + $0x70] sm:$0xff] %v2906_v48  ;;  %v2907_v51 = vadd.f32 %v3532_v34, %v6386_v42  ;;  %v2809_v18 = vpop.f32.mrb[15].mxu0 }
 0x417   : > { %2936 = vst [vmem:[%s6390_s7 + $0x60] sm:$0xff] %v2904_v12  ;;  %v2905_v54 = vadd.f32 %v6386_v42, %v2809_v18 }
 0x418   : > { %2939 = vst [vmem:[%s6390_s7 + $0x78] sm:$0xff] %v2907_v51 }
 0x419   : > { %2937 = vst [vmem:[%s6390_s7 + $0x68] sm:$0xff] %v2905_v54 }
 0x41b   : > { %v3535_v31 = vpop.f32.mrb[16].mxu0 }
 0x41c   : > { %v2910_v38 = vadd.f32 %v3535_v31, %v6386_v42  ;;  %v2822_v25 = vpop.f32.mrb[17].mxu0 }
 0x41d   : > { %v2908_v15 = vadd.f32 %v6386_v42, %v2822_v25  ;;  %v3536_v56 = vpop.f32.mrb[18].mxu0 }
 0x41e   : > { %2942 = vst [vmem:[%s6390_s7 + $0x90] sm:$0xff] %v2910_v38  ;;  %v2911_v16 = vadd.f32 %v3536_v56, %v6386_v42  ;;  %v2825_v11 = vpop.f32.mrb[19].mxu0 }
 0x41f   : > { %2940 = vst [vmem:[%s6390_s7 + $0x80] sm:$0xff] %v2908_v15  ;;  %v2909_v60 = vadd.f32 %v6386_v42, %v2825_v11 }
 0x420   : > { %2943 = vst [vmem:[%s6390_s7 + $0x98] sm:$0xff] %v2911_v16 }
 0x421   : > { %2941 = vst [vmem:[%s6390_s7 + $0x88] sm:$0xff] %v2909_v60 }
 0x423   : > { %v3539_v32 = vpop.f32.mrb[20].mxu0 }
 0x424   : > { %v2914_v23 = vadd.f32 %v3539_v32, %v6386_v42  ;;  %v2838_v20 = vpop.f32.mrb[21].mxu0 }
 0x425   : > { %v2912_v46 = vadd.f32 %v6386_v42, %v2838_v20  ;;  %v3540_v62 = vpop.f32.mrb[22].mxu0 }
 0x426   : > { %2946 = vst [vmem:[%s6390_s7 + $0xb0] sm:$0xff] %v2914_v23  ;;  %v2915_v10 = vadd.f32 %v3540_v62, %v6386_v42  ;;  %v2841_v39 = vpop.f32.mrb[23].mxu0 }
 0x427   : > { %2944 = vst [vmem:[%s6390_s7 + $0xa0] sm:$0xff] %v2912_v46  ;;  %v2913_v9 = vadd.f32 %v6386_v42, %v2841_v39 }
 0x428   : > { %2947 = vst [vmem:[%s6390_s7 + $0xb8] sm:$0xff] %v2915_v10 }
 0x429   : > { %2945 = vst [vmem:[%s6390_s7 + $0xa8] sm:$0xff] %v2913_v9 }
 0x42b   : > { %v3543_v2 = vpop.f32.mrb[24].mxu0 }
 0x42c   : > { %v2918_v19 = vadd.f32 %v3543_v2, %v6386_v42  ;;  %v2854_v7 = vpop.f32.mrb[25].mxu0 }
 0x42d   : > { %v2916_v52 = vadd.f32 %v6386_v42, %v2854_v7  ;;  %v3544_v57 = vpop.f32.mrb[26].mxu0 }
 0x42e   : > { %2950 = vst [vmem:[%s6390_s7 + $0xd0] sm:$0xff] %v2918_v19  ;;  %v2919_v29 = vadd.f32 %v3544_v57, %v6386_v42  ;;  %v2857_v59 = vpop.f32.mrb[27].mxu0 }
 0x42f   : > { %2948 = vst [vmem:[%s6390_s7 + $0xc0] sm:$0xff] %v2916_v52  ;;  %v2917_v1 = vadd.f32 %v6386_v42, %v2857_v59 }
 0x430   : > { %2951 = vst [vmem:[%s6390_s7 + $0xd8] sm:$0xff] %v2919_v29 }
 0x431   : > { %2949 = vst [vmem:[%s6390_s7 + $0xc8] sm:$0xff] %v2917_v1 }
 0x433   : > { %v3547_v13 = vpop.f32.mrb[28].mxu0 }
 0x434   : > { %v2922_v27 = vadd.f32 %v3547_v13, %v6386_v42  ;;  %v2870_v43 = vpop.f32.mrb[29].mxu0 }
 0x435   : > { %v2920_v37 = vadd.f32 %v6386_v42, %v2870_v43  ;;  %v3548_v14 = vpop.f32.mrb[30].mxu0 }
 0x436   : > { %2954 = vst [vmem:[%s6390_s7 + $0xf0] sm:$0xff] %v2922_v27  ;;  %v2923_v33 = vadd.f32 %v3548_v14, %v6386_v42  ;;  %v2873_v21 = vpop.f32.mrb[31].mxu0 }
 0x437   : > { %2952 = vst [vmem:[%s6390_s7 + $0xe0] sm:$0xff] %v2920_v37  ;;  %v2921_v22 = vadd.f32 %v6386_v42, %v2873_v21 }
 0x438   : > { %2955 = vst [vmem:[%s6390_s7 + $0xf8] sm:$0xff] %v2923_v33 }
 0x439   : > { %2953 = vst [vmem:[%s6390_s7 + $0xe8] sm:$0xff] %v2921_v22 }
 0x43a   : > { %4060 = shalt.err (!%p4057_p2)
}
 0x43b   : > { %s4061_s14 = scalar_lea.hbm %s6455_s26, 4096  ;;  %s4065_s11 = scalar_lea.hbm %s6510_s5, 8192 }
 0x43c   : > { %p4062_p13 = scmp.ne.s32.totalorder %s6455_s26, %s4061_s14  ;;  %p4066_p4 = scmp.lt.u32.totalorder %s6455_s26, %s6510_s5 }
 0x43d   : > { %p4067_p7 = scmp.lt.u32.totalorder %s4065_s11, %s4061_s14  ;;  %p4069_p11 = scmp.lt.u32.totalorder %s4061_s14, %s6455_s26 }
 0x43e   : > { %p4063_p6 = pnand %p4062_p13, %p6791_p0 }
 0x43f   : > { %p4068_p8 = por %p4067_p7, %p4066_p4 }
 0x440   : > { %p4064_p10 = pneg %p4063_p6 }
 0x441   : > { %p4070_p1 = por %p4069_p11, %p4068_p8 }
 0x443   : > { %p4071_p3 = pnand %p4070_p1, %p4064_p10 }
 0x445   : > { %4074 = shalt.err (!%p4071_p3)
}
 0x446   : > { %s4127_s6 = smov 128   ;;  %s4128_s9 = smov 8  }
 0x447   : > { %3591 = dma.vmem_to_hbm [thread:$0]  (%p6791_p0), %s6457_s8, 4096, %s6455_s26, %s2957_s22, %s4127_s6, %s4127_s6, %s4128_s9  }
 0x448 PF: > { %s2985_s24 = sand.u32 1, %s4105_s18   ;;  %p6792_p5 = scmp.ne.s32.totalorder %s6564_s25, 0 }
 0x449   : > { %p6793_p9 = scmp.ge.s32.totalorder %s4117_s21, 2  ;;  %s2986_s12 = scalar_lea.sflag [#allocation4], %s2985_s24 }
 0x44b   : > { %p3605_p12 = pnand %p6793_p9, %p6792_p5 }
 0x44d   : > { %4100 = dma.done.wait (!%p3605_p12), %s2986_s12, 4096  }
 0x44e   : > { %4102 = vsyncadd (!%p3605_p12), %s2986_s12, 4294963200  ;;  %p19_p2 = scmp.ge.s32.totalorder %s4272_s16, 4   ;;  %s6794_s18 = smov %s4109_s19 }
 0x44f   : > { %s6795_s19 = smov %s4113_s20  ;;  %s6796_s20 = smov %s4281_s27 }
 0x450   : > { %s6797_s21 = smov %s4272_s16  ;;  %21 = sbr.rel (!%p19_p2) target bundleno = 6 (0x6), region = 93 }
 0x457   :  { %2991 = vsyncpa [#allocation3], 1 }
 0x458   :  { %2993 = vsyncpa [#allocation3 + $0x1], 1 }
 0x459   :  { %2994 = vsyncpa [#allocation6], 1 }
 0x45a   :  { %2995 = vsyncpa [#allocation4], 1 }
 0x45b   :  { %2997 = vsyncpa [#allocation4 + $0x1], 1 }

</bundles_post_ra>
